<compile_context>
chip_gen: v5e
topology: v5e:2x2
jax: 0.10.0
libtpu: 0.0.40
codegen_flags: <defaults>
</compile_context>

<pallas_src>
import functools
import math

import jax
import jax.numpy as jnp
from jax import lax
from jax.experimental import pallas as pl
from jax.experimental.pallas import tpu as pltpu

VMEM_SPEC = pl.BlockSpec(memory_space=pltpu.MemorySpace.VMEM)


# ----------------------------- fused MLP + WITRAN + heads kernel --------------------------
def _fused_kernel(bn, row, col, hdim,
                  x_ref, xmask_ref, bmask_ref, w3_ref, b3_ref, w4_ref, b4_ref,
                  wx_ref, wrc_ref, bw_ref, wh_ref, bh_ref, out_ref):
    f32, bf16 = jnp.float32, jnp.bfloat16
    H = hdim
    t_len = row + col - 1                       # Water2sea_slice_len
    r_tot = col * bn                            # Water2sea_slice_num * batch

    # ---- fc3 -> ReLU (K = C is tiny; one cheap MXU staging, exact f32) ----
    hmid = jnp.dot(x_ref[...], w3_ref[...], preferred_element_type=f32) + b3_ref[...]
    hmid = jnp.maximum(hmid, 0.0)                                    # (T*R, 4H)

    # ---- fc4 on the MXU (bf16 operands, f32 accumulation) ----
    xh = jnp.dot(hmid.astype(bf16), w4_ref[...],
                 preferred_element_type=f32) + b4_ref[...]           # (T*R, H)

    # ---- zero the diagonal-shift padding rows, hoisted x @ W_x, fused bias epilogue ----
    xh = xh * xmask_ref[...]                                         # (T*R, H) * (T*R, 1)
    xproj = jnp.dot(xh.astype(bf16), wx_ref[...],
                    preferred_element_type=f32)                      # (T*R, 6H), M = T*R
    xproj = xproj + bmask_ref[...] * bw_ref[...]                     # WITRAN bias, hoisted

    wrc = wrc_ref[...]                                               # (2H, 6H) bf16
    hr = jnp.zeros((r_tot, H), f32)
    hc = jnp.zeros((r_tot, H), f32)
    hr_last = hc_last = None
    for t in range(t_len):                                           # static unroll (T small)
        gate = jnp.dot(jnp.concatenate([hr, hc], axis=-1).astype(bf16), wrc,
                       preferred_element_type=f32) + xproj[t * r_tot:(t + 1) * r_tot]
        sig = jax.nn.sigmoid(gate[:, :4 * H])
        tnh = jnp.tanh(gate[:, 4 * H:])
        u_r = sig[:, 0 * H:1 * H]
        o_r = sig[:, 1 * H:2 * H]
        u_c = sig[:, 2 * H:3 * H]
        o_c = sig[:, 3 * H:4 * H]
        i_r = tnh[:, :H]
        i_c = tnh[:, H:]
        hr = jnp.tanh((1.0 - u_r) * hr + u_r * i_r) * o_r
        hc_new = jnp.tanh((1.0 - u_c) * hc + u_c * i_c) * o_c
        if t == t_len - 1:
            # only the last bn rows feed the heads, read BEFORE the roll
            hr_last = hr[(col - 1) * bn:]
            hc_last = hc_new[(col - 1) * bn:]
        else:
            # torch.roll(hidden_slice_col, shifts=bn, dims=0): out[i] = in[(i - bn) % R]
            hc = jnp.concatenate([hc_new[r_tot - bn:], hc_new[:r_tot - bn]], axis=0)

    # ---- fused heads: 0.5 * fc1(hc_last) + 0.5 * fc2(hr_last) as a VPU/XLU matvec ----
    hcat = jnp.concatenate([hc_last, hr_last], axis=-1)              # (BN, 2H)
    out = 0.5 * jnp.sum(hcat * wh_ref[...], axis=-1, keepdims=True) + bh_ref[...]
    out_ref[...] = out.astype(out_ref.dtype)


# ----------------------------- wrapper ------------------------------------------------------
def vae_witran_forward(params, x, pad_mask=None, *, row, col):
    """x: (B, N, L, C) like the PyTorch 4-D input. Eval mode, signal=None, type='reg'.
    pad_mask is accepted for signature parity but (as in the PyTorch forward) unused."""
    del pad_mask
    bsz, n, l, c = x.shape
    bn = bsz * n
    h = params['w4'].shape[1]
    t_len = row + col - 1
    r_tot = col * bn

    # Tiny trace-time prep: time-major gather of the RAW input (~1 KB, one XLA gather with
    # constant indices) + validity / bias masks for the WITRAN diagonal shift.
    # Row (t*R + cc*BN + b) of x_tm corresponds to x[b, (t-cc)*col + cc, :] when
    # 0 <= t-cc < row, else a zero row.  Bias is applied to rows with cc <= t for t < col.
    x2d = x.reshape(bn * l, c)
    x_pad = jnp.concatenate([x2d, jnp.zeros((1, c), x2d.dtype)], axis=0)
    idx, xmask, bmask = [], [], []
    for t in range(t_len):
        for cc in range(col):
            r_idx = t - cc
            ok = 0 <= r_idx < row
            bias_on = (t < col) and (cc <= t)
            for b in range(bn):
                idx.append(b * l + r_idx * col + cc if ok else bn * l)
                xmask.append(1.0 if ok else 0.0)
                bmask.append(1.0 if bias_on else 0.0)
    x_tm = jnp.take(x_pad, jnp.asarray(idx, jnp.int32), axis=0)            # (T*R, C)
    xmask_a = jnp.asarray(xmask, jnp.float32).reshape(t_len * r_tot, 1)    # (T*R, 1)
    bmask_a = jnp.asarray(bmask, jnp.float32).reshape(t_len * r_tot, 1)    # (T*R, 1)

    # Weight prep (tiny, constant-ish under jit): stack / transpose / bf16 cast.
    wt = params['W_first'].T                                               # (3H, 6H)
    wrc = wt[:2 * h].astype(jnp.bfloat16)          # [W_row; W_col] for concat([hr, hc])
    wx = wt[2 * h:].astype(jnp.bfloat16)           # (H, 6H)
    w4 = params['w4'].astype(jnp.bfloat16)         # (4H, H)
    w_head = jnp.concatenate([params['w1'], params['w2']], axis=0).T       # (1, 2H)
    b_head = (0.5 * (params['b1'][0] + params['b2'][0])).reshape(1, 1)     # (1, 1)
    b_wit = params['B_wit'][0].reshape(1, -1)                              # (1, 6H)

    kernel = functools.partial(_fused_kernel, bn, row, col, h)
    out = pl.pallas_call(
        kernel,
        out_shape=jax.ShapeDtypeStruct((bn, 1), jnp.float32),
        in_specs=[VMEM_SPEC] * 12,
        out_specs=VMEM_SPEC,
    )(x_tm, xmask_a, bmask_a, params['w3'], params['b3'], w4, params['b4'],
      wx, wrc, b_wit, w_head, b_head)
    return out.reshape(bsz, n)                                             # squeeze + view(B, N)


# ----------------------------- pure-JAX f32 reference (for verification) --------------------
def reference_forward(params, x, row, col):
    hp = lax.Precision.HIGHEST
    bsz, n, l, c = x.shape
    bn = bsz * n
    h = params['w4'].shape[1]
    x2 = x.reshape(bn, l, c)
    hm = jax.nn.relu(jnp.einsum('blc,ck->blk', x2, params['w3'], precision=hp) + params['b3'])
    xh = jnp.einsum('blk,kh->blh', hm, params['w4'], precision=hp) + params['b4']
    xh = xh.reshape(bn, row, col, h)
    t_len = row + col - 1
    r_tot = col * bn
    inp = jnp.transpose(xh, (2, 0, 1, 3))
    it = jnp.zeros((col, bn, t_len, h), jnp.float32)
    for rr in range(col):
        it = it.at[rr, :, rr:rr + row, :].set(inp[rr])
    a = it.reshape(r_tot, t_len, h)
    w = params['W_first']
    bias = params['B_wit'][0]
    hr = jnp.zeros((r_tot, h), jnp.float32)
    hc = jnp.zeros((r_tot, h), jnp.float32)
    hr_last = hc_last = None
    for t in range(t_len):
        cat = jnp.concatenate([hr, hc, a[:, t, :]], axis=-1)
        gate = jnp.einsum('rk,gk->rg', cat, w, precision=hp)
        if t < col:
            gate = gate.at[:bn * (t + 1), :].add(bias)
        sig = jax.nn.sigmoid(gate[:, :4 * h])
        tnh = jnp.tanh(gate[:, 4 * h:])
        u_r, o_r, u_c, o_c = jnp.split(sig, 4, axis=-1)
        i_r, i_c = jnp.split(tnh, 2, axis=-1)
        hr = jnp.tanh((1 - u_r) * hr + u_r * i_r) * o_r
        hc = jnp.tanh((1 - u_c) * hc + u_c * i_c) * o_c
        if t == t_len - 1:
            hr_last = hr[(col - 1) * bn:]
            hc_last = hc[(col - 1) * bn:]
        hc = jnp.roll(hc, bn, axis=0)
    out = (0.5 * (hc_last @ params['w1'] + params['b1'])
           + 0.5 * (hr_last @ params['w2'] + params['b2']))
    return out.reshape(bsz, n)


if __name__ == "__main__":
    # configs: C=4, L=8, hidden_size=128, row=4, col=2, num_layers=1, dropout=0, type='reg'
    B, N, L, C = 2, 4, 8, 4
    H = 128
    ROW, COL = 4, 2
    assert ROW * COL == L and ROW >= COL

    key = jax.random.PRNGKey(0)
    ks = jax.random.split(key, 12)

    def unif(k, shape, bound):
        return jax.random.uniform(k, shape, jnp.float32, minval=-bound, maxval=bound)

    stdv = 1.0 / math.sqrt(H)
    params = dict(
        w3=unif(ks[0], (C, 4 * H), 1.0 / math.sqrt(C)),        # fc3.weight.T
        b3=unif(ks[1], (1, 4 * H), 1.0 / math.sqrt(C)),        # fc3.bias
        w4=unif(ks[2], (4 * H, H), 1.0 / math.sqrt(4 * H)),    # fc4.weight.T
        b4=unif(ks[3], (1, H), 1.0 / math.sqrt(4 * H)),        # fc4.bias
        W_first=unif(ks[4], (6 * H, 3 * H), stdv),             # WITRAN W_first_layer
        B_wit=unif(ks[5], (1, 6 * H), stdv),                   # WITRAN B (num_layers=1)
        w1=unif(ks[6], (H, 1), 1.0 / math.sqrt(H)),            # fc1.weight.T
        b1=unif(ks[7], (1,), 1.0 / math.sqrt(H)),              # fc1.bias
        w2=unif(ks[8], (H, 1), 1.0 / math.sqrt(H)),            # fc2.weight.T
        b2=unif(ks[9], (1,), 1.0 / math.sqrt(H)),              # fc2.bias
    )
    x = jax.random.normal(ks[10], (B, N, L, C), jnp.float32)
    # pad_mask is accepted but unused by the PyTorch forward; kept for signature parity.
    pad_mask = jnp.ones((B, N, L), jnp.float32)

    fwd = jax.jit(functools.partial(vae_witran_forward, row=ROW, col=COL))
    out = jax.block_until_ready(fwd(params, x, pad_mask))

    ref = reference_forward(params, x, ROW, COL)
    assert out.shape == (B, N)
    # bf16 MXU operands (f32 accumulation, f32 recurrent state) introduce ~1e-3-scale
    # numerical differences vs. the all-f32 HIGHEST-precision reference; structural bugs
    # would be >=0.05-scale, so 1e-2 still catches them while leaving precision margin.
    assert jnp.allclose(out, ref, rtol=1e-2, atol=1e-2), (out, ref)
    print("KERNEL_OK")
</pallas_src>

<mosaic_0001>
module attributes {stable_mosaic.version = 11 : i64} {
  func.func @_fused_kernel(%arg0: memref<80x4xf32, #tpu.memory_space<vmem>>, %arg1: memref<80x1xf32, #tpu.memory_space<vmem>>, %arg2: memref<80x1xf32, #tpu.memory_space<vmem>>, %arg3: memref<4x512xf32, #tpu.memory_space<vmem>>, %arg4: memref<1x512xf32, #tpu.memory_space<vmem>>, %arg5: memref<512x128xbf16, #tpu.memory_space<vmem>>, %arg6: memref<1x128xf32, #tpu.memory_space<vmem>>, %arg7: memref<128x768xbf16, #tpu.memory_space<vmem>>, %arg8: memref<256x768xbf16, #tpu.memory_space<vmem>>, %arg9: memref<1x768xf32, #tpu.memory_space<vmem>>, %arg10: memref<1x256xf32, #tpu.memory_space<vmem>>, %arg11: memref<1x1xf32, #tpu.memory_space<vmem>>, %arg12: memref<8x1xf32, #tpu.memory_space<vmem>>) attributes {dimension_semantics = [], scalar_prefetch = 0 : i64, scratch_operands = 0 : i64, tpu.core_type = #tpu.core_type<tc>} {
    %c0 = arith.constant 0 : index
    %c0_0 = arith.constant 0 : index
    %0 = vector.load %arg0[%c0, %c0_0] : memref<80x4xf32, #tpu.memory_space<vmem>>, vector<80x4xf32>
    %c0_1 = arith.constant 0 : index
    %c0_2 = arith.constant 0 : index
    %1 = vector.load %arg3[%c0_1, %c0_2] : memref<4x512xf32, #tpu.memory_space<vmem>>, vector<4x512xf32>
    %cst = arith.constant dense<0.000000e+00> : vector<80x512xf32>
    %2 = tpu.matmul %0, %1, %cst {dimension_numbers = #tpu.dot_dimension_numbers<[1], [0], [0], [1], [0, 0, 1, 1], [], []>} : vector<80x4xf32>, vector<4x512xf32>, vector<80x512xf32> -> vector<80x512xf32>
    %c0_3 = arith.constant 0 : index
    %c0_4 = arith.constant 0 : index
    %3 = vector.load %arg4[%c0_3, %c0_4] : memref<1x512xf32, #tpu.memory_space<vmem>>, vector<1x512xf32>
    %4 = vector.broadcast %3 : vector<1x512xf32> to vector<80x512xf32>
    %5 = arith.addf %2, %4 : vector<80x512xf32>
    %cst_5 = arith.constant 0.000000e+00 : f32
    %6 = vector.broadcast %cst_5 : f32 to vector<80x512xf32>
    %7 = arith.maximumf %5, %6 : vector<80x512xf32>
    %8 = arith.truncf %7 : vector<80x512xf32> to vector<80x512xbf16>
    %c0_6 = arith.constant 0 : index
    %c0_7 = arith.constant 0 : index
    %9 = vector.load %arg5[%c0_6, %c0_7] : memref<512x128xbf16, #tpu.memory_space<vmem>>, vector<512x128xbf16>
    %cst_8 = arith.constant dense<0.000000e+00> : vector<80x128xf32>
    %10 = tpu.matmul %8, %9, %cst_8 {dimension_numbers = #tpu.dot_dimension_numbers<[1], [0], [0], [1], [0, 0, 1, 1], [], []>} : vector<80x512xbf16>, vector<512x128xbf16>, vector<80x128xf32> -> vector<80x128xf32>
    %c0_9 = arith.constant 0 : index
    %c0_10 = arith.constant 0 : index
    %11 = vector.load %arg6[%c0_9, %c0_10] : memref<1x128xf32, #tpu.memory_space<vmem>>, vector<1x128xf32>
    %12 = vector.broadcast %11 : vector<1x128xf32> to vector<80x128xf32>
    %13 = arith.addf %10, %12 : vector<80x128xf32>
    %c0_11 = arith.constant 0 : index
    %c0_12 = arith.constant 0 : index
    %14 = vector.load %arg1[%c0_11, %c0_12] : memref<80x1xf32, #tpu.memory_space<vmem>>, vector<80x1xf32>
    %15 = vector.broadcast %14 : vector<80x1xf32> to vector<80x128xf32>
    %16 = arith.mulf %13, %15 : vector<80x128xf32>
    %17 = arith.truncf %16 : vector<80x128xf32> to vector<80x128xbf16>
    %c0_13 = arith.constant 0 : index
    %c0_14 = arith.constant 0 : index
    %18 = vector.load %arg7[%c0_13, %c0_14] : memref<128x768xbf16, #tpu.memory_space<vmem>>, vector<128x768xbf16>
    %cst_15 = arith.constant dense<0.000000e+00> : vector<80x768xf32>
    %19 = tpu.matmul %17, %18, %cst_15 {dimension_numbers = #tpu.dot_dimension_numbers<[1], [0], [0], [1], [0, 0, 1, 1], [], []>} : vector<80x128xbf16>, vector<128x768xbf16>, vector<80x768xf32> -> vector<80x768xf32>
    %c0_16 = arith.constant 0 : index
    %c0_17 = arith.constant 0 : index
    %20 = vector.load %arg2[%c0_16, %c0_17] : memref<80x1xf32, #tpu.memory_space<vmem>>, vector<80x1xf32>
    %c0_18 = arith.constant 0 : index
    %c0_19 = arith.constant 0 : index
    %21 = vector.load %arg9[%c0_18, %c0_19] : memref<1x768xf32, #tpu.memory_space<vmem>>, vector<1x768xf32>
    %22 = vector.broadcast %20 : vector<80x1xf32> to vector<80x768xf32>
    %23 = vector.broadcast %21 : vector<1x768xf32> to vector<80x768xf32>
    %24 = arith.mulf %22, %23 : vector<80x768xf32>
    %25 = arith.addf %19, %24 : vector<80x768xf32>
    %c0_20 = arith.constant 0 : index
    %c0_21 = arith.constant 0 : index
    %26 = vector.load %arg8[%c0_20, %c0_21] : memref<256x768xbf16, #tpu.memory_space<vmem>>, vector<256x768xbf16>
    %cst_22 = arith.constant 0.000000e+00 : f32
    %27 = vector.broadcast %cst_22 : f32 to vector<16x128xf32>
    %cst_23 = arith.constant 0.000000e+00 : f32
    %28 = vector.broadcast %cst_23 : f32 to vector<16x128xf32>
    %29 = tpu.concatenate %27, %28 in 1 : vector<16x128xf32>, vector<16x128xf32> -> vector<16x256xf32>
    %30 = arith.truncf %29 : vector<16x256xf32> to vector<16x256xbf16>
    %cst_24 = arith.constant dense<0.000000e+00> : vector<16x768xf32>
    %31 = tpu.matmul %30, %26, %cst_24 {dimension_numbers = #tpu.dot_dimension_numbers<[1], [0], [0], [1], [0, 0, 1, 1], [], []>} : vector<16x256xbf16>, vector<256x768xbf16>, vector<16x768xf32> -> vector<16x768xf32>
    %32 = vector.extract_strided_slice %25 {offsets = [0, 0], sizes = [16, 768], strides = [1, 1]} : vector<80x768xf32> to vector<16x768xf32>
    %33 = arith.addf %31, %32 : vector<16x768xf32>
    %34 = vector.extract_strided_slice %33 {offsets = [0, 0], sizes = [16, 512], strides = [1, 1]} : vector<16x768xf32> to vector<16x512xf32>
    %35 = arith.negf %34 : vector<16x512xf32>
    %36 = math.exp %35 : vector<16x512xf32>
    %cst_25 = arith.constant 1.000000e+00 : f32
    %37 = vector.broadcast %cst_25 : f32 to vector<16x512xf32>
    %38 = arith.addf %37, %36 : vector<16x512xf32>
    %39 = arith.divf %37, %38 : vector<16x512xf32>
    %40 = vector.extract_strided_slice %33 {offsets = [0, 512], sizes = [16, 256], strides = [1, 1]} : vector<16x768xf32> to vector<16x256xf32>
    %41 = math.tanh %40 : vector<16x256xf32>
    %42 = vector.extract_strided_slice %39 {offsets = [0, 0], sizes = [16, 128], strides = [1, 1]} : vector<16x512xf32> to vector<16x128xf32>
    %43 = vector.extract_strided_slice %39 {offsets = [0, 128], sizes = [16, 128], strides = [1, 1]} : vector<16x512xf32> to vector<16x128xf32>
    %44 = vector.extract_strided_slice %39 {offsets = [0, 256], sizes = [16, 128], strides = [1, 1]} : vector<16x512xf32> to vector<16x128xf32>
    %45 = vector.extract_strided_slice %39 {offsets = [0, 384], sizes = [16, 128], strides = [1, 1]} : vector<16x512xf32> to vector<16x128xf32>
    %46 = vector.extract_strided_slice %41 {offsets = [0, 0], sizes = [16, 128], strides = [1, 1]} : vector<16x256xf32> to vector<16x128xf32>
    %47 = vector.extract_strided_slice %41 {offsets = [0, 128], sizes = [16, 128], strides = [1, 1]} : vector<16x256xf32> to vector<16x128xf32>
    %cst_26 = arith.constant 1.000000e+00 : f32
    %48 = vector.broadcast %cst_26 : f32 to vector<16x128xf32>
    %49 = arith.subf %48, %42 : vector<16x128xf32>
    %50 = arith.mulf %49, %27 : vector<16x128xf32>
    %51 = arith.mulf %42, %46 : vector<16x128xf32>
    %52 = arith.addf %50, %51 : vector<16x128xf32>
    %53 = math.tanh %52 : vector<16x128xf32>
    %54 = arith.mulf %53, %43 : vector<16x128xf32>
    %cst_27 = arith.constant 1.000000e+00 : f32
    %55 = vector.broadcast %cst_27 : f32 to vector<16x128xf32>
    %56 = arith.subf %55, %44 : vector<16x128xf32>
    %57 = arith.mulf %56, %28 : vector<16x128xf32>
    %58 = arith.mulf %44, %47 : vector<16x128xf32>
    %59 = arith.addf %57, %58 : vector<16x128xf32>
    %60 = math.tanh %59 : vector<16x128xf32>
    %61 = arith.mulf %60, %45 : vector<16x128xf32>
    %62 = vector.extract_strided_slice %61 {offsets = [8, 0], sizes = [8, 128], strides = [1, 1]} : vector<16x128xf32> to vector<8x128xf32>
    %63 = vector.extract_strided_slice %61 {offsets = [0, 0], sizes = [8, 128], strides = [1, 1]} : vector<16x128xf32> to vector<8x128xf32>
    %64 = tpu.concatenate %62, %63 in 0 : vector<8x128xf32>, vector<8x128xf32> -> vector<16x128xf32>
    %65 = tpu.concatenate %54, %64 in 1 : vector<16x128xf32>, vector<16x128xf32> -> vector<16x256xf32>
    %66 = arith.truncf %65 : vector<16x256xf32> to vector<16x256xbf16>
    %cst_28 = arith.constant dense<0.000000e+00> : vector<16x768xf32>
    %67 = tpu.matmul %66, %26, %cst_28 {dimension_numbers = #tpu.dot_dimension_numbers<[1], [0], [0], [1], [0, 0, 1, 1], [], []>} : vector<16x256xbf16>, vector<256x768xbf16>, vector<16x768xf32> -> vector<16x768xf32>
    %68 = vector.extract_strided_slice %25 {offsets = [16, 0], sizes = [16, 768], strides = [1, 1]} : vector<80x768xf32> to vector<16x768xf32>
    %69 = arith.addf %67, %68 : vector<16x768xf32>
    %70 = vector.extract_strided_slice %69 {offsets = [0, 0], sizes = [16, 512], strides = [1, 1]} : vector<16x768xf32> to vector<16x512xf32>
    %71 = arith.negf %70 : vector<16x512xf32>
    %72 = math.exp %71 : vector<16x512xf32>
    %cst_29 = arith.constant 1.000000e+00 : f32
    %73 = vector.broadcast %cst_29 : f32 to vector<16x512xf32>
    %74 = arith.addf %73, %72 : vector<16x512xf32>
    %75 = arith.divf %73, %74 : vector<16x512xf32>
    %76 = vector.extract_strided_slice %69 {offsets = [0, 512], sizes = [16, 256], strides = [1, 1]} : vector<16x768xf32> to vector<16x256xf32>
    %77 = math.tanh %76 : vector<16x256xf32>
    %78 = vector.extract_strided_slice %75 {offsets = [0, 0], sizes = [16, 128], strides = [1, 1]} : vector<16x512xf32> to vector<16x128xf32>
    %79 = vector.extract_strided_slice %75 {offsets = [0, 128], sizes = [16, 128], strides = [1, 1]} : vector<16x512xf32> to vector<16x128xf32>
    %80 = vector.extract_strided_slice %75 {offsets = [0, 256], sizes = [16, 128], strides = [1, 1]} : vector<16x512xf32> to vector<16x128xf32>
    %81 = vector.extract_strided_slice %75 {offsets = [0, 384], sizes = [16, 128], strides = [1, 1]} : vector<16x512xf32> to vector<16x128xf32>
    %82 = vector.extract_strided_slice %77 {offsets = [0, 0], sizes = [16, 128], strides = [1, 1]} : vector<16x256xf32> to vector<16x128xf32>
    %83 = vector.extract_strided_slice %77 {offsets = [0, 128], sizes = [16, 128], strides = [1, 1]} : vector<16x256xf32> to vector<16x128xf32>
    %cst_30 = arith.constant 1.000000e+00 : f32
    %84 = vector.broadcast %cst_30 : f32 to vector<16x128xf32>
    %85 = arith.subf %84, %78 : vector<16x128xf32>
    %86 = arith.mulf %85, %54 : vector<16x128xf32>
    %87 = arith.mulf %78, %82 : vector<16x128xf32>
    %88 = arith.addf %86, %87 : vector<16x128xf32>
    %89 = math.tanh %88 : vector<16x128xf32>
    %90 = arith.mulf %89, %79 : vector<16x128xf32>
    %cst_31 = arith.constant 1.000000e+00 : f32
    %91 = vector.broadcast %cst_31 : f32 to vector<16x128xf32>
    %92 = arith.subf %91, %80 : vector<16x128xf32>
    %93 = arith.mulf %92, %64 : vector<16x128xf32>
    %94 = arith.mulf %80, %83 : vector<16x128xf32>
    %95 = arith.addf %93, %94 : vector<16x128xf32>
    %96 = math.tanh %95 : vector<16x128xf32>
    %97 = arith.mulf %96, %81 : vector<16x128xf32>
    %98 = vector.extract_strided_slice %97 {offsets = [8, 0], sizes = [8, 128], strides = [1, 1]} : vector<16x128xf32> to vector<8x128xf32>
    %99 = vector.extract_strided_slice %97 {offsets = [0, 0], sizes = [8, 128], strides = [1, 1]} : vector<16x128xf32> to vector<8x128xf32>
    %100 = tpu.concatenate %98, %99 in 0 : vector<8x128xf32>, vector<8x128xf32> -> vector<16x128xf32>
    %101 = tpu.concatenate %90, %100 in 1 : vector<16x128xf32>, vector<16x128xf32> -> vector<16x256xf32>
    %102 = arith.truncf %101 : vector<16x256xf32> to vector<16x256xbf16>
    %cst_32 = arith.constant dense<0.000000e+00> : vector<16x768xf32>
    %103 = tpu.matmul %102, %26, %cst_32 {dimension_numbers = #tpu.dot_dimension_numbers<[1], [0], [0], [1], [0, 0, 1, 1], [], []>} : vector<16x256xbf16>, vector<256x768xbf16>, vector<16x768xf32> -> vector<16x768xf32>
    %104 = vector.extract_strided_slice %25 {offsets = [32, 0], sizes = [16, 768], strides = [1, 1]} : vector<80x768xf32> to vector<16x768xf32>
    %105 = arith.addf %103, %104 : vector<16x768xf32>
    %106 = vector.extract_strided_slice %105 {offsets = [0, 0], sizes = [16, 512], strides = [1, 1]} : vector<16x768xf32> to vector<16x512xf32>
    %107 = arith.negf %106 : vector<16x512xf32>
    %108 = math.exp %107 : vector<16x512xf32>
    %cst_33 = arith.constant 1.000000e+00 : f32
    %109 = vector.broadcast %cst_33 : f32 to vector<16x512xf32>
    %110 = arith.addf %109, %108 : vector<16x512xf32>
    %111 = arith.divf %109, %110 : vector<16x512xf32>
    %112 = vector.extract_strided_slice %105 {offsets = [0, 512], sizes = [16, 256], strides = [1, 1]} : vector<16x768xf32> to vector<16x256xf32>
    %113 = math.tanh %112 : vector<16x256xf32>
    %114 = vector.extract_strided_slice %111 {offsets = [0, 0], sizes = [16, 128], strides = [1, 1]} : vector<16x512xf32> to vector<16x128xf32>
    %115 = vector.extract_strided_slice %111 {offsets = [0, 128], sizes = [16, 128], strides = [1, 1]} : vector<16x512xf32> to vector<16x128xf32>
    %116 = vector.extract_strided_slice %111 {offsets = [0, 256], sizes = [16, 128], strides = [1, 1]} : vector<16x512xf32> to vector<16x128xf32>
    %117 = vector.extract_strided_slice %111 {offsets = [0, 384], sizes = [16, 128], strides = [1, 1]} : vector<16x512xf32> to vector<16x128xf32>
    %118 = vector.extract_strided_slice %113 {offsets = [0, 0], sizes = [16, 128], strides = [1, 1]} : vector<16x256xf32> to vector<16x128xf32>
    %119 = vector.extract_strided_slice %113 {offsets = [0, 128], sizes = [16, 128], strides = [1, 1]} : vector<16x256xf32> to vector<16x128xf32>
    %cst_34 = arith.constant 1.000000e+00 : f32
    %120 = vector.broadcast %cst_34 : f32 to vector<16x128xf32>
    %121 = arith.subf %120, %114 : vector<16x128xf32>
    %122 = arith.mulf %121, %90 : vector<16x128xf32>
    %123 = arith.mulf %114, %118 : vector<16x128xf32>
    %124 = arith.addf %122, %123 : vector<16x128xf32>
    %125 = math.tanh %124 : vector<16x128xf32>
    %126 = arith.mulf %125, %115 : vector<16x128xf32>
    %cst_35 = arith.constant 1.000000e+00 : f32
    %127 = vector.broadcast %cst_35 : f32 to vector<16x128xf32>
    %128 = arith.subf %127, %116 : vector<16x128xf32>
    %129 = arith.mulf %128, %100 : vector<16x128xf32>
    %130 = arith.mulf %116, %119 : vector<16x128xf32>
    %131 = arith.addf %129, %130 : vector<16x128xf32>
    %132 = math.tanh %131 : vector<16x128xf32>
    %133 = arith.mulf %132, %117 : vector<16x128xf32>
    %134 = vector.extract_strided_slice %133 {offsets = [8, 0], sizes = [8, 128], strides = [1, 1]} : vector<16x128xf32> to vector<8x128xf32>
    %135 = vector.extract_strided_slice %133 {offsets = [0, 0], sizes = [8, 128], strides = [1, 1]} : vector<16x128xf32> to vector<8x128xf32>
    %136 = tpu.concatenate %134, %135 in 0 : vector<8x128xf32>, vector<8x128xf32> -> vector<16x128xf32>
    %137 = tpu.concatenate %126, %136 in 1 : vector<16x128xf32>, vector<16x128xf32> -> vector<16x256xf32>
    %138 = arith.truncf %137 : vector<16x256xf32> to vector<16x256xbf16>
    %cst_36 = arith.constant dense<0.000000e+00> : vector<16x768xf32>
    %139 = tpu.matmul %138, %26, %cst_36 {dimension_numbers = #tpu.dot_dimension_numbers<[1], [0], [0], [1], [0, 0, 1, 1], [], []>} : vector<16x256xbf16>, vector<256x768xbf16>, vector<16x768xf32> -> vector<16x768xf32>
    %140 = vector.extract_strided_slice %25 {offsets = [48, 0], sizes = [16, 768], strides = [1, 1]} : vector<80x768xf32> to vector<16x768xf32>
    %141 = arith.addf %139, %140 : vector<16x768xf32>
    %142 = vector.extract_strided_slice %141 {offsets = [0, 0], sizes = [16, 512], strides = [1, 1]} : vector<16x768xf32> to vector<16x512xf32>
    %143 = arith.negf %142 : vector<16x512xf32>
    %144 = math.exp %143 : vector<16x512xf32>
    %cst_37 = arith.constant 1.000000e+00 : f32
    %145 = vector.broadcast %cst_37 : f32 to vector<16x512xf32>
    %146 = arith.addf %145, %144 : vector<16x512xf32>
    %147 = arith.divf %145, %146 : vector<16x512xf32>
    %148 = vector.extract_strided_slice %141 {offsets = [0, 512], sizes = [16, 256], strides = [1, 1]} : vector<16x768xf32> to vector<16x256xf32>
    %149 = math.tanh %148 : vector<16x256xf32>
    %150 = vector.extract_strided_slice %147 {offsets = [0, 0], sizes = [16, 128], strides = [1, 1]} : vector<16x512xf32> to vector<16x128xf32>
    %151 = vector.extract_strided_slice %147 {offsets = [0, 128], sizes = [16, 128], strides = [1, 1]} : vector<16x512xf32> to vector<16x128xf32>
    %152 = vector.extract_strided_slice %147 {offsets = [0, 256], sizes = [16, 128], strides = [1, 1]} : vector<16x512xf32> to vector<16x128xf32>
    %153 = vector.extract_strided_slice %147 {offsets = [0, 384], sizes = [16, 128], strides = [1, 1]} : vector<16x512xf32> to vector<16x128xf32>
    %154 = vector.extract_strided_slice %149 {offsets = [0, 0], sizes = [16, 128], strides = [1, 1]} : vector<16x256xf32> to vector<16x128xf32>
    %155 = vector.extract_strided_slice %149 {offsets = [0, 128], sizes = [16, 128], strides = [1, 1]} : vector<16x256xf32> to vector<16x128xf32>
    %cst_38 = arith.constant 1.000000e+00 : f32
    %156 = vector.broadcast %cst_38 : f32 to vector<16x128xf32>
    %157 = arith.subf %156, %150 : vector<16x128xf32>
    %158 = arith.mulf %157, %126 : vector<16x128xf32>
    %159 = arith.mulf %150, %154 : vector<16x128xf32>
    %160 = arith.addf %158, %159 : vector<16x128xf32>
    %161 = math.tanh %160 : vector<16x128xf32>
    %162 = arith.mulf %161, %151 : vector<16x128xf32>
    %cst_39 = arith.constant 1.000000e+00 : f32
    %163 = vector.broadcast %cst_39 : f32 to vector<16x128xf32>
    %164 = arith.subf %163, %152 : vector<16x128xf32>
    %165 = arith.mulf %164, %136 : vector<16x128xf32>
    %166 = arith.mulf %152, %155 : vector<16x128xf32>
    %167 = arith.addf %165, %166 : vector<16x128xf32>
    %168 = math.tanh %167 : vector<16x128xf32>
    %169 = arith.mulf %168, %153 : vector<16x128xf32>
    %170 = vector.extract_strided_slice %169 {offsets = [8, 0], sizes = [8, 128], strides = [1, 1]} : vector<16x128xf32> to vector<8x128xf32>
    %171 = vector.extract_strided_slice %169 {offsets = [0, 0], sizes = [8, 128], strides = [1, 1]} : vector<16x128xf32> to vector<8x128xf32>
    %172 = tpu.concatenate %170, %171 in 0 : vector<8x128xf32>, vector<8x128xf32> -> vector<16x128xf32>
    %173 = tpu.concatenate %162, %172 in 1 : vector<16x128xf32>, vector<16x128xf32> -> vector<16x256xf32>
    %174 = arith.truncf %173 : vector<16x256xf32> to vector<16x256xbf16>
    %cst_40 = arith.constant dense<0.000000e+00> : vector<16x768xf32>
    %175 = tpu.matmul %174, %26, %cst_40 {dimension_numbers = #tpu.dot_dimension_numbers<[1], [0], [0], [1], [0, 0, 1, 1], [], []>} : vector<16x256xbf16>, vector<256x768xbf16>, vector<16x768xf32> -> vector<16x768xf32>
    %176 = vector.extract_strided_slice %25 {offsets = [64, 0], sizes = [16, 768], strides = [1, 1]} : vector<80x768xf32> to vector<16x768xf32>
    %177 = arith.addf %175, %176 : vector<16x768xf32>
    %178 = vector.extract_strided_slice %177 {offsets = [0, 0], sizes = [16, 512], strides = [1, 1]} : vector<16x768xf32> to vector<16x512xf32>
    %179 = arith.negf %178 : vector<16x512xf32>
    %180 = math.exp %179 : vector<16x512xf32>
    %cst_41 = arith.constant 1.000000e+00 : f32
    %181 = vector.broadcast %cst_41 : f32 to vector<16x512xf32>
    %182 = arith.addf %181, %180 : vector<16x512xf32>
    %183 = arith.divf %181, %182 : vector<16x512xf32>
    %184 = vector.extract_strided_slice %177 {offsets = [0, 512], sizes = [16, 256], strides = [1, 1]} : vector<16x768xf32> to vector<16x256xf32>
    %185 = math.tanh %184 : vector<16x256xf32>
    %186 = vector.extract_strided_slice %183 {offsets = [0, 0], sizes = [16, 128], strides = [1, 1]} : vector<16x512xf32> to vector<16x128xf32>
    %187 = vector.extract_strided_slice %183 {offsets = [0, 128], sizes = [16, 128], strides = [1, 1]} : vector<16x512xf32> to vector<16x128xf32>
    %188 = vector.extract_strided_slice %183 {offsets = [0, 256], sizes = [16, 128], strides = [1, 1]} : vector<16x512xf32> to vector<16x128xf32>
    %189 = vector.extract_strided_slice %183 {offsets = [0, 384], sizes = [16, 128], strides = [1, 1]} : vector<16x512xf32> to vector<16x128xf32>
    %190 = vector.extract_strided_slice %185 {offsets = [0, 0], sizes = [16, 128], strides = [1, 1]} : vector<16x256xf32> to vector<16x128xf32>
    %191 = vector.extract_strided_slice %185 {offsets = [0, 128], sizes = [16, 128], strides = [1, 1]} : vector<16x256xf32> to vector<16x128xf32>
    %cst_42 = arith.constant 1.000000e+00 : f32
    %192 = vector.broadcast %cst_42 : f32 to vector<16x128xf32>
    %193 = arith.subf %192, %186 : vector<16x128xf32>
    %194 = arith.mulf %193, %162 : vector<16x128xf32>
    %195 = arith.mulf %186, %190 : vector<16x128xf32>
    %196 = arith.addf %194, %195 : vector<16x128xf32>
    %197 = math.tanh %196 : vector<16x128xf32>
    %198 = arith.mulf %197, %187 : vector<16x128xf32>
    %cst_43 = arith.constant 1.000000e+00 : f32
    %199 = vector.broadcast %cst_43 : f32 to vector<16x128xf32>
    %200 = arith.subf %199, %188 : vector<16x128xf32>
    %201 = arith.mulf %200, %172 : vector<16x128xf32>
    %202 = arith.mulf %188, %191 : vector<16x128xf32>
    %203 = arith.addf %201, %202 : vector<16x128xf32>
    %204 = math.tanh %203 : vector<16x128xf32>
    %205 = arith.mulf %204, %189 : vector<16x128xf32>
    %206 = vector.extract_strided_slice %198 {offsets = [8, 0], sizes = [8, 128], strides = [1, 1]} : vector<16x128xf32> to vector<8x128xf32>
    %207 = vector.extract_strided_slice %205 {offsets = [8, 0], sizes = [8, 128], strides = [1, 1]} : vector<16x128xf32> to vector<8x128xf32>
    %208 = tpu.concatenate %207, %206 in 1 : vector<8x128xf32>, vector<8x128xf32> -> vector<8x256xf32>
    %c0_44 = arith.constant 0 : index
    %c0_45 = arith.constant 0 : index
    %209 = vector.load %arg10[%c0_44, %c0_45] : memref<1x256xf32, #tpu.memory_space<vmem>>, vector<1x256xf32>
    %210 = vector.broadcast %209 : vector<1x256xf32> to vector<8x256xf32>
    %211 = arith.mulf %208, %210 : vector<8x256xf32>
    %cst_46 = arith.constant dense<0.000000e+00> : vector<8xf32>
    %212 = vector.multi_reduction <add>, %211, %cst_46 [1] : vector<8x256xf32> to vector<8xf32>
    %213 = vector.shape_cast %212 : vector<8xf32> to vector<8x1xf32>
    %cst_47 = arith.constant 5.000000e-01 : f32
    %214 = vector.broadcast %cst_47 : f32 to vector<8x1xf32>
    %215 = arith.mulf %214, %213 : vector<8x1xf32>
    %c0_48 = arith.constant 0 : index
    %c0_49 = arith.constant 0 : index
    %216 = vector.load %arg11[%c0_48, %c0_49] : memref<1x1xf32, #tpu.memory_space<vmem>>, vector<1x1xf32>
    %217 = vector.broadcast %216 : vector<1x1xf32> to vector<8x1xf32>
    %218 = arith.addf %215, %217 : vector<8x1xf32>
    %c0_50 = arith.constant 0 : index
    %c0_51 = arith.constant 0 : index
    %219 = vector.load %arg12[%c0_50, %c0_51] : memref<8x1xf32, #tpu.memory_space<vmem>>, vector<8x1xf32>
    tpu.vector_store %arg12[%c0_50, %c0_51], %218 {strides = array<i32>} : memref<8x1xf32, #tpu.memory_space<vmem>>, vector<8x1xf32>,
    return
  }
}

</mosaic_0001>

<bundles_post_ra>
// kernel: vae_witran_forward.1
= control target key start
LH: loop header
LB: loop body
LE: loop exit
PB: predicated region body
PF: predicated region fallthrough
CT: control target
= control target key end

     0   :  { %vm105_vm0 = vcmask 1043456   ;;  %vm74_vm1 = vcmask 31744   ;;  %v4877_v37 = vmov 0   ;;  %s7805_s3 = inlined_call_operand.vmem [shape: f32[4,512], index: 3, kind: input, shape index: {}]   ;;  %s7806_s0 = inlined_call_operand.vmem [shape: f32[80,4], index: 0, kind: input, shape index: {}]   ;;  %s7807_s5 = inlined_call_operand.vmem [shape: bf16[512,128], index: 5, kind: input, shape index: {}]   ;;  %s7808_s1 = inlined_call_operand.vmem [shape: f32[80,1], index: 1, kind: input, shape index: {}]   ;;  %s7809_s6 = inlined_call_operand.vmem [shape: f32[1,128], index: 6, kind: input, shape index: {}]   ;;  %s7810_s4 = inlined_call_operand.vmem [shape: f32[1,512], index: 4, kind: input, shape index: {}]   ;;  %s7811_s2 = inlined_call_operand.vmem [shape: f32[80,1], index: 2, kind: input, shape index: {}]   ;;  %s7812_s7 = inlined_call_operand.vmem [shape: bf16[128,768], index: 7, kind: input, shape index: {}]   ;;  %s7813_s8 = inlined_call_operand.vmem [shape: bf16[256,768], index: 8, kind: input, shape index: {}]   ;;  %s7814_s9 = inlined_call_operand.vmem [shape: f32[1,768], index: 9, kind: input, shape index: {}]   ;;  %s7815_s11 = inlined_call_operand.<no memory space> [shape: f32[1,1], index: 11, kind: input, shape index: {}]   ;;  %s7816_s10 = inlined_call_operand.vmem [shape: f32[1,256], index: 10, kind: input, shape index: {}]   ;;  %s7817_s12 = inlined_call_operand.vmem [shape: f32[8,1], index: 12, kind: output, shape index: {}]  }
   0x1   :  { %v53_v0 = vld [vmem:[%s7805_s3] sm:$0xff]  ;;  %v54_v1 = vld [vmem:[%s7805_s3 + $0x8] sm:$0xff]  ;;  %v45_v9 = vld [vmem:[%s7806_s0 + $0x10] sm:$0xff]  ;;  %4656 = vset.pattern.permute.xlu0 %v4877_v37  ;;  %4657 = vset.pattern.permute.xlu1 %v4877_v37 }
   0x2   :  { %67 = vst [vmem:[#allocation1] ss:$2 sm:$0xff] %v53_v0  ;;  %v43_v2 = vld [vmem:[%s7806_s0] sm:$0xff]  ;;  %v4956_v3 = vld [vmem:[%s7806_s0 + $0x48] sm:$0xff]  ;;  %v46_v10 = vld [vmem:[%s7806_s0 + $0x18] sm:$0xff]  ;;  %4658 = vset.pattern.permute.xlu2 %v4877_v37 }
   0x3   :  { %69 = vst [vmem:[#allocation1 + $0x10] ss:$2 sm:$0xff] %v54_v1  ;;  %v44_v8 = vld [vmem:[%s7806_s0 + $0x8] sm:$0xff]  ;;  %v47_v11 = vld [vmem:[%s7806_s0 + $0x20] sm:$0xff]  ;;  %v4499_v13 = vld [vmem:[%s7807_s5 + $0xb8] sm:$0xff] }
   0x4   :  { %v48_v12 = vld [vmem:[%s7806_s0 + $0x28] sm:$0xff]  ;;  %v4507_v14 = vld [vmem:[%s7807_s5 + $0xf8] sm:$0xff]  ;;  %v49_v15 = vld [vmem:[%s7806_s0 + $0x30] sm:$0xff] }
   0x5   :  { %v4483_v16 = vld [vmem:[%s7807_s5 + $0x38] sm:$0xff]  ;;  %v4498_v17 = vld [vmem:[%s7807_s5 + $0xb0] sm:$0xff]  ;;  %v4497_v21 = vld [vmem:[%s7807_s5 + $0xa8] sm:$0xff] }
   0x6   :  { %v4491_v18 = vld [vmem:[%s7807_s5 + $0x78] sm:$0xff]  ;;  %v4506_v19 = vld [vmem:[%s7807_s5 + $0xf0] sm:$0xff]  ;;  %v4505_v24 = vld [vmem:[%s7807_s5 + $0xe8] sm:$0xff] }
   0x7   :  { %v4482_v20 = vld [vmem:[%s7807_s5 + $0x30] sm:$0xff]  ;;  %v50_v22 = vld [vmem:[%s7806_s0 + $0x38] sm:$0xff]  ;;  %v4481_v25 = vld [vmem:[%s7807_s5 + $0x28] sm:$0xff] }
   0x8   :  { %v4490_v23 = vld [vmem:[%s7807_s5 + $0x70] sm:$0xff]  ;;  %v4496_v26 = vld [vmem:[%s7807_s5 + $0xa0] sm:$0xff]  ;;  %v4489_v27 = vld [vmem:[%s7807_s5 + $0x68] sm:$0xff] }
   0x9   :  { %v70_v4 = vld.sshfl [vmem:[#allocation1] sm:$0xff pattern:$0x75316420]  ;;  %v71_v5 = vld.sshfl [vmem:[#allocation1 + $0x8] sm:$0xff pattern:$0x75316420] }
   0xa   :  { %3692 = vmatpush.msk.msra.mxu0 %vm105_vm0, %v70_v4  ;;  %4652 = vmatpush.msk.msra.mxu2 %vm105_vm0, %v70_v4  ;;  %v72_v6 = vld.sshfl [vmem:[#allocation1 + $0x10] sm:$0xff pattern:$0x75316420]  ;;  %v73_v7 = vld.sshfl [vmem:[#allocation1 + $0x18] sm:$0xff pattern:$0x75316420] }
   0xb   :  { %3703 = vmatpush.msk.msra.mxu1 %vm105_vm0, %v71_v5  ;;  %4653 = vmatpush.msk.msra.mxu3 %vm105_vm0, %v71_v5  ;;  %v4504_v28 = vld [vmem:[%s7807_s5 + $0xe0] sm:$0xff]  ;;  %v4495_v30 = vld [vmem:[%s7807_s5 + $0x98] sm:$0xff]  ;;  %v4494_v35 = vld [vmem:[%s7807_s5 + $0x90] sm:$0xff] }
   0xc   :  { %3693 = vmatmul.msk.f32.vlgmr.msra.gmra.mxu0 %vm74_vm1, %v43_v2  ;;  %3702 = vmatmul.msk.f32.vlgmr.msra.gmra.mxu2 %vm74_vm1, %v4956_v3  ;;  %v4480_v29 = vld [vmem:[%s7807_s5 + $0x20] sm:$0xff]  ;;  %v4503_v33 = vld [vmem:[%s7807_s5 + $0xd8] sm:$0xff]  ;;  %v4478_v39 = vld [vmem:[%s7807_s5 + $0x10] sm:$0xff] }
   0xd   :  { %3704 = vmatmul.msk.f32.vlgmr.msra.gmra.mxu1 %vm74_vm1, %v43_v2  ;;  %3713 = vmatmul.msk.f32.vlgmr.msra.gmra.mxu3 %vm74_vm1, %v4956_v3  ;;  %v51_v31 = vld [vmem:[%s7806_s0 + $0x40] sm:$0xff]  ;;  %v4479_v34 = vld [vmem:[%s7807_s5 + $0x18] sm:$0xff]  ;;  %v4486_v40 = vld [vmem:[%s7807_s5 + $0x50] sm:$0xff] }
   0xe   :  { %3714 = vmatpush.msk.msrb.mxu2 %vm105_vm0, %v72_v6  ;;  %3725 = vmatpush.msk.msrb.mxu3 %vm105_vm0, %v73_v7  ;;  %v4488_v32 = vld [vmem:[%s7807_s5 + $0x60] sm:$0xff]  ;;  %v4487_v36 = vld [vmem:[%s7807_s5 + $0x58] sm:$0xff]  ;;  %v4502_v41 = vld [vmem:[%s7807_s5 + $0xd0] sm:$0xff] }
   0xf   :  { %622 = vmatpush.bf16.msrb.mxu0 %v4483_v16  ;;  %656 = vmatpush.bf16.msrb.mxu1 %v4491_v18  ;;  %v758_v38 = vld [vmem:[%s7808_s1] sm:$0xff]  ;;  %v4477_v42 = vld [vmem:[%s7807_s5 + $0x8] sm:$0xff]  ;;  %v764_v49 = vld [vmem:[%s7808_s1 + $0x30] sm:$0xff] }
  0x10   :  { %690 = vmatpush.bf16.msra.mxu2 %v4499_v13  ;;  %724 = vmatpush.bf16.msra.mxu3 %v4507_v14  ;;  %v4485_v43 = vld [vmem:[%s7807_s5 + $0x48] sm:$0xff]  ;;  %v4476_v45 = vld [vmem:[%s7807_s5] sm:$0xff]  ;;  %v760_v52 = vld [vmem:[%s7808_s1 + $0x10] sm:$0xff] }
  0x11   :  { %770 = vperm.xlu0 %4656, %v758_v38   ;;  %v759_v44 = vld [vmem:[%s7808_s1 + $0x8] sm:$0xff]  ;;  %v4484_v46 = vld [vmem:[%s7807_s5 + $0x40] sm:$0xff]  ;;  %780 = vperm.xlu1 %4657, %v760_v52   ;;  %v761_v58 = vld [vmem:[%s7808_s1 + $0x18] sm:$0xff] }
  0x12   :  { %v4493_v47 = vld [vmem:[%s7807_s5 + $0x88] sm:$0xff]  ;;  %v4492_v50 = vld [vmem:[%s7807_s5 + $0x80] sm:$0xff]  ;;  %v883_v59 = vld [vmem:[%s7811_s2 + $0x10] sm:$0xff] }
  0x13   :  { %623 = vmatpush.bf16.msrb.mxu0 %v4482_v20  ;;  %657 = vmatpush.bf16.msrb.mxu1 %v4490_v23  ;;  %v4501_v48 = vld [vmem:[%s7807_s5 + $0xc8] sm:$0xff]  ;;  %v4500_v51 = vld [vmem:[%s7807_s5 + $0xc0] sm:$0xff]  ;;  %v765_v7 = vld [vmem:[%s7808_s1 + $0x38] sm:$0xff] }
  0x14   :  { %3694 = vmatmul.msk.f32.gmra.mxu0 %vm74_vm1, %v44_v8  ;;  %3715 = vmatmul.msk.f32.vlgmr.msrb.gmra.mxu2 %vm74_vm1, %v43_v2  ;;  %v767_v53 = vld [vmem:[%s7808_s1 + $0x48] sm:$0xff]  ;;  %v55_v54 = vld [vmem:[%s7810_s4] sm:$0xf] }
  0x15   :  { %3705 = vmatmul.msk.f32.gmra.mxu1 %vm74_vm1, %v44_v8  ;;  %3726 = vmatmul.msk.f32.vlgmr.msrb.gmra.mxu3 %vm74_vm1, %v43_v2  ;;  %v5146_v57 = vperm.slane %v55_v54, 1  ;;  %v5154_v60 = vperm.slane %v55_v54, 0  ;;  %v5170_v16 = vperm.slane %v55_v54, 2  ;;  %v5172_v18 = vperm.slane %v55_v54, 3  ;;  %v890_v20 = vld [vmem:[%s7811_s2 + $0x48] sm:$0xff] }
  0x16   :  { %691 = vmatpush.bf16.msra.mxu2 %v4498_v17  ;;  %725 = vmatpush.bf16.msra.mxu3 %v4506_v19  ;;  %v881_v19 = vld [vmem:[%s7811_s2] sm:$0xff] }
  0x17   :  { %624 = vmatpush.bf16.msrb.mxu0 %v4481_v25  ;;  %658 = vmatpush.bf16.msrb.mxu1 %v4489_v27 }
  0x19   :  { %775 = vperm.xlu0 %4656, %v759_v44   ;;  %785 = vperm.xlu1 %4657, %v761_v58  }
  0x1a   :  { %692 = vmatpush.bf16.msra.mxu2 %v4497_v21  ;;  %726 = vmatpush.bf16.msra.mxu3 %v4505_v24 }
  0x1b   :  { %625 = vmatpush.bf16.msrb.mxu0 %v4480_v29  ;;  %659 = vmatpush.bf16.msrb.mxu1 %v4488_v32 }
  0x1c   :  { %3695 = vmatmul.msk.f32.gmra.mxu0 %vm74_vm1, %v45_v9  ;;  %3716 = vmatmul.msk.f32.gmra.mxu2 %vm74_vm1, %v44_v8 }
  0x1d   :  { %3706 = vmatmul.msk.f32.gmra.mxu1 %vm74_vm1, %v45_v9  ;;  %3727 = vmatmul.msk.f32.gmra.mxu3 %vm74_vm1, %v44_v8  ;;  %v886_v8 = vld [vmem:[%s7811_s2 + $0x28] sm:$0xff] }
  0x1e   :  { %693 = vmatpush.bf16.msra.mxu2 %v4496_v26  ;;  %727 = vmatpush.bf16.msra.mxu3 %v4504_v28 }
  0x1f   :  { %626 = vmatpush.bf16.msrb.mxu0 %v4479_v34  ;;  %660 = vmatpush.bf16.msrb.mxu1 %v4487_v36 }
  0x21   :  { %800 = vperm.xlu0 %4656, %v764_v49   ;;  %805 = vperm.xlu1 %4657, %v765_v7  }
  0x22   :  { %694 = vmatpush.bf16.msra.mxu2 %v4495_v30  ;;  %728 = vmatpush.bf16.msra.mxu3 %v4503_v33 }
  0x23   :  { %627 = vmatpush.bf16.msrb.mxu0 %v4478_v39  ;;  %661 = vmatpush.bf16.msrb.mxu1 %v4486_v40  ;;  %v884_v39 = vld [vmem:[%s7811_s2 + $0x18] sm:$0xff] }
  0x24   :  { %3696 = vmatmul.msk.f32.gmra.mxu0 %vm74_vm1, %v46_v10  ;;  %3717 = vmatmul.msk.f32.gmra.mxu2 %vm74_vm1, %v45_v9 }
  0x25   :  { %3707 = vmatmul.msk.f32.gmra.mxu1 %vm74_vm1, %v46_v10  ;;  %3728 = vmatmul.msk.f32.gmra.mxu3 %vm74_vm1, %v45_v9 }
  0x26   :  { %695 = vmatpush.bf16.msra.mxu2 %v4494_v35  ;;  %729 = vmatpush.bf16.msra.mxu3 %v4502_v41 }
  0x27   :  { %628 = vmatpush.bf16.msrb.mxu0 %v4477_v42  ;;  %662 = vmatpush.bf16.msrb.mxu1 %v4485_v43 }
  0x29   :  { %815 = vperm.xlu0 %4656, %v767_v53   ;;  %894 = vperm.xlu1 %4657, %v881_v19  }
  0x2a   :  { %696 = vmatpush.bf16.msra.mxu2 %v4493_v47  ;;  %730 = vmatpush.bf16.msra.mxu3 %v4501_v48 }
  0x2b   :  { %629 = vmatpush.bf16.msrb.mxu0 %v4476_v45  ;;  %663 = vmatpush.bf16.msrb.mxu1 %v4484_v46 }
  0x2c   :  { %3697 = vmatmul.msk.f32.gmra.mxu0 %vm74_vm1, %v47_v11  ;;  %3718 = vmatmul.msk.f32.gmra.mxu2 %vm74_vm1, %v46_v10 }
  0x2d   :  { %3708 = vmatmul.msk.f32.gmra.mxu1 %vm74_vm1, %v47_v11  ;;  %3729 = vmatmul.msk.f32.gmra.mxu3 %vm74_vm1, %v46_v10 }
  0x2e   :  { %697 = vmatpush.bf16.msra.mxu2 %v4492_v50  ;;  %731 = vmatpush.bf16.msra.mxu3 %v4500_v51  ;;  %v762_v50 = vld [vmem:[%s7808_s1 + $0x20] sm:$0xff]  ;;  %v887_v51 = vld [vmem:[%s7811_s2 + $0x30] sm:$0xff] }
  0x2f   :  { %790 = vperm.xlu2 %4658, %v762_v50   ;;  %v4034_v50 = vld [vmem:[%s7812_s7 + $0x150] sm:$0xf] }
  0x31   :  { %904 = vperm.xlu0 %4656, %v883_v59   ;;  %909 = vperm.xlu1 %4657, %v884_v39  }
  0x34   :  { %3698 = vmatmul.msk.f32.gmra.mxu0 %vm74_vm1, %v48_v12  ;;  %3719 = vmatmul.msk.f32.gmra.mxu2 %vm74_vm1, %v47_v11 }
  0x35   :  { %3709 = vmatmul.msk.f32.gmra.mxu1 %vm74_vm1, %v48_v12  ;;  %3730 = vmatmul.msk.f32.gmra.mxu3 %vm74_vm1, %v47_v11 }
  0x39   :  { %919 = vperm.xlu0 %4656, %v886_v8   ;;  %924 = vperm.xlu1 %4657, %v887_v51   ;;  %v4553_v51 = vld [vmem:[%s7812_s7 + $0x164] sm:$0xf0] }
  0x3c   :  { %3699 = vmatmul.msk.f32.gmra.mxu0 %vm74_vm1, %v49_v15  ;;  %3720 = vmatmul.msk.f32.gmra.mxu2 %vm74_vm1, %v48_v12 }
  0x3d   :  { %3710 = vmatmul.msk.f32.gmra.mxu1 %vm74_vm1, %v49_v15  ;;  %3731 = vmatmul.msk.f32.gmra.mxu3 %vm74_vm1, %v48_v12 }
  0x41   :  { %938 = vperm.xlu0 %4656, %v890_v20  }
  0x44   :  { %3700 = vmatmul.msk.f32.gmra.mxu0 %vm74_vm1, %v50_v22  ;;  %3721 = vmatmul.msk.f32.gmra.mxu2 %vm74_vm1, %v49_v15 }
  0x45   :  { %3711 = vmatmul.msk.f32.gmra.mxu1 %vm74_vm1, %v50_v22  ;;  %3732 = vmatmul.msk.f32.gmra.mxu3 %vm74_vm1, %v49_v15 }
  0x4c   :  { %3701 = vmatmul.msk.f32.gmra.mxu0 %vm74_vm1, %v51_v31  ;;  %3722 = vmatmul.msk.f32.gmra.mxu2 %vm74_vm1, %v50_v22 }
  0x4d   :  { %3712 = vmatmul.msk.f32.gmra.mxu1 %vm74_vm1, %v51_v31  ;;  %3733 = vmatmul.msk.f32.gmra.mxu3 %vm74_vm1, %v50_v22 }
  0x54   :  { %3723 = vmatmul.msk.f32.gmra.mxu2 %vm74_vm1, %v51_v31 }
  0x55   :  { %3734 = vmatmul.msk.f32.gmra.mxu3 %vm74_vm1, %v51_v31 }
  0x5c   :  { %3724 = vmatmul.msk.f32.gmra.mxu2 %vm74_vm1, %v4956_v3 }
  0x5d   :  { %3735 = vmatmul.msk.f32.gmra.mxu3 %vm74_vm1, %v4956_v3 }
  0x89   :  { %v131_v55 = vpop.f32.mrf.mxu0 }
  0x8a   :  { %v178_v56 = vpop.f32.mrf.mxu1  ;;  %v132_v61 = vadd.f32 %v131_v55, %v5154_v60 }
  0x8b   :  { %v179_v62 = vadd.f32 %v178_v56, %v5146_v57 }
  0x8c   :  { %v302_v2 = vmax.f32 %v132_v61, 0.0 }
  0x8d   :  { %v303_v5 = vmax.f32 %v179_v62, 0.0 }
  0x8f   :  { %v5158_v63 = vpop.f32.mrf.mxu2 }
  0x90   :  { %v5160_v0 = vpop.f32.mrf.mxu3 }
  0x91   :  { %v134_v1 = vpop.f32.mrf.mxu0 }
  0x92   :  { %v135_v3 = vadd.f32 %v134_v1, %v5154_v60  ;;  %v181_v4 = vpop.f32.mrf.mxu1 }
  0x93   :  { %v182_v6 = vadd.f32 %v181_v4, %v5146_v57 }
  0x94   :  { %v306_v9 = vmax.f32 %v135_v3, 0.0 }
  0x95   :  { %v307_v10 = vmax.f32 %v182_v6, 0.0 }
  0x96   :  { %v342_v11 = vpack.c.bf16 %v306_v9, %v302_v2 }
  0x97   :  { %v343_v12 = vpack.c.bf16 %v307_v10, %v303_v5  ;;  %v225_v13 = vpop.f32.mrf.mxu2  ;;  %v763_v10 = vld [vmem:[%s7808_s1 + $0x28] sm:$0xff] }
  0x98   :  { %v272_v14 = vpop.f32.mrf.mxu3  ;;  %630 = vmatmul.bf16.vlgmr.msrb.gmra.mxu0 %v342_v11  ;;  %v226_v21 = vadd.f32 %v225_v13, %v5170_v16  ;;  %795 = vperm.xlu2 %4658, %v763_v10  }
  0x99   :  { %664 = vmatmul.bf16.vlgmr.msrb.gmra.mxu1 %v343_v12  ;;  %v137_v15 = vpop.f32.mrf.mxu0  ;;  %v273_v23 = vadd.f32 %v272_v14, %v5172_v18 }
  0x9a   :  { %v184_v17 = vpop.f32.mrf.mxu1  ;;  %v138_v22 = vadd.f32 %v137_v15, %v5154_v60  ;;  %v304_v30 = vmax.f32 %v226_v21, 0.0 }
  0x9b   :  { %v185_v24 = vadd.f32 %v184_v17, %v5146_v57  ;;  %v305_v35 = vmax.f32 %v273_v23, 0.0  ;;  %v766_v23 = vld [vmem:[%s7808_s1 + $0x40] sm:$0xff] }
  0x9c   :  { %v310_v31 = vmax.f32 %v138_v22, 0.0 }
  0x9d   :  { %v311_v36 = vmax.f32 %v185_v24, 0.0 }
  0x9f   :  { %v228_v25 = vpop.f32.mrf.mxu2 }
  0xa0   :  { %v229_v26 = vadd.f32 %v228_v25, %v5170_v16  ;;  %v275_v27 = vpop.f32.mrf.mxu3  ;;  %810 = vperm.xlu2 %4658, %v766_v23  }
  0xa1   :  { %v276_v28 = vadd.f32 %v275_v27, %v5172_v18  ;;  %v140_v29 = vpop.f32.mrf.mxu0 }
  0xa2   :  { %v308_v32 = vmax.f32 %v229_v26, 0.0  ;;  %v141_v33 = vadd.f32 %v140_v29, %v5154_v60  ;;  %v187_v34 = vpop.f32.mrf.mxu1 }
  0xa3   :  { %v309_v37 = vmax.f32 %v276_v28, 0.0  ;;  %v188_v38 = vadd.f32 %v187_v34, %v5146_v57 }
  0xa4   :  { %v344_v40 = vpack.c.bf16 %v308_v32, %v304_v30  ;;  %v314_v41 = vmax.f32 %v141_v33, 0.0 }
  0xa5   :  { %v345_v42 = vpack.c.bf16 %v309_v37, %v305_v35  ;;  %v315_v43 = vmax.f32 %v188_v38, 0.0 }
  0xa6   :  { %698 = vmatmul.bf16.vlgmr.msra.gmra.mxu2 %v344_v40  ;;  %v346_v44 = vpack.c.bf16 %v314_v41, %v310_v31 }
  0xa7   :  { %732 = vmatmul.bf16.vlgmr.msra.gmra.mxu3 %v345_v42  ;;  %v231_v45 = vpop.f32.mrf.mxu2  ;;  %v347_v46 = vpack.c.bf16 %v315_v43, %v311_v36  ;;  %v882_v42 = vld [vmem:[%s7811_s2 + $0x8] sm:$0xff] }
  0xa8   :  { %v278_v47 = vpop.f32.mrf.mxu3  ;;  %635 = vmatmul.bf16.gmra.mxu0 %v346_v44  ;;  %v232_v52 = vadd.f32 %v231_v45, %v5170_v16  ;;  %899 = vperm.xlu2 %4658, %v882_v42  }
  0xa9   :  { %669 = vmatmul.bf16.gmra.mxu1 %v347_v46  ;;  %v143_v48 = vpop.f32.mrf.mxu0  ;;  %v279_v54 = vadd.f32 %v278_v47, %v5172_v18 }
  0xaa   :  { %v190_v49 = vpop.f32.mrf.mxu1  ;;  %v144_v53 = vadd.f32 %v143_v48, %v5154_v60  ;;  %v312_v1 = vmax.f32 %v232_v52, 0.0 }
  0xab   :  { %v191_v55 = vadd.f32 %v190_v49, %v5146_v57  ;;  %v313_v6 = vmax.f32 %v279_v54, 0.0  ;;  %v885_v54 = vld [vmem:[%s7811_s2 + $0x20] sm:$0xff] }
  0xac   :  { %v318_v2 = vmax.f32 %v144_v53, 0.0  ;;  %v4035_v53 = vor.u32 %v4553_v51, %v4034_v50 }
  0xad   :  { %v319_v7 = vmax.f32 %v191_v55, 0.0  ;;  %v4550_v55 = vld [vmem:[%s7812_s7 + $0x154] sm:$0xf] }
  0xae   :  { %1248 = vmatpush.bf16.msra.mxu0 %v4035_v53 }
  0xaf   :  { %v234_v56 = vpop.f32.mrf.mxu2 }
  0xb0   :  { %v235_v58 = vadd.f32 %v234_v56, %v5170_v16  ;;  %v281_v59 = vpop.f32.mrf.mxu3  ;;  %v4036_v56 = vld [vmem:[%s7812_s7 + $0x168] sm:$0xf0]  ;;  %914 = vperm.xlu2 %4658, %v885_v54  }
  0xb1   :  { %v282_v61 = vadd.f32 %v281_v59, %v5172_v18  ;;  %v146_v62 = vpop.f32.mrf.mxu0  ;;  %v4010_v59 = vld [vmem:[%s7812_s7 + $0x120] sm:$0xf] }
  0xb2   :  { %v316_v3 = vmax.f32 %v235_v58, 0.0  ;;  %v147_v4 = vadd.f32 %v146_v62, %v5154_v60  ;;  %v193_v5 = vpop.f32.mrf.mxu1  ;;  %v4039_v58 = vor.u32 %v4550_v55, %v4036_v56  ;;  %v4544_v62 = vld [vmem:[%s7812_s7 + $0x124] sm:$0xf] }
  0xb3   :  { %v317_v8 = vmax.f32 %v282_v61, 0.0  ;;  %v194_v9 = vadd.f32 %v193_v5, %v5146_v57  ;;  %v4547_v61 = vld [vmem:[%s7812_s7 + $0x134] sm:$0xf0]  ;;  %v3986_v5 = vld [vmem:[%s7812_s7 + $0xf0] sm:$0xf] }
  0xb4   :  { %v322_v11 = vmax.f32 %v147_v4, 0.0  ;;  %v348_v12 = vpack.c.bf16 %v316_v3, %v312_v1  ;;  %v4011_v1 = vor.u32 %v4547_v61, %v4010_v59  ;;  %1281 = vmatpush.bf16.msra.mxu1 %v4039_v58 }
  0xb5   :  { %v323_v13 = vmax.f32 %v194_v9, 0.0  ;;  %v349_v14 = vpack.c.bf16 %v317_v8, %v313_v6  ;;  %v4541_v6 = vld [vmem:[%s7812_s7 + $0x104] sm:$0xf0]  ;;  %v4538_v8 = vld [vmem:[%s7812_s7 + $0xf4] sm:$0xf] }
  0xb6   :  { %703 = vmatmul.bf16.gmra.mxu2 %v348_v12  ;;  %v350_v15 = vpack.c.bf16 %v322_v11, %v318_v2  ;;  %v4012_v2 = vld [vmem:[%s7812_s7 + $0x138] sm:$0xf0]  ;;  %v3988_v9 = vld [vmem:[%s7812_s7 + $0x108] sm:$0xf0]  ;;  %1249 = vmatpush.bf16.msra.mxu0 %v4011_v1 }
  0xb7   :  { %737 = vmatmul.bf16.gmra.mxu3 %v349_v14  ;;  %v237_v17 = vpop.f32.mrf.mxu2  ;;  %v351_v19 = vpack.c.bf16 %v323_v13, %v319_v7  ;;  %v4015_v4 = vor.u32 %v4544_v62, %v4012_v2  ;;  %v3987_v13 = vor.u32 %v4541_v6, %v3986_v5  ;;  %v3962_v14 = vld [vmem:[%s7812_s7 + $0xc0] sm:$0xf]  ;;  %v4018_v5 = vld [vmem:[%s7812_s7 + $0x128] sm:$0xf] }
  0xb8   :  { %v284_v20 = vpop.f32.mrf.mxu3  ;;  %640 = vmatmul.bf16.gmra.mxu0 %v350_v15  ;;  %v238_v24 = vadd.f32 %v237_v17, %v5170_v16  ;;  %v4042_v15 = vld [vmem:[%s7812_s7 + $0x158] sm:$0xf]  ;;  %v4554_v17 = vld [vmem:[%s7812_s7 + $0x16c] sm:$0xf0]  ;;  %v4548_v6 = vld [vmem:[%s7812_s7 + $0x13c] sm:$0xf0] }
  0xb9   :  { %674 = vmatmul.bf16.gmra.mxu1 %v351_v19  ;;  %v149_v21 = vpop.f32.mrf.mxu0  ;;  %v285_v26 = vadd.f32 %v284_v20, %v5172_v18  ;;  %v4043_v23 = vor.u32 %v4554_v17, %v4042_v15  ;;  %v4542_v17 = vld [vmem:[%s7812_s7 + $0x10c] sm:$0xf0] }
  0xba   :  { %v196_v22 = vpop.f32.mrf.mxu1  ;;  %v150_v25 = vadd.f32 %v149_v21, %v5154_v60  ;;  %v320_v33 = vmax.f32 %v238_v24, 0.0  ;;  %1282 = vmatpush.bf16.msra.mxu1 %v4015_v4  ;;  %v3991_v21 = vor.u32 %v4538_v8, %v3988_v9  ;;  %v4551_v24 = vld [vmem:[%s7812_s7 + $0x15c] sm:$0xf]  ;;  %1250 = vmatpush.bf16.msra.mxu0 %v3987_v13  ;;  %v3914_v8 = vld [vmem:[%s7812_s7 + $0x60] sm:$0xf] }
  0xbb   :  { %v197_v27 = vadd.f32 %v196_v22, %v5146_v57  ;;  %v321_v38 = vmax.f32 %v285_v26, 0.0  ;;  %v4535_v22 = vld [vmem:[%s7812_s7 + $0xd4] sm:$0xf0]  ;;  %v159_v26 = vadd.f32 %v5158_v63, %v5154_v60  ;;  %1314 = vmatpush.bf16.msrb.mxu2 %v4043_v23  ;;  %v3916_v13 = vld [vmem:[%s7812_s7 + $0x78] sm:$0xf0] }
  0xbc   :  { %v326_v34 = vmax.f32 %v150_v25, 0.0  ;;  %v4044_v25 = vld [vmem:[%s7812_s7 + $0x170] sm:$0xf0]  ;;  %v4523_v9 = vld [vmem:[%s7812_s7 + $0x74] sm:$0xf0] }
  0xbd   :  { %v327_v39 = vmax.f32 %v197_v27, 0.0  ;;  %v3970_v23 = vld [vmem:[%s7812_s7 + $0xc8] sm:$0xf] }
  0xbe   :  { %1283 = vmatpush.bf16.msra.mxu1 %v3991_v21 }
  0xbf   :  { %v240_v28 = vpop.f32.mrf.mxu2 }
  0xc0   :  { %v241_v29 = vadd.f32 %v240_v28, %v5170_v16  ;;  %v287_v30 = vpop.f32.mrf.mxu3 }
  0xc1   :  { %v288_v31 = vadd.f32 %v287_v30, %v5172_v18  ;;  %v152_v32 = vpop.f32.mrf.mxu0  ;;  %v3964_v30 = vld [vmem:[%s7812_s7 + $0xd8] sm:$0xf0] }
  0xc2   :  { %v324_v35 = vmax.f32 %v241_v29, 0.0  ;;  %v153_v36 = vadd.f32 %v152_v32, %v5154_v60  ;;  %v199_v37 = vpop.f32.mrf.mxu1  ;;  %v4532_v29 = vld [vmem:[%s7812_s7 + $0xc4] sm:$0xf]  ;;  %v206_v32 = vadd.f32 %v5160_v0, %v5146_v57  ;;  %v4529_v0 = vld [vmem:[%s7812_s7 + $0xa4] sm:$0xf0] }
  0xc3   :  { %v325_v40 = vmax.f32 %v288_v31, 0.0  ;;  %v200_v41 = vadd.f32 %v199_v37, %v5146_v57  ;;  %v4047_v31 = vor.u32 %v4551_v24, %v4044_v25  ;;  %v3963_v37 = vor.u32 %v4535_v22, %v3962_v14  ;;  %v3994_v14 = vld [vmem:[%s7812_s7 + $0xf8] sm:$0xf]  ;;  %v4536_v24 = vld [vmem:[%s7812_s7 + $0xdc] sm:$0xf0] }
  0xc4   :  { %v330_v43 = vmax.f32 %v153_v36, 0.0  ;;  %v352_v44 = vpack.c.bf16 %v324_v35, %v320_v33  ;;  %v3995_v21 = vor.u32 %v4542_v17, %v3994_v14  ;;  %v4533_v25 = vld [vmem:[%s7812_s7 + $0xcc] sm:$0xf]  ;;  %v4546_v14 = vld [vmem:[%s7812_s7 + $0x134] sm:$0xf] }
  0xc5   :  { %v331_v45 = vmax.f32 %v200_v41, 0.0  ;;  %v353_v46 = vpack.c.bf16 %v325_v40, %v321_v38  ;;  %1347 = vmatpush.bf16.msrb.mxu3 %v4047_v31  ;;  %v3967_v40 = vor.u32 %v4532_v29, %v3964_v30  ;;  %v338_v41 = vmax.f32 %v159_v26, 0.0  ;;  %1251 = vmatpush.bf16.msra.mxu0 %v3963_v37  ;;  %v3890_v29 = vld [vmem:[%s7812_s7 + $0x30] sm:$0xf]  ;;  %v4517_v30 = vld [vmem:[%s7812_s7 + $0x44] sm:$0xf0] }
  0xc6   :  { %708 = vmatmul.bf16.gmra.mxu2 %v352_v44  ;;  %v354_v47 = vpack.c.bf16 %v330_v43, %v326_v34  ;;  %v4526_v43 = vld [vmem:[%s7812_s7 + $0x94] sm:$0xf]  ;;  %v3940_v44 = vld [vmem:[%s7812_s7 + $0xa8] sm:$0xf0]  ;;  %v3971_v26 = vor.u32 %v4536_v24, %v3970_v23  ;;  %v771_v23 = vpop.permute.xlu0 %770 }
  0xc7   :  { %742 = vmatmul.bf16.gmra.mxu3 %v353_v46  ;;  %v243_v48 = vpop.f32.mrf.mxu2  ;;  %v355_v49 = vpack.c.bf16 %v331_v45, %v327_v39  ;;  %v339_v45 = vmax.f32 %v206_v32, 0.0  ;;  %1284 = vmatpush.bf16.msra.mxu1 %v3967_v40  ;;  %v3943_v51 = vor.u32 %v4526_v43, %v3940_v44  ;;  %v4514_v31 = vld [vmem:[%s7812_s7 + $0x34] sm:$0xf]  ;;  %v3891_v32 = vor.u32 %v4517_v30, %v3890_v29  ;;  %v4524_v40 = vld [vmem:[%s7812_s7 + $0x7c] sm:$0xf0] }
  0xc8   :  { %v290_v52 = vpop.f32.mrf.mxu3  ;;  %645 = vmatmul.bf16.gmra.mxu0 %v354_v47  ;;  %v244_v10 = vadd.f32 %v243_v48, %v5170_v16  ;;  %v3948_v37 = vld [vmem:[%s7812_s7 + $0xb0] sm:$0xf0]  ;;  %v3866_v43 = vld [vmem:[%s7812_s7] sm:$0xf]  ;;  %v4511_v44 = vld [vmem:[%s7812_s7 + $0x14] sm:$0xf0] }
  0xc9   :  { %679 = vmatmul.bf16.gmra.mxu1 %v355_v49  ;;  %v155_v3 = vpop.f32.mrf.mxu0  ;;  %v291_v11 = vadd.f32 %v290_v52, %v5172_v18  ;;  %v4601_v29 = vld [vmem:[%s7813_s8 + $0x164] sm:$0xf0] }
  0xca   :  { %v202_v7 = vpop.f32.mrf.mxu1  ;;  %v156_v12 = vadd.f32 %v155_v3, %v5154_v60  ;;  %v328_v33 = vmax.f32 %v244_v10, 0.0  ;;  %v888_v60 = vld [vmem:[%s7811_s2 + $0x38] sm:$0xff] }
  0xcb   :  { %v203_v19 = vadd.f32 %v202_v7, %v5146_v57  ;;  %v329_v63 = vmax.f32 %v291_v11, 0.0  ;;  %v3938_v57 = vld [vmem:[%s7812_s7 + $0x90] sm:$0xf]  ;;  %929 = vperm.xlu2 %4658, %v888_v60   ;;  %1285 = vmatpush.bf16.msra.mxu1 %v3943_v51  ;;  %v4020_v7 = vld [vmem:[%s7812_s7 + $0x140] sm:$0xf0]  ;;  %v3915_v11 = vor.u32 %v4523_v9, %v3914_v8 }
  0xcc   :  { %v334_v35 = vmax.f32 %v156_v12, 0.0  ;;  %v3939_v48 = vor.u32 %v4529_v0, %v3938_v57  ;;  %v4520_v12 = vld [vmem:[%s7812_s7 + $0x64] sm:$0xf]  ;;  %v4530_v60 = vld [vmem:[%s7812_s7 + $0xac] sm:$0xf0] }
  0xcd   :  { %v335_v38 = vmax.f32 %v203_v19, 0.0  ;;  %v3919_v15 = vor.u32 %v4520_v12, %v3916_v13  ;;  %v4539_v19 = vld [vmem:[%s7812_s7 + $0xfc] sm:$0xf]  ;;  %v4521_v57 = vld [vmem:[%s7812_s7 + $0x6c] sm:$0xf] }
  0xce   :  { %v358_v47 = vpack.c.bf16 %v338_v41, %v334_v35  ;;  %1252 = vmatpush.bf16.msra.mxu0 %v3939_v48  ;;  %v3924_v41 = vld [vmem:[%s7812_s7 + $0x80] sm:$0xf0]  ;;  %v4515_v48 = vld [vmem:[%s7812_s7 + $0x3c] sm:$0xf]  ;;  %v5449_v9 = vld [vmem:[%s7809_s6] ss:$0 sm:$0xff] }
  0xcf   :  { %v246_v20 = vpop.f32.mrf.mxu2  ;;  %v359_v50 = vpack.c.bf16 %v339_v45, %v335_v38  ;;  %1286 = vmatpush.bf16.msra.mxu1 %v3919_v15  ;;  %v3867_v45 = vor.u32 %v4511_v44, %v3866_v43  ;;  %v4026_v12 = vld [vmem:[%s7812_s7 + $0x130] sm:$0xf]  ;;  %v4549_v13 = vld [vmem:[%s7812_s7 + $0x144] sm:$0xf0] }
  0xd0   :  { %v247_v27 = vadd.f32 %v246_v20, %v5170_v16  ;;  %v293_v28 = vpop.f32.mrf.mxu3  ;;  %v3996_v20 = vld [vmem:[%s7812_s7 + $0x110] sm:$0xf0] }
  0xd1   :  { %v294_v34 = vadd.f32 %v293_v28, %v5172_v18  ;;  %v3999_v22 = vor.u32 %v4539_v19, %v3996_v20  ;;  %v4027_v19 = vor.u32 %v4549_v13, %v4026_v12  ;;  %v4028_v20 = vld [vmem:[%s7812_s7 + $0x148] sm:$0xf0]  ;;  %v4631_v12 = vld [vmem:[%s7813_s8 + $0x254] sm:$0xf0] }
  0xd2   :  { %v332_v36 = vmax.f32 %v247_v27, 0.0  ;;  %1253 = vmatpush.bf16.msra.mxu0 %v3915_v11  ;;  %v3972_v27 = vld [vmem:[%s7812_s7 + $0xe0] sm:$0xf0] }
  0xd3   :  { %v333_v39 = vmax.f32 %v294_v34, 0.0  ;;  %v3975_v28 = vor.u32 %v4533_v25, %v3972_v27  ;;  %v3946_v34 = vld [vmem:[%s7812_s7 + $0x98] sm:$0xf] }
  0xd4   :  { %v356_v42 = vpack.c.bf16 %v332_v36, %v328_v33  ;;  %v3892_v33 = vld [vmem:[%s7812_s7 + $0x48] sm:$0xf0]  ;;  %v3947_v35 = vor.u32 %v4530_v60, %v3946_v34  ;;  %v4527_v36 = vld [vmem:[%s7812_s7 + $0x9c] sm:$0xf]  ;;  %v4540_v34 = vld [vmem:[%s7812_s7 + $0x104] sm:$0xf] }
  0xd5   :  { %v357_v46 = vpack.c.bf16 %v333_v39, %v329_v63  ;;  %v3895_v63 = vor.u32 %v4514_v31, %v3892_v33  ;;  %v3951_v38 = vor.u32 %v4527_v36, %v3948_v37  ;;  %v3922_v39 = vld [vmem:[%s7812_s7 + $0x68] sm:$0xf]  ;;  %v4543_v33 = vld [vmem:[%s7812_s7 + $0x114] sm:$0xf0]  ;;  %v4418_v36 = vld [vmem:[%s7813_s8 + $0x2d0] sm:$0xf] }
  0xd6   :  { %713 = vmatmul.bf16.gmra.mxu2 %v356_v42  ;;  %1254 = vmatpush.bf16.msra.mxu0 %v3891_v32  ;;  %v3923_v0 = vor.u32 %v4524_v40, %v3922_v39  ;;  %v3927_v42 = vor.u32 %v4521_v57, %v3924_v41  ;;  %v4002_v32 = vld [vmem:[%s7812_s7 + $0x100] sm:$0xf]  ;;  %v4649_v37 = vld [vmem:[%s7813_s8 + $0x2e4] sm:$0xf0] }
  0xd7   :  { %747 = vmatmul.bf16.gmra.mxu3 %v357_v46  ;;  %v249_v49 = vpop.f32.mrf.mxu2  ;;  %1287 = vmatpush.bf16.msra.mxu1 %v3895_v63  ;;  %v3898_v46 = vld [vmem:[%s7812_s7 + $0x38] sm:$0xf]  ;;  %v4003_v63 = vor.u32 %v4543_v33, %v4002_v32  ;;  %v4202_v41 = vld [vmem:[%s7813_s8 + $0x120] sm:$0xf] }
  0xd8   :  { %v296_v52 = vpop.f32.mrf.mxu3  ;;  %650 = vmatmul.bf16.gmra.mxu0 %v358_v47  ;;  %v250_v53 = vadd.f32 %v249_v49, %v5170_v16  ;;  %v4518_v47 = vld [vmem:[%s7812_s7 + $0x4c] sm:$0xf0] }
  0xd9   :  { %684 = vmatmul.bf16.gmra.mxu1 %v359_v50  ;;  %v297_v54 = vadd.f32 %v296_v52, %v5172_v18  ;;  %v3899_v49 = vor.u32 %v4518_v47, %v3898_v46  ;;  %v3900_v50 = vld [vmem:[%s7812_s7 + $0x50] sm:$0xf0]  ;;  %v4394_v46 = vld [vmem:[%s7813_s8 + $0x2a0] sm:$0xf]  ;;  %v4643_v47 = vld [vmem:[%s7813_s8 + $0x2b4] sm:$0xf0] }
  0xda   :  { %v336_v61 = vmax.f32 %v250_v53, 0.0  ;;  %1255 = vmatpush.bf16.msra.mxu0 %v3867_v45  ;;  %v3903_v51 = vor.u32 %v4515_v48, %v3900_v50  ;;  %v4508_v53 = vld [vmem:[%s7812_s7 + $0x4] sm:$0xf]  ;;  %v776_v48 = vpop.permute.xlu0 %775 }
  0xdb   :  { %v337_v1 = vmax.f32 %v297_v54, 0.0  ;;  %v3868_v54 = vld [vmem:[%s7812_s7 + $0x18] sm:$0xf0] }
  0xdf   :  { %v252_v55 = vpop.f32.mrf.mxu2 }
  0xe0   :  { %v253_v56 = vadd.f32 %v252_v55, %v5170_v16  ;;  %v299_v58 = vpop.f32.mrf.mxu3  ;;  %v4545_v16 = vld [vmem:[%s7812_s7 + $0x12c] sm:$0xf]  ;;  %v3874_v55 = vld [vmem:[%s7812_s7 + $0x8] sm:$0xf] }
  0xe1   :  { %v300_v59 = vadd.f32 %v299_v58, %v5172_v18  ;;  %v4019_v18 = vor.u32 %v4548_v6, %v4018_v5  ;;  %v4023_v10 = vor.u32 %v4545_v16, %v4020_v7  ;;  %v3871_v58 = vor.u32 %v4508_v53, %v3868_v54  ;;  %v4555_v5 = vld [vmem:[%s7812_s7 + $0x174] sm:$0xf0]  ;;  %v4552_v6 = vld [vmem:[%s7812_s7 + $0x164] sm:$0xf]  ;;  %v4052_v7 = vld [vmem:[%s7812_s7 + $0x178] sm:$0xf0] }
  0xe2   :  { %v340_v62 = vmax.f32 %v253_v56, 0.0  ;;  %v4055_v8 = vor.u32 %v4552_v6, %v4052_v7  ;;  %v4589_v53 = vld [vmem:[%s7813_s8 + $0x104] sm:$0xf0]  ;;  %v4154_v6 = vld [vmem:[%s7813_s8 + $0xc0] sm:$0xf] }
  0xe3   :  { %v341_v2 = vmax.f32 %v300_v59, 0.0  ;;  %1315 = vmatpush.bf16.msrb.mxu2 %v4019_v18  ;;  %1348 = vmatpush.bf16.msrb.mxu3 %v4023_v10  ;;  %v4512_v59 = vld [vmem:[%s7812_s7 + $0x1c] sm:$0xf0] }
  0xe4   :  { %v360_v3 = vpack.c.bf16 %v340_v62, %v336_v61  ;;  %v4509_v61 = vld [vmem:[%s7812_s7 + $0xc] sm:$0xf]  ;;  %v3876_v62 = vld [vmem:[%s7812_s7 + $0x20] sm:$0xf0]  ;;  %1288 = vmatpush.bf16.msra.mxu1 %v3871_v58 }
  0xe5   :  { %v361_v4 = vpack.c.bf16 %v341_v2, %v337_v1  ;;  %v3875_v1 = vor.u32 %v4512_v59, %v3874_v55  ;;  %v3879_v2 = vor.u32 %v4509_v61, %v3876_v62  ;;  %v3978_v59 = vld [vmem:[%s7812_s7 + $0xd0] sm:$0xf]  ;;  %v4537_v61 = vld [vmem:[%s7812_s7 + $0xe4] sm:$0xf0] }
  0xe6   :  { %718 = vmatmul.bf16.gmra.mxu2 %v360_v3  ;;  %v4370_v62 = vld [vmem:[%s7813_s8 + $0x270] sm:$0xf] }
  0xe7   :  { %752 = vmatmul.bf16.gmra.mxu3 %v361_v4  ;;  %1316 = vmatpush.bf16.msrb.mxu2 %v3995_v21  ;;  %v4050_v4 = vld [vmem:[%s7812_s7 + $0x160] sm:$0xf] }
  0xe8   :  { %1349 = vmatpush.bf16.msrb.mxu3 %v3999_v22  ;;  %v4051_v18 = vor.u32 %v4555_v5, %v4050_v4  ;;  %1413 = vmatpush.bf16.msrb.mxu1 %v4055_v8  ;;  %v4031_v22 = vor.u32 %v4546_v14, %v4028_v20  ;;  %v4130_v20 = vld [vmem:[%s7813_s8 + $0x90] sm:$0xf] }
  0xea   :  { %1380 = vmatpush.bf16.msrb.mxu0 %v4051_v18  ;;  %v781_v18 = vpop.permute.xlu1 %780 }
  0xeb   :  { %1317 = vmatpush.bf16.msrb.mxu2 %v3971_v26 }
  0xec   :  { %1350 = vmatpush.bf16.msrb.mxu3 %v3975_v28  ;;  %1414 = vmatpush.bf16.msrb.mxu1 %v4031_v22  ;;  %v4226_v28 = vld [vmem:[%s7813_s8 + $0x150] sm:$0xf]  ;;  %v4577_v22 = vld [vmem:[%s7813_s8 + $0xa4] sm:$0xf0] }
  0xed   :  { %v5473_v30 = vor.u32 %v4601_v29, %v4226_v28 }
  0xee   :  { %1381 = vmatpush.bf16.msrb.mxu0 %v4027_v19  ;;  %v3980_v19 = vld [vmem:[%s7812_s7 + $0xe8] sm:$0xf0] }
  0xef   :  { %1318 = vmatpush.bf16.msrb.mxu2 %v3947_v35  ;;  %8028 = vst [vmem:[#allocation3_spill] sm:$0xff] %v5473_v30  ;;  %v4004_v35 = vld [vmem:[%s7812_s7 + $0x118] sm:$0xf0] }
  0xf0   :  { %1351 = vmatpush.bf16.msrb.mxu3 %v3951_v38  ;;  %v4007_v57 = vor.u32 %v4540_v34, %v4004_v35  ;;  %v4106_v34 = vld [vmem:[%s7813_s8 + $0x60] sm:$0xf] }
  0xf2   :  { %1382 = vmatpush.bf16.msrb.mxu0 %v4003_v63  ;;  %1415 = vmatpush.bf16.msrb.mxu1 %v4007_v57 }
  0xf3   :  { %1319 = vmatpush.bf16.msrb.mxu2 %v3923_v0  ;;  %v5494_v0 = vor.u32 %v4649_v37, %v4418_v36  ;;  %v4298_v36 = vld [vmem:[%s7813_s8 + $0x1e0] sm:$0xf]  ;;  %v4619_v37 = vld [vmem:[%s7813_s8 + $0x1f4] sm:$0xf0] }
  0xf4   :  { %1352 = vmatpush.bf16.msrb.mxu3 %v3927_v42  ;;  %v4595_v42 = vld [vmem:[%s7813_s8 + $0x134] sm:$0xf0] }
  0xf5   :  { %8029 = vst [vmem:[#allocation4_spill] sm:$0xff] %v5494_v0  ;;  %v5502_v44 = vor.u32 %v4595_v42, %v4202_v41  ;;  %v4082_v41 = vld [vmem:[%s7813_s8 + $0x30] sm:$0xf]  ;;  %v4565_v42 = vld [vmem:[%s7813_s8 + $0x44] sm:$0xf0] }
  0xf7   :  { %1320 = vmatpush.bf16.msrb.mxu2 %v3899_v49  ;;  %8030 = vst [vmem:[#allocation5_spill] sm:$0xff] %v5502_v44  ;;  %v5512_v49 = vor.u32 %v4643_v47, %v4394_v46  ;;  %v3954_v47 = vld [vmem:[%s7812_s7 + $0xa0] sm:$0xf] }
  0xf8   :  { %1353 = vmatpush.bf16.msrb.mxu3 %v3903_v51 }
  0xf9   :  { %8031 = vst [vmem:[#allocation6_spill] sm:$0xff] %v5512_v49 }
  0xfb   :  { %1321 = vmatpush.bf16.msrb.mxu2 %v3875_v1 }
  0xfc   :  { %1354 = vmatpush.bf16.msrb.mxu3 %v3879_v2  ;;  %v3979_v2 = vor.u32 %v4537_v61, %v3978_v59  ;;  %v4613_v59 = vld [vmem:[%s7813_s8 + $0x1c4] sm:$0xf0] }
  0xfe   :  { %1383 = vmatpush.bf16.msrb.mxu0 %v3979_v2  ;;  %v4058_v2 = vld [vmem:[%s7813_s8] sm:$0xf] }
  0xff   :  { %2023 = vmatpush.bf16.msra.mxu2 %v5473_v30 }
 0x100   :  { %2037 = vmatpush.bf16.msra.mxu3 %v5494_v0 }
 0x103   :  { %2024 = vmatpush.bf16.msra.mxu2 %v5502_v44 }
 0x104   :  { %2038 = vmatpush.bf16.msra.mxu3 %v5512_v49 }
 0x115   :  { %v631_v52 = vpop.f32.mrf.mxu0 }
 0x116   :  { %v665_v56 = vpop.f32.mrf.mxu1  ;;  %v632_v11 = vadd.f32 %v5449_v9, %v631_v52  ;;  %v4178_v52 = vld [vmem:[%s7813_s8 + $0xf0] sm:$0xf] }
 0x117   :  { %v5522_v55 = vor.u32 %v4589_v53, %v4178_v52  ;;  %v3956_v53 = vld [vmem:[%s7812_s7 + $0xb8] sm:$0xf0] }
 0x118   :  { %v666_v24 = vadd.f32 %v665_v56, %v632_v11  ;;  %v4346_v11 = vld [vmem:[%s7813_s8 + $0x240] sm:$0xf] }
 0x119   :  { %8032 = vst [vmem:[#allocation7_spill] sm:$0xff] %v5522_v55  ;;  %2025 = vmatpush.bf16.msra.mxu2 %v5522_v55  ;;  %v5565_v14 = vor.u32 %v4631_v12, %v4346_v11  ;;  %v4250_v11 = vld [vmem:[%s7813_s8 + $0x180] sm:$0xf]  ;;  %v4607_v12 = vld [vmem:[%s7813_s8 + $0x194] sm:$0xf0] }
 0x11b   :  { %8035 = vst [vmem:[#allocation10_spill] sm:$0xff] %v5565_v14 }
 0x11d   :  { %v633_v3 = vpop.f32.mrf.mxu0 }
 0x11e   :  { %v667_v16 = vpop.f32.mrf.mxu1  ;;  %v634_v25 = vadd.f32 %v5449_v9, %v633_v3  ;;  %v4637_v3 = vld [vmem:[%s7813_s8 + $0x284] sm:$0xf0] }
 0x11f   :  { %v5543_v5 = vor.u32 %v4637_v3, %v4370_v62  ;;  %v4559_v3 = vld [vmem:[%s7813_s8 + $0x14] sm:$0xf0] }
 0x120   :  { %v668_v31 = vadd.f32 %v667_v16, %v634_v25  ;;  %v4583_v16 = vld [vmem:[%s7813_s8 + $0xd4] sm:$0xf0]  ;;  %v4322_v25 = vld [vmem:[%s7813_s8 + $0x210] sm:$0xf] }
 0x121   :  { %8033 = vst [vmem:[#allocation8_spill] sm:$0xff] %v5543_v5  ;;  %v5553_v7 = vor.u32 %v4583_v16, %v4154_v6  ;;  %2039 = vmatpush.bf16.msra.mxu3 %v5543_v5  ;;  %v4598_v16 = vld [vmem:[%s7813_s8 + $0x154] sm:$0xf] }
 0x123   :  { %8034 = vst [vmem:[#allocation9_spill] sm:$0xff] %v5553_v7  ;;  %2026 = vmatpush.bf16.msra.mxu2 %v5553_v7 }
 0x125   :  { %v636_v10 = vpop.f32.mrf.mxu0  ;;  %2040 = vmatpush.bf16.msra.mxu3 %v5565_v14 }
 0x126   :  { %v5461_v15 = vpop.f32.mrf.mxu1  ;;  %v637_v56 = vadd.f32 %v5449_v9, %v636_v10 }
 0x128   :  { %v671_v8 = vadd.f32 %v5461_v15, %v637_v56  ;;  %v4534_v15 = vld [vmem:[%s7812_s7 + $0xd4] sm:$0xf]  ;;  %v4274_v56 = vld [vmem:[%s7813_s8 + $0x1b0] sm:$0xf] }
 0x129   :  { %v699_v17 = vpop.f32.mrf.mxu2 }
 0x12a   :  { %v733_v21 = vpop.f32.mrf.mxu3  ;;  %v700_v27 = vadd.f32 %v699_v17, %v666_v24  ;;  %v5580_v24 = vor.u32 %v4577_v22, %v4130_v20  ;;  %v3930_v20 = vld [vmem:[%s7812_s7 + $0x70] sm:$0xf] }
 0x12c   :  { %v734_v38 = vadd.f32 %v733_v21, %v700_v27  ;;  %v3983_v21 = vor.u32 %v4534_v15, %v3980_v19  ;;  %8036 = vst [vmem:[#allocation11_spill] sm:$0xff] %v5580_v24  ;;  %2027 = vmatpush.bf16.msra.mxu2 %v5580_v24  ;;  %v4420_v15 = vld [vmem:[%s7813_s8 + $0x2e8] sm:$0xf0] }
 0x12d   :  { %v638_v26 = vpop.f32.mrf.mxu0 }
 0x12e   :  { %v672_v43 = vpop.f32.mrf.mxu1  ;;  %v818_v50 = vmul.f32 %v771_v23, %v734_v38  ;;  %v639_v10 = vadd.f32 %v5449_v9, %v638_v26  ;;  %v4625_v26 = vld [vmem:[%s7813_s8 + $0x224] sm:$0xf0]  ;;  %1416 = vmatpush.bf16.msrb.mxu1 %v3983_v21  ;;  %v786_v38 = vpop.permute.xlu1 %785 }
 0x12f   :  { %v5588_v29 = vor.u32 %v4625_v26, %v4322_v25  ;;  %v4525_v21 = vld [vmem:[%s7812_s7 + $0x84] sm:$0xf0]  ;;  %v3932_v26 = vld [vmem:[%s7812_s7 + $0x88] sm:$0xf0] }
 0x130   :  { %v673_v23 = vadd.f32 %v672_v43, %v639_v10  ;;  %v3931_v25 = vor.u32 %v4525_v21, %v3930_v20 }
 0x131   :  { %v701_v60 = vpop.f32.mrf.mxu2  ;;  %8037 = vst [vmem:[#allocation12_spill] sm:$0xff] %v5588_v29  ;;  %2041 = vmatpush.bf16.msra.mxu3 %v5588_v29 }
 0x132   :  { %v702_v39 = vadd.f32 %v701_v60, %v668_v31  ;;  %v735_v40 = vpop.f32.mrf.mxu3  ;;  %v4571_v60 = vld [vmem:[%s7813_s8 + $0x74] sm:$0xf0] }
 0x133   :  { %v5597_v63 = vor.u32 %v4571_v60, %v4106_v34 }
 0x134   :  { %v736_v45 = vadd.f32 %v735_v40, %v702_v39  ;;  %v5606_v39 = vor.u32 %v4619_v37, %v4298_v36  ;;  %v4640_v36 = vld [vmem:[%s7813_s8 + $0x2a4] sm:$0xf]  ;;  %v4396_v37 = vld [vmem:[%s7813_s8 + $0x2b8] sm:$0xf0] }
 0x135   :  { %v5520_v54 = vpop.f32.mrf.mxu0  ;;  %8038 = vst [vmem:[#allocation13_spill] sm:$0xff] %v5597_v63  ;;  %2028 = vmatpush.bf16.msra.mxu2 %v5597_v63 }
 0x136   :  { %v819_v51 = vmul.f32 %v776_v48, %v736_v45  ;;  %v675_v13 = vpop.f32.mrf.mxu1  ;;  %8039 = vst [vmem:[#allocation14_spill] sm:$0xff] %v5606_v39  ;;  %v642_v45 = vadd.f32 %v5449_v9, %v5520_v54  ;;  %v4531_v48 = vld [vmem:[%s7812_s7 + $0xb4] sm:$0xf0]  ;;  %2042 = vmatpush.bf16.msra.mxu3 %v5606_v39  ;;  %v5632_v54 = vor.u32 %v4565_v42, %v4082_v41 }
 0x137   :  { %v3955_v52 = vor.u32 %v4531_v48, %v3954_v47  ;;  %v4586_v48 = vld [vmem:[%s7813_s8 + $0xf4] sm:$0xf] }
 0x138   :  { %v5525_v58 = vpack.c.bf16 %v819_v51, %v818_v50  ;;  %v4528_v50 = vld [vmem:[%s7812_s7 + $0xa4] sm:$0xf]  ;;  %8040 = vst [vmem:[#allocation15_spill] sm:$0xff] %v5632_v54 }
 0x139   :  { %v704_v1 = vpop.f32.mrf.mxu2  ;;  %v3959_v62 = vor.u32 %v4528_v50, %v3956_v53  ;;  %1384 = vmatpush.bf16.msrb.mxu0 %v3955_v52  ;;  %2029 = vmatpush.bf16.msra.mxu2 %v5632_v54  ;;  %v4180_v50 = vld [vmem:[%s7813_s8 + $0x108] sm:$0xf0]  ;;  %v4634_v53 = vld [vmem:[%s7813_s8 + $0x274] sm:$0xf] }
 0x13a   :  { %v738_v4 = vpop.f32.mrf.mxu3  ;;  %1256 = vmatmul.bf16.vlgmr.msra.gmra.mxu0 %v5525_v58  ;;  %1289 = vmatmul.bf16.vlgmr.msra.gmra.mxu1 %v5525_v58  ;;  %v705_v17 = vadd.f32 %v704_v1, %v671_v8  ;;  %v5642_v1 = vor.u32 %v4613_v59, %v4274_v56  ;;  %v676_v8 = vadd.f32 %v675_v13, %v642_v45  ;;  %v4646_v13 = vld [vmem:[%s7813_s8 + $0x2d4] sm:$0xf]  ;;  %v4372_v56 = vld [vmem:[%s7813_s8 + $0x288] sm:$0xf0] }
 0x13b   :  { %1322 = vmatmul.bf16.vlgmr.msrb.gmra.mxu2 %v5525_v58  ;;  %1355 = vmatmul.bf16.vlgmr.msrb.gmra.mxu3 %v5525_v58  ;;  %v5697_v34 = vor.u32 %v4646_v13, %v4420_v15  ;;  %v4628_v15 = vld [vmem:[%s7813_s8 + $0x244] sm:$0xf] }
 0x13c   :  { %v739_v31 = vadd.f32 %v738_v4, %v705_v17  ;;  %8041 = vst [vmem:[#allocation16_spill] sm:$0xff] %v5642_v1  ;;  %v791_v4 = vpop.permute.xlu2 %790  ;;  %1417 = vmatpush.bf16.msrb.mxu1 %v3959_v62  ;;  %2043 = vmatpush.bf16.msra.mxu3 %v5642_v1  ;;  %v5667_v17 = vor.u32 %v4559_v3, %v4058_v2  ;;  %v3906_v2 = vld [vmem:[%s7812_s7 + $0x40] sm:$0xf]  ;;  %v4519_v3 = vld [vmem:[%s7812_s7 + $0x54] sm:$0xf0] }
 0x13d   :  { %v643_v27 = vpop.f32.mrf.mxu0  ;;  %8045 = vst [vmem:[#allocation20_spill] sm:$0xff] %v5697_v34  ;;  %1385 = vmatpush.bf16.msrb.mxu0 %v3931_v25  ;;  %v5730_v62 = vor.u32 %v4586_v48, %v4180_v50 }
 0x13e   :  { %v820_v40 = vmul.f32 %v781_v18, %v739_v31  ;;  %v677_v43 = vpop.f32.mrf.mxu1  ;;  %v4228_v18 = vld [vmem:[%s7813_s8 + $0x168] sm:$0xf0]  ;;  %v644_v10 = vadd.f32 %v5449_v9, %v643_v27  ;;  %8042 = vst [vmem:[#allocation17_spill] sm:$0xff] %v5667_v17  ;;  %v5689_v27 = vor.u32 %v4607_v12, %v4250_v11  ;;  %v4204_v31 = vld [vmem:[%s7813_s8 + $0x138] sm:$0xf0]  ;;  %2030 = vmatpush.bf16.msra.mxu2 %v5667_v17 }
 0x13f   :  { %v5681_v22 = vor.u32 %v4598_v16, %v4228_v18  ;;  %8048 = vst [vmem:[#allocation23_spill] sm:$0xff] %v5730_v62  ;;  %v5741_v18 = vor.u32 %v4634_v53, %v4372_v56  ;;  %v4156_v11 = vld [vmem:[%s7813_s8 + $0xd8] sm:$0xf0] }
 0x140   :  { %8044 = vst [vmem:[#allocation19_spill] sm:$0xff] %v5689_v27  ;;  %2044 = vmatpush.bf16.msra.mxu3 %v5689_v27 }
 0x141   :  { %v706_v28 = vpop.f32.mrf.mxu2  ;;  %8043 = vst [vmem:[#allocation18_spill] sm:$0xff] %v5681_v22 }
 0x142   :  { %v707_v32 = vadd.f32 %v706_v28, %v673_v23  ;;  %v740_v33 = vpop.f32.mrf.mxu3  ;;  %v4522_v23 = vld [vmem:[%s7812_s7 + $0x74] sm:$0xf]  ;;  %v4592_v28 = vld [vmem:[%s7813_s8 + $0x124] sm:$0xf]  ;;  %2051 = vmatpush.bf16.msrb.mxu2 %v5681_v22  ;;  %8049 = vst [vmem:[#allocation24_spill] sm:$0xff] %v5741_v18 }
 0x143   :  { %v5707_v41 = vor.u32 %v4592_v28, %v4204_v31  ;;  %v4513_v28 = vld [vmem:[%s7812_s7 + $0x24] sm:$0xf0] }
 0x144   :  { %v741_v35 = vadd.f32 %v740_v33, %v707_v32  ;;  %v678_v32 = vadd.f32 %v677_v43, %v644_v10  ;;  %v3935_v33 = vor.u32 %v4522_v23, %v3932_v26  ;;  %2065 = vmatpush.bf16.msrb.mxu3 %v5697_v34  ;;  %v5711_v43 = vor.u32 %v4640_v36, %v4396_v37  ;;  %v796_v45 = vpop.permute.xlu2 %795  ;;  %v4580_v10 = vld [vmem:[%s7813_s8 + $0xc4] sm:$0xf]  ;;  %v3882_v26 = vld [vmem:[%s7812_s7 + $0x10] sm:$0xf]  ;;  %v4622_v37 = vld [vmem:[%s7813_s8 + $0x214] sm:$0xf] }
 0x145   :  { %v646_v6 = vpop.f32.mrf.mxu0  ;;  %8046 = vst [vmem:[#allocation21_spill] sm:$0xff] %v5707_v41  ;;  %v5764_v25 = vor.u32 %v4580_v10, %v4156_v11 }
 0x146   :  { %v821_v57 = vmul.f32 %v786_v38, %v741_v35  ;;  %v680_v60 = vpop.f32.mrf.mxu1  ;;  %1418 = vmatpush.bf16.msrb.mxu1 %v3935_v33  ;;  %8047 = vst [vmem:[#allocation22_spill] sm:$0xff] %v5711_v43  ;;  %2052 = vmatpush.bf16.msrb.mxu2 %v5707_v41  ;;  %v647_v59 = vadd.f32 %v5449_v9, %v646_v6  ;;  %v4132_v33 = vld [vmem:[%s7813_s8 + $0xa8] sm:$0xf0] }
 0x147   :  { %v3907_v6 = vor.u32 %v4519_v3, %v3906_v2  ;;  %8050 = vst [vmem:[#allocation25_spill] sm:$0xff] %v5764_v25  ;;  %v4616_v2 = vld [vmem:[%s7813_s8 + $0x1e4] sm:$0xf]  ;;  %v4300_v3 = vld [vmem:[%s7813_s8 + $0x1f8] sm:$0xf0] }
 0x148   :  { %v5617_v46 = vpack.c.bf16 %v821_v57, %v820_v40  ;;  %2066 = vmatpush.bf16.msrb.mxu3 %v5711_v43  ;;  %v681_v21 = vadd.f32 %v680_v60, %v647_v59  ;;  %v3883_v60 = vor.u32 %v4513_v28, %v3882_v26  ;;  %v5815_v11 = vor.u32 %v4616_v2, %v4300_v3 }
 0x149   :  { %v709_v51 = vpop.f32.mrf.mxu2  ;;  %1386 = vmatpush.bf16.msrb.mxu0 %v3907_v6 }
 0x14a   :  { %v743_v61 = vpop.f32.mrf.mxu3  ;;  %1261 = vmatmul.bf16.gmra.mxu0 %v5617_v46  ;;  %1294 = vmatmul.bf16.gmra.mxu1 %v5617_v46  ;;  %v710_v19 = vadd.f32 %v709_v51, %v676_v8  ;;  %v3908_v8 = vld [vmem:[%s7812_s7 + $0x58] sm:$0xf0]  ;;  %8055 = vst [vmem:[#allocation30_spill] sm:$0xff] %v5815_v11 }
 0x14b   :  { %1327 = vmatmul.bf16.gmra.mxu2 %v5617_v46  ;;  %1360 = vmatmul.bf16.gmra.mxu3 %v5617_v46 }
 0x14c   :  { %v744_v38 = vadd.f32 %v743_v61, %v710_v19  ;;  %v4348_v19 = vld [vmem:[%s7813_s8 + $0x258] sm:$0xf0]  ;;  %2053 = vmatpush.bf16.msrb.mxu2 %v5730_v62  ;;  %2067 = vmatpush.bf16.msrb.mxu3 %v5741_v18 }
 0x14d   :  { %v648_v47 = vpop.f32.mrf.mxu0  ;;  %v5773_v31 = vor.u32 %v4628_v15, %v4348_v19  ;;  %1387 = vmatpush.bf16.msrb.mxu0 %v3883_v60 }
 0x14e   :  { %v822_v51 = vmul.f32 %v791_v4, %v744_v38  ;;  %v4516_v4 = vld [vmem:[%s7812_s7 + $0x44] sm:$0xf]  ;;  %v682_v20 = vpop.f32.mrf.mxu1  ;;  %v649_v23 = vadd.f32 %v5449_v9, %v648_v47  ;;  %v4324_v38 = vld [vmem:[%s7813_s8 + $0x228] sm:$0xf0] }
 0x14f   :  { %v3911_v13 = vor.u32 %v4516_v4, %v3908_v8  ;;  %8051 = vst [vmem:[#allocation26_spill] sm:$0xff] %v5773_v31  ;;  %v5797_v50 = vor.u32 %v4622_v37, %v4324_v38  ;;  %v801_v4 = vpop.permute.xlu0 %800  ;;  %v806_v8 = vpop.permute.xlu1 %805  ;;  %v4604_v38 = vld [vmem:[%s7813_s8 + $0x184] sm:$0xf] }
 0x150   :  { %2054 = vmatpush.bf16.msrb.mxu2 %v5764_v25  ;;  %2068 = vmatpush.bf16.msrb.mxu3 %v5773_v31 }
 0x151   :  { %v711_v35 = vpop.f32.mrf.mxu2  ;;  %1419 = vmatpush.bf16.msrb.mxu1 %v3911_v13  ;;  %8053 = vst [vmem:[#allocation28_spill] sm:$0xff] %v5797_v50  ;;  %v4084_v13 = vld [vmem:[%s7813_s8 + $0x48] sm:$0xf0] }
 0x152   :  { %v712_v40 = vadd.f32 %v711_v35, %v678_v32  ;;  %v745_v57 = vpop.f32.mrf.mxu3  ;;  %v4574_v32 = vld [vmem:[%s7813_s8 + $0x94] sm:$0xf] }
 0x153   :  { %v4510_v35 = vld [vmem:[%s7812_s7 + $0x14] sm:$0xf]  ;;  %v5794_v47 = vor.u32 %v4574_v32, %v4132_v33 }
 0x154   :  { %v746_v42 = vadd.f32 %v745_v57, %v712_v40  ;;  %v3884_v40 = vld [vmem:[%s7812_s7 + $0x28] sm:$0xf0]  ;;  %2069 = vmatpush.bf16.msrb.mxu3 %v5797_v50 }
 0x155   :  { %v651_v57 = vpop.f32.mrf.mxu0  ;;  %8052 = vst [vmem:[#allocation27_spill] sm:$0xff] %v5794_v47  ;;  %2055 = vmatpush.bf16.msrb.mxu2 %v5794_v47 }
 0x156   :  { %v823_v52 = vmul.f32 %v796_v45, %v746_v42  ;;  %v3887_v42 = vor.u32 %v4510_v35, %v3884_v40  ;;  %v683_v45 = vadd.f32 %v682_v20, %v649_v23  ;;  %v685_v10 = vpop.f32.mrf.mxu1  ;;  %v4610_v20 = vld [vmem:[%s7813_s8 + $0x1b4] sm:$0xf]  ;;  %v652_v23 = vadd.f32 %v5449_v9, %v651_v57  ;;  %v4556_v35 = vld [vmem:[%s7813_s8 + $0x4] sm:$0xf]  ;;  %v4252_v40 = vld [vmem:[%s7813_s8 + $0x198] sm:$0xf0] }
 0x158   :  { %v5727_v61 = vpack.c.bf16 %v823_v52, %v822_v51  ;;  %v4568_v51 = vld [vmem:[%s7813_s8 + $0x64] sm:$0xf]  ;;  %v4108_v52 = vld [vmem:[%s7813_s8 + $0x78] sm:$0xf0]  ;;  %1420 = vmatpush.bf16.msrb.mxu1 %v3887_v42  ;;  %2070 = vmatpush.bf16.msrb.mxu3 %v5815_v11  ;;  %v686_v57 = vadd.f32 %v685_v10, %v652_v23 }
 0x159   :  { %v714_v16 = vpop.f32.mrf.mxu2  ;;  %v5812_v6 = vor.u32 %v4568_v51, %v4108_v52  ;;  %v4236_v51 = vld [vmem:[%s7813_s8 + $0x170] sm:$0xf0]  ;;  %v4647_v52 = vld [vmem:[%s7813_s8 + $0x2dc] sm:$0xf] }
 0x15a   :  { %v748_v12 = vpop.f32.mrf.mxu3  ;;  %1266 = vmatmul.bf16.gmra.mxu0 %v5727_v61  ;;  %1299 = vmatmul.bf16.gmra.mxu1 %v5727_v61  ;;  %v715_v36 = vadd.f32 %v714_v16, %v681_v21  ;;  %v4276_v21 = vld [vmem:[%s7813_s8 + $0x1c8] sm:$0xf0] }
 0x15b   :  { %1332 = vmatmul.bf16.gmra.mxu2 %v5727_v61  ;;  %1365 = vmatmul.bf16.gmra.mxu3 %v5727_v61  ;;  %8054 = vst [vmem:[#allocation29_spill] sm:$0xff] %v5812_v6  ;;  %v5836_v60 = vor.u32 %v4610_v20, %v4276_v21  ;;  %v816_v20 = vpop.permute.xlu0 %815  ;;  %v811_v21 = vpop.permute.xlu2 %810 }
 0x15c   :  { %v749_v53 = vadd.f32 %v748_v12, %v715_v36  ;;  %v4562_v12 = vld [vmem:[%s7813_s8 + $0x34] sm:$0xf]  ;;  %2056 = vmatpush.bf16.msrb.mxu2 %v5812_v6  ;;  %v4060_v36 = vld [vmem:[%s7813_s8 + $0x18] sm:$0xf0] }
 0x15d   :  { %v5833_v28 = vor.u32 %v4562_v12, %v4084_v13  ;;  %v653_v32 = vpop.f32.mrf.mxu0  ;;  %8057 = vst [vmem:[#allocation32_spill] sm:$0xff] %v5836_v60  ;;  %2071 = vmatpush.bf16.msrb.mxu3 %v5836_v60 }
 0x15e   :  { %v824_v15 = vmul.f32 %v801_v4, %v749_v53  ;;  %v654_v42 = vadd.f32 %v5449_v9, %v653_v32  ;;  %v5870_v9 = vor.u32 %v4604_v38, %v4252_v40  ;;  %v687_v3 = vpop.f32.mrf.mxu1  ;;  %v4587_v40 = vld [vmem:[%s7813_s8 + $0xfc] sm:$0xf] }
 0x15f   :  { %8056 = vst [vmem:[#allocation31_spill] sm:$0xff] %v5833_v28 }
 0x160   :  { %2057 = vmatpush.bf16.msrb.mxu2 %v5833_v28  ;;  %8060 = vst [vmem:[#allocation35_spill] sm:$0xff] %v5870_v9  ;;  %v688_v4 = vadd.f32 %v687_v3, %v654_v42  ;;  %v4635_v42 = vld [vmem:[%s7813_s8 + $0x27c] sm:$0xf]  ;;  %v4426_v3 = vld [vmem:[%s7813_s8 + $0x2d8] sm:$0xf] }
 0x161   :  { %v716_v48 = vpop.f32.mrf.mxu2  ;;  %2072 = vmatpush.bf16.msrb.mxu3 %v5870_v9  ;;  %v4068_v9 = vld [vmem:[%s7813_s8 + $0x20] sm:$0xf0] }
 0x162   :  { %v717_v56 = vadd.f32 %v716_v48, %v683_v45  ;;  %v750_v59 = vpop.f32.mrf.mxu3  ;;  %v5856_v45 = vor.u32 %v4556_v35, %v4060_v36  ;;  %v4599_v48 = vld [vmem:[%s7813_s8 + $0x15c] sm:$0xf]  ;;  %v4641_v36 = vld [vmem:[%s7813_s8 + $0x2ac] sm:$0xf] }
 0x163   :  { %v5868_v53 = vor.u32 %v4599_v48, %v4236_v51  ;;  %v4380_v51 = vld [vmem:[%s7813_s8 + $0x290] sm:$0xf0] }
 0x164   :  { %v751_v16 = vadd.f32 %v750_v59, %v717_v56  ;;  %8058 = vst [vmem:[#allocation33_spill] sm:$0xff] %v5856_v45  ;;  %v4428_v56 = vld [vmem:[%s7813_s8 + $0x2f0] sm:$0xf0]  ;;  %2058 = vmatpush.bf16.msrb.mxu2 %v5856_v45  ;;  %v4170_v45 = vld [vmem:[%s7813_s8 + $0xd0] sm:$0xf] }
 0x165   :  { %8059 = vst [vmem:[#allocation34_spill] sm:$0xff] %v5868_v53  ;;  %v5875_v2 = vor.u32 %v4647_v52, %v4428_v56  ;;  %2107 = vmatpush.bf16.msra.mxu0 %v5868_v53  ;;  %v5919_v52 = vor.u32 %v4635_v42, %v4380_v51  ;;  %v4234_v56 = vld [vmem:[%s7813_s8 + $0x158] sm:$0xf]  ;;  %v4590_v42 = vld [vmem:[%s7813_s8 + $0x10c] sm:$0xf0] }
 0x166   :  { %v825_v19 = vmul.f32 %v806_v8, %v751_v16  ;;  %v4378_v51 = vld [vmem:[%s7813_s8 + $0x278] sm:$0xf]  ;;  %v4557_v53 = vld [vmem:[%s7813_s8 + $0xc] sm:$0xf] }
 0x167   :  { %8061 = vst [vmem:[#allocation36_spill] sm:$0xff] %v5875_v2  ;;  %2121 = vmatpush.bf16.msra.mxu1 %v5875_v2 }
 0x168   :  { %v5830_v26 = vpack.c.bf16 %v825_v19, %v824_v15  ;;  %v4593_v15 = vld [vmem:[%s7813_s8 + $0x12c] sm:$0xf]  ;;  %v4212_v19 = vld [vmem:[%s7813_s8 + $0x140] sm:$0xf0]  ;;  %8065 = vst [vmem:[#allocation40_spill] sm:$0xff] %v5919_v52 }
 0x169   :  { %v719_v33 = vpop.f32.mrf.mxu2  ;;  %v5887_v23 = vor.u32 %v4593_v15, %v4212_v19  ;;  %v4644_v15 = vld [vmem:[%s7813_s8 + $0x2bc] sm:$0xf0]  ;;  %v4581_v19 = vld [vmem:[%s7813_s8 + $0xcc] sm:$0xf] }
 0x16a   :  { %v753_v37 = vpop.f32.mrf.mxu3  ;;  %1271 = vmatmul.bf16.gmra.mxu0 %v5830_v26  ;;  %1304 = vmatmul.bf16.gmra.mxu1 %v5830_v26  ;;  %v720_v59 = vadd.f32 %v719_v33, %v686_v57  ;;  %v4188_v57 = vld [vmem:[%s7813_s8 + $0x110] sm:$0xf0] }
 0x16b   :  { %1337 = vmatmul.bf16.gmra.mxu2 %v5830_v26  ;;  %1370 = vmatmul.bf16.gmra.mxu3 %v5830_v26  ;;  %8062 = vst [vmem:[#allocation37_spill] sm:$0xff] %v5887_v23  ;;  %v5914_v48 = vor.u32 %v4587_v40, %v4188_v57  ;;  %v4186_v40 = vld [vmem:[%s7813_s8 + $0xf8] sm:$0xf] }
 0x16c   :  { %v754_v8 = vadd.f32 %v753_v37, %v720_v59  ;;  %2108 = vmatpush.bf16.msra.mxu0 %v5887_v23  ;;  %v4404_v37 = vld [vmem:[%s7813_s8 + $0x2c0] sm:$0xf0]  ;;  %v4602_v59 = vld [vmem:[%s7813_s8 + $0x16c] sm:$0xf0] }
 0x16d   :  { %v5898_v38 = vor.u32 %v4641_v36, %v4404_v37  ;;  %8064 = vst [vmem:[#allocation39_spill] sm:$0xff] %v5914_v48  ;;  %v4356_v36 = vld [vmem:[%s7813_s8 + $0x260] sm:$0xf0]  ;;  %v4218_v23 = vld [vmem:[%s7813_s8 + $0x130] sm:$0xf] }
 0x16e   :  { %v826_v32 = vmul.f32 %v811_v21, %v754_v8 }
 0x16f   :  { %8063 = vst [vmem:[#allocation38_spill] sm:$0xff] %v5898_v38  ;;  %2122 = vmatpush.bf16.msra.mxu1 %v5898_v38  ;;  %v4242_v38 = vld [vmem:[%s7813_s8 + $0x160] sm:$0xf] }
 0x170   :  { %2109 = vmatpush.bf16.msra.mxu0 %v5914_v48 }
 0x171   :  { %v721_v16 = vpop.f32.mrf.mxu2 }
 0x172   :  { %v722_v10 = vadd.f32 %v721_v16, %v688_v4  ;;  %v755_v12 = vpop.f32.mrf.mxu3  ;;  %v4650_v4 = vld [vmem:[%s7813_s8 + $0x2ec] sm:$0xf0]  ;;  %v5935_v16 = vor.u32 %v4602_v59, %v4234_v56  ;;  %v5993_v59 = vor.u32 %v4590_v42, %v4186_v40  ;;  %v4138_v40 = vld [vmem:[%s7813_s8 + $0x98] sm:$0xf] }
 0x173   :  { %2123 = vmatpush.bf16.msra.mxu1 %v5919_v52  ;;  %v5937_v8 = vor.u32 %v4650_v4, %v4426_v3  ;;  %v4638_v56 = vld [vmem:[%s7813_s8 + $0x28c] sm:$0xf0]  ;;  %v4162_v4 = vld [vmem:[%s7813_s8 + $0xc8] sm:$0xf] }
 0x174   :  { %v756_v13 = vadd.f32 %v755_v12, %v722_v10  ;;  %8066 = vst [vmem:[#allocation41_spill] sm:$0xff] %v5935_v16  ;;  %v4210_v10 = vld [vmem:[%s7813_s8 + $0x128] sm:$0xf]  ;;  %v4596_v12 = vld [vmem:[%s7813_s8 + $0x13c] sm:$0xf0]  ;;  %v5995_v3 = vor.u32 %v4638_v56, %v4378_v51 }
 0x175   :  { %8067 = vst [vmem:[#allocation42_spill] sm:$0xff] %v5937_v8  ;;  %v4578_v42 = vld [vmem:[%s7813_s8 + $0xac] sm:$0xf0]  ;;  %v4330_v51 = vld [vmem:[%s7813_s8 + $0x218] sm:$0xf] }
 0x176   :  { %v827_v33 = vmul.f32 %v816_v20, %v756_v13  ;;  %v4402_v13 = vld [vmem:[%s7813_s8 + $0x2a8] sm:$0xf]  ;;  %v4164_v20 = vld [vmem:[%s7813_s8 + $0xe0] sm:$0xf0]  ;;  %8072 = vst [vmem:[#allocation47_spill] sm:$0xff] %v5993_v59 }
 0x177   :  { %v5959_v21 = vor.u32 %v4581_v19, %v4164_v20  ;;  %v5973_v37 = vor.u32 %v4644_v15, %v4402_v13  ;;  %8073 = vst [vmem:[#allocation48_spill] sm:$0xff] %v5995_v3  ;;  %v4632_v13 = vld [vmem:[%s7813_s8 + $0x25c] sm:$0xf0]  ;;  %v4575_v15 = vld [vmem:[%s7813_s8 + $0x9c] sm:$0xf] }
 0x178   :  { %v5890_v35 = vpack.c.bf16 %v827_v33, %v826_v32  ;;  %v7818_v32 = vmov 0.0|0.0   ;;  %v4629_v33 = vld [vmem:[%s7813_s8 + $0x24c] sm:$0xf]  ;;  %v4140_v19 = vld [vmem:[%s7813_s8 + $0xb0] sm:$0xf0] }
 0x179   :  { %8068 = vst [vmem:[#allocation43_spill] sm:$0xff] %v5959_v21  ;;  %v5978_v57 = vor.u32 %v4629_v33, %v4356_v36  ;;  %2110 = vmatpush.bf16.msra.mxu0 %v5959_v21  ;;  %v6015_v20 = vor.u32 %v4575_v15, %v4140_v19  ;;  %v4626_v56 = vld [vmem:[%s7813_s8 + $0x22c] sm:$0xf0]  ;;  %v4114_v19 = vld [vmem:[%s7813_s8 + $0x68] sm:$0xf] }
 0x17a   :  { %1276 = vmatmul.bf16.gmra.mxu0 %v5890_v35  ;;  %1309 = vmatmul.bf16.gmra.mxu1 %v5890_v35  ;;  %8070 = vst [vmem:[#allocation45_spill] sm:$0xff] %v5973_v37  ;;  %v6048_v15 = vor.u32 %v4626_v56, %v4330_v51  ;;  %v4090_v56 = vld [vmem:[%s7813_s8 + $0x38] sm:$0xf] }
 0x17b   :  { %1342 = vmatmul.bf16.gmra.mxu2 %v5890_v35  ;;  %1375 = vmatmul.bf16.gmra.mxu3 %v5890_v35  ;;  %8071 = vst [vmem:[#allocation46_spill] sm:$0xff] %v5978_v57 }
 0x17c   :  { %2124 = vmatpush.bf16.msra.mxu1 %v5978_v57  ;;  %8074 = vst [vmem:[#allocation49_spill] sm:$0xff] %v6015_v20  ;;  %v4308_v57 = vld [vmem:[%s7813_s8 + $0x200] sm:$0xf0] }
 0x17d   :  { %2111 = vmatpush.bf16.msra.mxu0 %v6015_v20  ;;  %8079 = vst [vmem:[#allocation54_spill] sm:$0xff] %v6048_v15  ;;  %v4614_v20 = vld [vmem:[%s7813_s8 + $0x1cc] sm:$0xf0] }
 0x18a   :  { %1388 = vmatmul.bf16.vlgmr.msrb.gmra.mxu0 %v5525_v58  ;;  %1421 = vmatmul.bf16.vlgmr.msrb.gmra.mxu1 %v5525_v58  ;;  %v5971_v58 = vor.u32 %v4596_v12, %v4210_v10  ;;  %v4584_v10 = vld [vmem:[%s7813_s8 + $0xdc] sm:$0xf0]  ;;  %v4354_v12 = vld [vmem:[%s7813_s8 + $0x248] sm:$0xf] }
 0x18b   :  { %2031 = vmatmul.bf16.vlgmr.msra.gmra.mxu2 %v7818_v32  ;;  %2045 = vmatmul.bf16.vlgmr.msra.gmra.mxu3 %v7818_v32  ;;  %v6019_v33 = vor.u32 %v4584_v10, %v4162_v4  ;;  %v6021_v36 = vor.u32 %v4632_v13, %v4354_v12  ;;  %v4623_v4 = vld [vmem:[%s7813_s8 + $0x21c] sm:$0xf]  ;;  %v4332_v10 = vld [vmem:[%s7813_s8 + $0x230] sm:$0xf0]  ;;  %v6046_v13 = vor.u32 %v4578_v42, %v4138_v40  ;;  %v4572_v32 = vld [vmem:[%s7813_s8 + $0x7c] sm:$0xf0] }
 0x18c   :  { %2079 = vmatpush.bf16.msra.mxu2 %v5935_v16  ;;  %2093 = vmatpush.bf16.msra.mxu3 %v5937_v8  ;;  %8069 = vst [vmem:[#allocation44_spill] sm:$0xff] %v5971_v58  ;;  %v6042_v12 = vor.u32 %v4623_v4, %v4332_v10  ;;  %v4306_v4 = vld [vmem:[%s7813_s8 + $0x1e8] sm:$0xf]  ;;  %v4620_v10 = vld [vmem:[%s7813_s8 + $0x1fc] sm:$0xf0]  ;;  %v8080_v40 = vmov 0.0|0.0   ;;  %v6069_v42 = vor.u32 %v4572_v32, %v4114_v19 }
 0x18d   :  { %8075 = vst [vmem:[#allocation50_spill] sm:$0xff] %v6019_v33  ;;  %v6071_v51 = vor.u32 %v4620_v10, %v4306_v4  ;;  %v4569_v32 = vld [vmem:[%s7813_s8 + $0x6c] sm:$0xf]  ;;  %v4116_v19 = vld [vmem:[%s7813_s8 + $0x80] sm:$0xf0] }
 0x18e   :  { %8076 = vst [vmem:[#allocation51_spill] sm:$0xff] %v6021_v36  ;;  %2125 = vmatpush.bf16.msra.mxu1 %v6042_v12  ;;  %v6091_v4 = vor.u32 %v4569_v32, %v4116_v19  ;;  %v4617_v10 = vld [vmem:[%s7813_s8 + $0x1ec] sm:$0xf]  ;;  %v4066_v32 = vld [vmem:[%s7813_s8 + $0x8] sm:$0xf] }
 0x18f   :  { %8077 = vst [vmem:[#allocation52_spill] sm:$0xff] %v6042_v12  ;;  %v4282_v12 = vld [vmem:[%s7813_s8 + $0x1b8] sm:$0xf]  ;;  %v4560_v19 = vld [vmem:[%s7813_s8 + $0x1c] sm:$0xf0]  ;;  %v6111_v48 = vor.u32 %v4617_v10, %v4308_v57 }
 0x190   :  { %2080 = vmatpush.bf16.msra.mxu2 %v5971_v58  ;;  %2094 = vmatpush.bf16.msra.mxu3 %v5973_v37  ;;  %8078 = vst [vmem:[#allocation53_spill] sm:$0xff] %v6046_v13  ;;  %v6103_v52 = vor.u32 %v4614_v20, %v4282_v12  ;;  %v4608_v20 = vld [vmem:[%s7813_s8 + $0x19c] sm:$0xf0]  ;;  %v4603_v12 = vld [vmem:[%s7813_s8 + $0x174] sm:$0xf0]  ;;  %v6135_v10 = vor.u32 %v4560_v19, %v4066_v32 }
 0x191   :  { %8081 = vst [vmem:[#allocation55_spill] sm:$0xff] %v6069_v42  ;;  %2112 = vmatpush.bf16.msra.mxu0 %v6091_v4  ;;  %v4434_v57 = vld [vmem:[%s7813_s8 + $0x2e0] sm:$0xf]  ;;  %v4092_v32 = vld [vmem:[%s7813_s8 + $0x50] sm:$0xf0] }
 0x192   :  { %8082 = vst [vmem:[#allocation56_spill] sm:$0xff] %v6071_v51  ;;  %2126 = vmatpush.bf16.msra.mxu1 %v6111_v48  ;;  %v4611_v19 = vld [vmem:[%s7813_s8 + $0x1bc] sm:$0xf] }
 0x193   :  { %8083 = vst [vmem:[#allocation57_spill] sm:$0xff] %v6091_v4 }
 0x194   :  { %2081 = vmatpush.bf16.msra.mxu2 %v5993_v59  ;;  %2095 = vmatpush.bf16.msra.mxu3 %v5995_v3  ;;  %8085 = vst [vmem:[#allocation59_spill] sm:$0xff] %v6103_v52 }
 0x195   :  { %8086 = vst [vmem:[#allocation60_spill] sm:$0xff] %v6111_v48  ;;  %v4563_v48 = vld [vmem:[%s7813_s8 + $0x3c] sm:$0xf] }
 0x196   :  { %8087 = vst [vmem:[#allocation61_spill] sm:$0xff] %v6135_v10 }
 0x198   :  { %2082 = vmatpush.bf16.msra.mxu2 %v6019_v33  ;;  %2096 = vmatpush.bf16.msra.mxu3 %v6021_v36 }
 0x19a   :  { %1393 = vmatmul.bf16.gmra.mxu0 %v5617_v46  ;;  %1426 = vmatmul.bf16.gmra.mxu1 %v5617_v46  ;;  %v4566_v46 = vld [vmem:[%s7813_s8 + $0x4c] sm:$0xf0] }
 0x19b   :  { %2059 = vmatmul.bf16.vlgmr.msrb.gmra.mxu2 %v8080_v40  ;;  %2073 = vmatmul.bf16.vlgmr.msrb.gmra.mxu3 %v8080_v40  ;;  %v6101_v21 = vor.u32 %v4566_v46, %v4090_v56  ;;  %v4258_v56 = vld [vmem:[%s7813_s8 + $0x188] sm:$0xf]  ;;  %v4651_v46 = vld [vmem:[%s7813_s8 + $0x2f4] sm:$0xf0] }
 0x19c   :  { %2083 = vmatpush.bf16.msra.mxu2 %v6046_v13  ;;  %2097 = vmatpush.bf16.msra.mxu3 %v6048_v15  ;;  %v6137_v4 = vor.u32 %v4608_v20, %v4258_v56  ;;  %v6147_v2 = vor.u32 %v4651_v46, %v4434_v57  ;;  %v4410_v56 = vld [vmem:[%s7813_s8 + $0x2b0] sm:$0xf]  ;;  %v4284_v20 = vld [vmem:[%s7813_s8 + $0x1d0] sm:$0xf0]  ;;  %v4591_v57 = vld [vmem:[%s7813_s8 + $0x114] sm:$0xf0] }
 0x19d   :  { %8084 = vst [vmem:[#allocation58_spill] sm:$0xff] %v6101_v21  ;;  %v4386_v46 = vld [vmem:[%s7813_s8 + $0x280] sm:$0xf] }
 0x19e   :  { %8088 = vst [vmem:[#allocation62_spill] sm:$0xff] %v6137_v4 }
 0x19f   :  { %8090 = vst [vmem:[#allocation64_spill] sm:$0xff] %v6147_v2 }
 0x1a0   :  { %2084 = vmatpush.bf16.msra.mxu2 %v6069_v42  ;;  %2098 = vmatpush.bf16.msra.mxu3 %v6071_v51  ;;  %v4597_v51 = vld [vmem:[%s7813_s8 + $0x144] sm:$0xf0]  ;;  %v6145_v42 = vor.u32 %v4603_v12, %v4242_v38  ;;  %v4194_v12 = vld [vmem:[%s7813_s8 + $0x100] sm:$0xf] }
 0x1a1   :  { %v4645_v38 = vld [vmem:[%s7813_s8 + $0x2c4] sm:$0xf0] }
 0x1a2   :  { %8089 = vst [vmem:[#allocation63_spill] sm:$0xff] %v6145_v42 }
 0x1a4   :  { %2085 = vmatpush.bf16.msra.mxu2 %v6101_v21  ;;  %2099 = vmatpush.bf16.msra.mxu3 %v6103_v52  ;;  %v6178_v52 = vor.u32 %v4563_v48, %v4092_v32  ;;  %v6180_v21 = vor.u32 %v4611_v19, %v4284_v20  ;;  %v4605_v48 = vld [vmem:[%s7813_s8 + $0x18c] sm:$0xf]  ;;  %v4600_v32 = vld [vmem:[%s7813_s8 + $0x164] sm:$0xf] }
 0x1a5   :  { %v4648_v19 = vld [vmem:[%s7813_s8 + $0x2e4] sm:$0xf] }
 0x1a6   :  { %8091 = vst [vmem:[#allocation65_spill] sm:$0xff] %v6178_v52  ;;  %2113 = vmatpush.bf16.msra.mxu0 %v6178_v52  ;;  %2127 = vmatpush.bf16.msra.mxu1 %v6180_v21 }
 0x1a7   :  { %8092 = vst [vmem:[#allocation66_spill] sm:$0xff] %v6180_v21  ;;  %v4585_v21 = vld [vmem:[%s7813_s8 + $0xe4] sm:$0xf0] }
 0x1a8   :  { %2086 = vmatpush.bf16.msra.mxu2 %v6135_v10  ;;  %2100 = vmatpush.bf16.msra.mxu3 %v6137_v4  ;;  %v6184_v4 = vor.u32 %v4597_v51, %v4218_v23  ;;  %v6186_v10 = vor.u32 %v4645_v38, %v4410_v56  ;;  %v4639_v23 = vld [vmem:[%s7813_s8 + $0x294] sm:$0xf0]  ;;  %v4260_v51 = vld [vmem:[%s7813_s8 + $0x1a0] sm:$0xf0]  ;;  %v4436_v56 = vld [vmem:[%s7813_s8 + $0x2f8] sm:$0xf0]  ;;  %v6221_v38 = vor.u32 %v4557_v53, %v4068_v9 }
 0x1a9   :  { %v6223_v20 = vor.u32 %v4605_v48, %v4260_v51  ;;  %v4362_v53 = vld [vmem:[%s7813_s8 + $0x250] sm:$0xf]  ;;  %v4633_v9 = vld [vmem:[%s7813_s8 + $0x264] sm:$0xf0]  ;;  %v4220_v48 = vld [vmem:[%s7813_s8 + $0x148] sm:$0xf0] }
 0x1aa   :  { %8093 = vst [vmem:[#allocation67_spill] sm:$0xff] %v6184_v4  ;;  %1398 = vmatmul.bf16.gmra.mxu0 %v5727_v61  ;;  %1431 = vmatmul.bf16.gmra.mxu1 %v5727_v61  ;;  %v4244_v61 = vld [vmem:[%s7813_s8 + $0x178] sm:$0xf0]  ;;  %v4412_v51 = vld [vmem:[%s7813_s8 + $0x2c8] sm:$0xf0] }
 0x1ab   :  { %8094 = vst [vmem:[#allocation68_spill] sm:$0xff] %v6186_v10  ;;  %2087 = vmatmul.bf16.vlgmr.msra.gmra.mxu2 %v8080_v40  ;;  %2101 = vmatmul.bf16.vlgmr.msra.gmra.mxu3 %v8080_v40 }
 0x1ac   :  { %2135 = vmatpush.bf16.msrb.mxu2 %v6145_v42  ;;  %2149 = vmatpush.bf16.msrb.mxu3 %v6147_v2  ;;  %8095 = vst [vmem:[#allocation69_spill] sm:$0xff] %v6221_v38  ;;  %v6227_v2 = vor.u32 %v4591_v57, %v4194_v12  ;;  %v6229_v42 = vor.u32 %v4639_v23, %v4386_v46  ;;  %v4594_v46 = vld [vmem:[%s7813_s8 + $0x134] sm:$0xf] }
 0x1ad   :  { %8096 = vst [vmem:[#allocation70_spill] sm:$0xff] %v6223_v20  ;;  %v6243_v12 = vor.u32 %v4600_v32, %v4244_v61  ;;  %v6245_v57 = vor.u32 %v4648_v19, %v4436_v56  ;;  %v4642_v23 = vld [vmem:[%s7813_s8 + $0x2b4] sm:$0xf]  ;;  %2114 = vmatpush.bf16.msra.mxu0 %v6221_v38  ;;  %2128 = vmatpush.bf16.msra.mxu1 %v6223_v20  ;;  %v4146_v19 = vld [vmem:[%s7813_s8 + $0xa0] sm:$0xf] }
 0x1ae   :  { %8097 = vst [vmem:[#allocation71_spill] sm:$0xff] %v6227_v2  ;;  %v6263_v32 = vor.u32 %v4585_v21, %v4170_v45  ;;  %v6265_v61 = vor.u32 %v4633_v9, %v4362_v53  ;;  %v4579_v56 = vld [vmem:[%s7813_s8 + $0xb4] sm:$0xf0]  ;;  %v6281_v45 = vor.u32 %v4594_v46, %v4220_v48  ;;  %v6283_v21 = vor.u32 %v4642_v23, %v4412_v51  ;;  %v4588_v53 = vld [vmem:[%s7813_s8 + $0x104] sm:$0xf] }
 0x1af   :  { %8098 = vst [vmem:[#allocation72_spill] sm:$0xff] %v6229_v42  ;;  %v4196_v9 = vld [vmem:[%s7813_s8 + $0x118] sm:$0xf0]  ;;  %v6299_v46 = vor.u32 %v4579_v56, %v4146_v19  ;;  %v4122_v23 = vld [vmem:[%s7813_s8 + $0x70] sm:$0xf] }
 0x1b0   :  { %2136 = vmatpush.bf16.msrb.mxu2 %v6184_v4  ;;  %2150 = vmatpush.bf16.msrb.mxu3 %v6186_v10  ;;  %8099 = vst [vmem:[#allocation73_spill] sm:$0xff] %v6243_v12  ;;  %v4338_v10 = vld [vmem:[%s7813_s8 + $0x220] sm:$0xf]  ;;  %v4573_v51 = vld [vmem:[%s7813_s8 + $0x84] sm:$0xf0]  ;;  %v6321_v19 = vor.u32 %v4588_v53, %v4196_v9 }
 0x1b1   :  { %8100 = vst [vmem:[#allocation74_spill] sm:$0xff] %v6245_v57  ;;  %2163 = vmatpush.bf16.msrb.mxu0 %v6243_v12  ;;  %2177 = vmatpush.bf16.msrb.mxu1 %v6245_v57  ;;  %v4388_v57 = vld [vmem:[%s7813_s8 + $0x298] sm:$0xf0]  ;;  %v4314_v4 = vld [vmem:[%s7813_s8 + $0x1f0] sm:$0xf] }
 0x1b2   :  { %8101 = vst [vmem:[#allocation75_spill] sm:$0xff] %v6263_v32  ;;  %v4172_v12 = vld [vmem:[%s7813_s8 + $0xe8] sm:$0xf0]  ;;  %v4098_v53 = vld [vmem:[%s7813_s8 + $0x40] sm:$0xf] }
 0x1b3   :  { %8102 = vst [vmem:[#allocation76_spill] sm:$0xff] %v6265_v61  ;;  %v4567_v9 = vld [vmem:[%s7813_s8 + $0x54] sm:$0xf0] }
 0x1b4   :  { %2137 = vmatpush.bf16.msrb.mxu2 %v6227_v2  ;;  %2151 = vmatpush.bf16.msrb.mxu3 %v6229_v42  ;;  %v4627_v42 = vld [vmem:[%s7813_s8 + $0x234] sm:$0xf0]  ;;  %8103 = vst [vmem:[#allocation77_spill] sm:$0xff] %v6281_v45  ;;  %v4636_v2 = vld [vmem:[%s7813_s8 + $0x284] sm:$0xf] }
 0x1b5   :  { %8104 = vst [vmem:[#allocation78_spill] sm:$0xff] %v6283_v21  ;;  %v6301_v48 = vor.u32 %v4627_v42, %v4338_v10  ;;  %2164 = vmatpush.bf16.msrb.mxu0 %v6281_v45  ;;  %2178 = vmatpush.bf16.msrb.mxu1 %v6283_v21  ;;  %v6323_v56 = vor.u32 %v4636_v2, %v4388_v57  ;;  %v4630_v21 = vld [vmem:[%s7813_s8 + $0x254] sm:$0xf]  ;;  %v4364_v45 = vld [vmem:[%s7813_s8 + $0x268] sm:$0xf0] }
 0x1b6   :  { %8105 = vst [vmem:[#allocation79_spill] sm:$0xff] %v6299_v46  ;;  %v6339_v2 = vor.u32 %v4573_v51, %v4122_v23  ;;  %v6361_v23 = vor.u32 %v4630_v21, %v4364_v45  ;;  %v4148_v51 = vld [vmem:[%s7813_s8 + $0xb8] sm:$0xf0]  ;;  %v4074_v45 = vld [vmem:[%s7813_s8 + $0x10] sm:$0xf] }
 0x1b7   :  { %8106 = vst [vmem:[#allocation80_spill] sm:$0xff] %v6301_v48  ;;  %v6317_v42 = vpop.f32.mrf.mxu0  ;;  %v6319_v10 = vpop.f32.mrf.mxu1 }
 0x1b8   :  { %2138 = vmatpush.bf16.msrb.mxu2 %v6263_v32  ;;  %2152 = vmatpush.bf16.msrb.mxu3 %v6265_v61  ;;  %v4621_v61 = vld [vmem:[%s7813_s8 + $0x204] sm:$0xf0]  ;;  %8107 = vst [vmem:[#allocation81_spill] sm:$0xff] %v6317_v42  ;;  %v4582_v32 = vld [vmem:[%s7813_s8 + $0xd4] sm:$0xf] }
 0x1b9   :  { %8108 = vst [vmem:[#allocation82_spill] sm:$0xff] %v6319_v10  ;;  %v6341_v57 = vor.u32 %v4621_v61, %v4314_v4  ;;  %v4615_v4 = vld [vmem:[%s7813_s8 + $0x1d4] sm:$0xf0]  ;;  %2165 = vmatpush.bf16.msrb.mxu0 %v6321_v19  ;;  %2179 = vmatpush.bf16.msrb.mxu1 %v6323_v56  ;;  %v6359_v61 = vor.u32 %v4582_v32, %v4172_v12  ;;  %v4561_v10 = vld [vmem:[%s7813_s8 + $0x24] sm:$0xf0] }
 0x1ba   :  { %8109 = vst [vmem:[#allocation83_spill] sm:$0xff] %v6321_v19  ;;  %1403 = vmatmul.bf16.gmra.mxu0 %v5830_v26  ;;  %1436 = vmatmul.bf16.gmra.mxu1 %v5830_v26  ;;  %v4576_v26 = vld [vmem:[%s7813_s8 + $0xa4] sm:$0xf]  ;;  %v6377_v12 = vor.u32 %v4567_v9, %v4098_v53  ;;  %v4124_v42 = vld [vmem:[%s7813_s8 + $0x88] sm:$0xf0] }
 0x1bb   :  { %8110 = vst [vmem:[#allocation84_spill] sm:$0xff] %v6323_v56  ;;  %v4340_v56 = vld [vmem:[%s7813_s8 + $0x238] sm:$0xf0]  ;;  %v6400_v53 = vld [vmem:[%s7814_s9] sm:$0x3f] }
 0x1bc   :  { %2139 = vmatpush.bf16.msrb.mxu2 %v6299_v46  ;;  %2153 = vmatpush.bf16.msrb.mxu3 %v6301_v48  ;;  %8111 = vst [vmem:[#allocation85_spill] sm:$0xff] %v6339_v2  ;;  %v4290_v48 = vld [vmem:[%s7813_s8 + $0x1c0] sm:$0xf]  ;;  %v4624_v46 = vld [vmem:[%s7813_s8 + $0x224] sm:$0xf] }
 0x1bd   :  { %8112 = vst [vmem:[#allocation86_spill] sm:$0xff] %v6341_v57  ;;  %v6379_v32 = vor.u32 %v4615_v4, %v4290_v48  ;;  %v4609_v48 = vld [vmem:[%s7813_s8 + $0x1a4] sm:$0xf0]  ;;  %2166 = vmatpush.bf16.msrb.mxu0 %v6359_v61  ;;  %2180 = vmatpush.bf16.msrb.mxu1 %v6361_v23 }
 0x1be   :  { %8113 = vst [vmem:[#allocation87_spill] sm:$0xff] %v6359_v61  ;;  %v6384_v21 = vpop.f32.mrf.mxu2  ;;  %v6386_v19 = vpop.f32.mrf.mxu3 }
 0x1bf   :  { %8114 = vst [vmem:[#allocation88_spill] sm:$0xff] %v6361_v23  ;;  %v6402_v9 = vpop.f32.mrf.mxu0  ;;  %v6404_v4 = vpop.f32.mrf.mxu1  ;;  %v4316_v23 = vld [vmem:[%s7813_s8 + $0x208] sm:$0xf0] }
 0x1c0   :  { %2140 = vmatpush.bf16.msrb.mxu2 %v6339_v2  ;;  %2154 = vmatpush.bf16.msrb.mxu3 %v6341_v57  ;;  %8115 = vst [vmem:[#allocation89_spill] sm:$0xff] %v6377_v12  ;;  %v4266_v57 = vld [vmem:[%s7813_s8 + $0x190] sm:$0xf]  ;;  %v6408_v2 = vor.u32 %v4576_v26, %v4148_v51  ;;  %v6431_v26 = vperm.slane %v6400_v53, 0  ;;  %v6434_v51 = vperm.slane %v6400_v53, 1 }
 0x1c1   :  { %8116 = vst [vmem:[#allocation90_spill] sm:$0xff] %v6379_v32 }
 0x1c2   :  { %8117 = vst [vmem:[#allocation91_spill] sm:$0xff] %v6384_v21  ;;  %v4570_v21 = vld [vmem:[%s7813_s8 + $0x74] sm:$0xf]  ;;  %2167 = vmatpush.bf16.msrb.mxu0 %v6408_v2 }
 0x1c3   :  { %8118 = vst [vmem:[#allocation92_spill] sm:$0xff] %v6386_v19  ;;  %v6410_v19 = vor.u32 %v4624_v46, %v4340_v56  ;;  %v6426_v46 = vor.u32 %v4561_v10, %v4074_v45  ;;  %v6428_v56 = vor.u32 %v4609_v48, %v4266_v57  ;;  %v6438_v61 = vor.u32 %v4570_v21, %v4124_v42  ;;  %v4564_v10 = vld [vmem:[%s7813_s8 + $0x44] sm:$0xf]  ;;  %v4100_v57 = vld [vmem:[%s7813_s8 + $0x58] sm:$0xf0]  ;;  %v6454_v42 = vpop.permute.xlu0 %904 }
 0x1c4   :  { %8119 = vst [vmem:[#allocation93_spill] sm:$0xff] %v6402_v9  ;;  %2141 = vmatpush.bf16.msrb.mxu2 %v6377_v12  ;;  %2155 = vmatpush.bf16.msrb.mxu3 %v6379_v32  ;;  %v4612_v45 = vld [vmem:[%s7813_s8 + $0x1c4] sm:$0xf]  ;;  %v4292_v48 = vld [vmem:[%s7813_s8 + $0x1d8] sm:$0xf0]  ;;  %v967_v32 = vmul.f32 %v6434_v51, %v6454_v42 }
 0x1c5   :  { %8120 = vst [vmem:[#allocation94_spill] sm:$0xff] %v6404_v4  ;;  %v4618_v4 = vld [vmem:[%s7813_s8 + $0x1f4] sm:$0xf]  ;;  %2181 = vmatpush.bf16.msrb.mxu1 %v6410_v19 }
 0x1c6   :  { %8121 = vst [vmem:[#allocation95_spill] sm:$0xff] %v6408_v2  ;;  %v6440_v9 = vor.u32 %v4618_v4, %v4316_v23  ;;  %v6458_v23 = vpop.f32.mrf.mxu2  ;;  %v6460_v21 = vpop.f32.mrf.mxu3  ;;  %v966_v4 = vmul.f32 %v6431_v26, %v6454_v42  ;;  %2168 = vmatpush.bf16.msrb.mxu0 %v6438_v61  ;;  %v4558_v2 = vld [vmem:[%s7813_s8 + $0x14] sm:$0xf] }
 0x1c7   :  { %8122 = vst [vmem:[#allocation96_spill] sm:$0xff] %v6410_v19  ;;  %v1262_v19 = vpop.f32.mrf.mxu0  ;;  %v1295_v12 = vpop.f32.mrf.mxu1 }
 0x1c8   :  { %8123 = vst [vmem:[#allocation97_spill] sm:$0xff] %v6426_v46  ;;  %2142 = vmatpush.bf16.msrb.mxu2 %v6426_v46  ;;  %2156 = vmatpush.bf16.msrb.mxu3 %v6428_v56  ;;  %v6472_v46 = vor.u32 %v4612_v45, %v4292_v48  ;;  %v6493_v45 = vperm.slane %v6400_v53, 2 }
 0x1c9   :  { %8124 = vst [vmem:[#allocation98_spill] sm:$0xff] %v6428_v56  ;;  %2182 = vmatpush.bf16.msrb.mxu1 %v6440_v9  ;;  %v6470_v56 = vor.u32 %v4564_v10, %v4100_v57  ;;  %v4606_v10 = vld [vmem:[%s7813_s8 + $0x194] sm:$0xf]  ;;  %v4268_v57 = vld [vmem:[%s7813_s8 + $0x1a8] sm:$0xf0] }
 0x1ca   :  { %8125 = vst [vmem:[#allocation99_spill] sm:$0xff] %v6431_v26  ;;  %1408 = vmatmul.bf16.gmra.mxu0 %v5890_v35  ;;  %1441 = vmatmul.bf16.gmra.mxu1 %v5890_v35  ;;  %v6506_v48 = vor.u32 %v4606_v10, %v4268_v57 }
 0x1cb   :  { %8126 = vst [vmem:[#allocation100_spill] sm:$0xff] %v6434_v51  ;;  %2143 = vmatmul.bf16.vlgmr.msrb.gmra.mxu2 %v8080_v40  ;;  %2157 = vmatmul.bf16.vlgmr.msrb.gmra.mxu3 %v8080_v40 }
 0x1cc   :  { %8127 = vst [vmem:[#allocation101_spill] sm:$0xff] %v6440_v9  ;;  %2373 = vmatpush.bf16.msra.mxu2 %v5473_v30  ;;  %2387 = vmatpush.bf16.msra.mxu3 %v5494_v0  ;;  %v6480_v30 = vadd.f32 %v1295_v12, %v967_v32  ;;  %v4076_v0 = vld [vmem:[%s7813_s8 + $0x28] sm:$0xf0]  ;;  %v6500_v12 = vpop.permute.xlu2 %899 }
 0x1cd   :  { %8128 = vst [vmem:[#allocation102_spill] sm:$0xff] %v6460_v21  ;;  %v6478_v21 = vadd.f32 %v1262_v19, %v966_v4  ;;  %v6496_v19 = vperm.slane %v6400_v53, 3  ;;  %2169 = vmatpush.bf16.msrb.mxu0 %v6470_v56  ;;  %2183 = vmatpush.bf16.msrb.mxu1 %v6472_v46  ;;  %v6504_v32 = vor.u32 %v4558_v2, %v4076_v0  ;;  %v6510_v4 = vpop.permute.xlu1 %894 }
 0x1ce   :  { %8129 = vst [vmem:[#allocation103_spill] sm:$0xff] %v6470_v56  ;;  %v1361_v9 = vpop.f32.mrf.mxu3 }
 0x1cf   :  { %8130 = vst [vmem:[#allocation104_spill] sm:$0xff] %v6472_v46  ;;  %v969_v35 = vmul.f32 %v6496_v19, %v6454_v42  ;;  %v6520_v2 = vpop.f32.mrf.mxu0  ;;  %v6522_v10 = vpop.f32.mrf.mxu1 }
 0x1d0   :  { %8131 = vst [vmem:[#allocation105_spill] sm:$0xff] %v6478_v21  ;;  %2374 = vmatpush.bf16.msra.mxu2 %v5502_v44  ;;  %2388 = vmatpush.bf16.msra.mxu3 %v5512_v49  ;;  %v968_v21 = vmul.f32 %v6493_v45, %v6454_v42 }
 0x1d1   :  { %8132 = vst [vmem:[#allocation106_spill] sm:$0xff] %v6480_v30  ;;  %v1328_v30 = vpop.f32.mrf.mxu2  ;;  %v6518_v0 = vadd.f32 %v1361_v9, %v969_v35  ;;  %2170 = vmatpush.bf16.msrb.mxu0 %v6504_v32  ;;  %2184 = vmatpush.bf16.msrb.mxu1 %v6506_v48 }
 0x1d2   :  { %8133 = vst [vmem:[#allocation107_spill] sm:$0xff] %v6493_v45  ;;  %v6516_v56 = vadd.f32 %v1328_v30, %v968_v21 }
 0x1d3   :  { %8134 = vst [vmem:[#allocation108_spill] sm:$0xff] %v6496_v19 }
 0x1d4   :  { %8135 = vst [vmem:[#allocation109_spill] sm:$0xff] %v6504_v32  ;;  %2375 = vmatpush.bf16.msra.mxu2 %v5522_v55  ;;  %2389 = vmatpush.bf16.msra.mxu3 %v5543_v5  ;;  %v6530_v30 = vpop.permute.xlu2 %914 }
 0x1d5   :  { %8136 = vst [vmem:[#allocation110_spill] sm:$0xff] %v6506_v48  ;;  %v978_v57 = vmul.f32 %v6431_v26, %v6530_v30  ;;  %v979_v35 = vmul.f32 %v6434_v51, %v6530_v30 }
 0x1d6   :  { %8137 = vst [vmem:[#allocation111_spill] sm:$0xff] %v6516_v56  ;;  %v6534_v21 = vpop.f32.mrf.mxu3 }
 0x1d7   :  { %8138 = vst [vmem:[#allocation112_spill] sm:$0xff] %v6518_v0  ;;  %v1267_v56 = vpop.f32.mrf.mxu0  ;;  %v1300_v0 = vpop.f32.mrf.mxu1 }
 0x1d8   :  { %8139 = vst [vmem:[#allocation113_spill] sm:$0xff] %v6520_v2  ;;  %2376 = vmatpush.bf16.msra.mxu2 %v5553_v7  ;;  %2390 = vmatpush.bf16.msra.mxu3 %v5565_v14  ;;  %v6542_v2 = vadd.f32 %v1300_v0, %v979_v35  ;;  %v6546_v14 = vpop.permute.xlu1 %909  ;;  %v981_v0 = vmul.f32 %v6496_v19, %v6530_v30 }
 0x1d9   :  { %8140 = vst [vmem:[#allocation114_spill] sm:$0xff] %v6522_v10  ;;  %v6532_v9 = vpop.f32.mrf.mxu2  ;;  %v6540_v10 = vadd.f32 %v1267_v56, %v978_v57  ;;  %v980_v56 = vmul.f32 %v6493_v45, %v6530_v30 }
 0x1da   :  { %8141 = vst [vmem:[#allocation115_spill] sm:$0xff] %v6532_v9  ;;  %2115 = vmatmul.bf16.vlgmr.msra.gmra.mxu0 %v8080_v40  ;;  %2129 = vmatmul.bf16.vlgmr.msra.gmra.mxu1 %v8080_v40 }
 0x1db   :  { %8142 = vst [vmem:[#allocation116_spill] sm:$0xff] %v6534_v21  ;;  %2401 = vmatpush.bf16.msra.mxu0 %v5681_v22  ;;  %2415 = vmatpush.bf16.msra.mxu1 %v5697_v34 }
 0x1dc   :  { %8143 = vst [vmem:[#allocation117_spill] sm:$0xff] %v6540_v10  ;;  %2377 = vmatpush.bf16.msra.mxu2 %v5580_v24  ;;  %2391 = vmatpush.bf16.msra.mxu3 %v5588_v29  ;;  %v960_v29 = vmul.f32 %v6431_v26, %v6500_v12 }
 0x1dd   :  { %8144 = vst [vmem:[#allocation118_spill] sm:$0xff] %v6542_v2 }
 0x1de   :  { %8145 = vst [vmem:[#allocation119_spill] sm:$0xff] %v6546_v14  ;;  %v1366_v35 = vpop.f32.mrf.mxu3 }
 0x1df   :  { %v6560_v2 = vadd.f32 %v1366_v35, %v981_v0  ;;  %v6562_v9 = vpop.f32.mrf.mxu0  ;;  %v6564_v21 = vpop.f32.mrf.mxu1  ;;  %2402 = vmatpush.bf16.msra.mxu0 %v5707_v41  ;;  %2416 = vmatpush.bf16.msra.mxu1 %v5711_v43 }
 0x1e0   :  { %2378 = vmatpush.bf16.msra.mxu2 %v5597_v63  ;;  %2392 = vmatpush.bf16.msra.mxu3 %v5606_v39  ;;  %8148 = vst [vmem:[#allocation122_spill] sm:$0xff] %v6562_v9  ;;  %v6570_v14 = vpop.permute.xlu1 %924 }
 0x1e1   :  { %v1333_v57 = vpop.f32.mrf.mxu2  ;;  %8147 = vst [vmem:[#allocation121_spill] sm:$0xff] %v6560_v2  ;;  %v991_v35 = vmul.f32 %v6434_v51, %v6570_v14 }
 0x1e2   :  { %v6558_v10 = vadd.f32 %v1333_v57, %v980_v56  ;;  %8149 = vst [vmem:[#allocation123_spill] sm:$0xff] %v6564_v21  ;;  %v990_v57 = vmul.f32 %v6431_v26, %v6570_v14 }
 0x1e3   :  { %2403 = vmatpush.bf16.msra.mxu0 %v5730_v62  ;;  %2417 = vmatpush.bf16.msra.mxu1 %v5741_v18 }
 0x1e4   :  { %8146 = vst [vmem:[#allocation120_spill] sm:$0xff] %v6558_v10  ;;  %2379 = vmatpush.bf16.msra.mxu2 %v5632_v54  ;;  %2393 = vmatpush.bf16.msra.mxu3 %v5642_v1 }
 0x1e6   :  { %v6580_v0 = vpop.f32.mrf.mxu3 }
 0x1e7   :  { %8151 = vst [vmem:[#allocation125_spill] sm:$0xff] %v6580_v0  ;;  %v1272_v10 = vpop.f32.mrf.mxu0  ;;  %v1305_v2 = vpop.f32.mrf.mxu1  ;;  %2404 = vmatpush.bf16.msra.mxu0 %v5764_v25  ;;  %2418 = vmatpush.bf16.msra.mxu1 %v5773_v31  ;;  %v8164_v0 = vld [vmem:[#allocation55_spill] sm:$0xff] }
 0x1e8   :  { %2380 = vmatpush.bf16.msra.mxu2 %v5667_v17  ;;  %2394 = vmatpush.bf16.msra.mxu3 %v5689_v27  ;;  %v6588_v9 = vadd.f32 %v1272_v10, %v990_v57  ;;  %v6590_v21 = vadd.f32 %v1305_v2, %v991_v35  ;;  %v993_v10 = vmul.f32 %v6496_v19, %v6570_v14  ;;  %v8174_v27 = vld [vmem:[#allocation61_spill] sm:$0xff] }
 0x1e9   :  { %v6578_v56 = vpop.f32.mrf.mxu2 }
 0x1ea   :  { %8150 = vst [vmem:[#allocation124_spill] sm:$0xff] %v6578_v56  ;;  %2171 = vmatmul.bf16.vlgmr.msrb.gmra.mxu0 %v8080_v40  ;;  %2185 = vmatmul.bf16.vlgmr.msrb.gmra.mxu1 %v8080_v40  ;;  %v992_v56 = vmul.f32 %v6493_v45, %v6570_v14 }
 0x1eb   :  { %8152 = vst [vmem:[#allocation126_spill] sm:$0xff] %v6588_v9  ;;  %2405 = vmatpush.bf16.msra.mxu0 %v5794_v47  ;;  %2419 = vmatpush.bf16.msra.mxu1 %v5797_v50 }
 0x1ec   :  { %2429 = vmatpush.bf16.msrb.mxu2 %v5935_v16  ;;  %2443 = vmatpush.bf16.msrb.mxu3 %v5937_v8  ;;  %8153 = vst [vmem:[#allocation127_spill] sm:$0xff] %v6590_v21 }
 0x1ee   :  { %v1371_v57 = vpop.f32.mrf.mxu3 }
 0x1ef   :  { %v6606_v9 = vadd.f32 %v1371_v57, %v993_v10  ;;  %v6608_v40 = vpop.f32.mrf.mxu0  ;;  %v6610_v21 = vpop.f32.mrf.mxu1  ;;  %2406 = vmatpush.bf16.msra.mxu0 %v5812_v6  ;;  %2420 = vmatpush.bf16.msra.mxu1 %v5815_v11  ;;  %v6666_v11 = vperm.slane %v6400_v53, 5 }
 0x1f0   :  { %2430 = vmatpush.bf16.msrb.mxu2 %v5971_v58  ;;  %2444 = vmatpush.bf16.msrb.mxu3 %v5973_v37  ;;  %8156 = vst [vmem:[#allocation130_spill] sm:$0xff] %v6608_v40  ;;  %v8162_v40 = vld [vmem:[#allocation34_spill] sm:$0xff] }
 0x1f1   :  { %v1338_v2 = vpop.f32.mrf.mxu2  ;;  %8155 = vst [vmem:[#allocation129_spill] sm:$0xff] %v6606_v9  ;;  %v8161_v9 = vld [vmem:[#allocation35_spill] sm:$0xff] }
 0x1f2   :  { %v6604_v35 = vadd.f32 %v1338_v2, %v992_v56  ;;  %8157 = vst [vmem:[#allocation131_spill] sm:$0xff] %v6610_v21  ;;  %v8163_v21 = vld [vmem:[#allocation36_spill] sm:$0xff] }
 0x1f3   :  { %2407 = vmatpush.bf16.msra.mxu0 %v5833_v28  ;;  %2421 = vmatpush.bf16.msra.mxu1 %v5836_v60  ;;  %v8176_v60 = vld [vmem:[#allocation43_spill] sm:$0xff]  ;;  %8186 = vst [vmem:[#allocation139_spill] sm:$0xff] %v6666_v11 }
 0x1f4   :  { %2431 = vmatpush.bf16.msrb.mxu2 %v5993_v59  ;;  %2445 = vmatpush.bf16.msrb.mxu3 %v5995_v3  ;;  %8154 = vst [vmem:[#allocation128_spill] sm:$0xff] %v6604_v35  ;;  %v8160_v35 = vld [vmem:[#allocation33_spill] sm:$0xff] }
 0x1f5   :  { %v8166_v3 = vld [vmem:[#allocation37_spill] sm:$0xff] }
 0x1f6   :  { %v6622_v10 = vpop.f32.mrf.mxu3 }
 0x1f7   :  { %8159 = vst [vmem:[#allocation133_spill] sm:$0xff] %v6622_v10  ;;  %v1277_v2 = vpop.f32.mrf.mxu0  ;;  %v1310_v57 = vpop.f32.mrf.mxu1  ;;  %2408 = vmatpush.bf16.msra.mxu0 %v8160_v35  ;;  %2422 = vmatpush.bf16.msra.mxu1 %v8161_v9  ;;  %v8172_v9 = vld [vmem:[#allocation39_spill] sm:$0xff] }
 0x1f8   :  { %2432 = vmatpush.bf16.msrb.mxu2 %v6019_v33  ;;  %2446 = vmatpush.bf16.msrb.mxu3 %v6021_v36  ;;  %v8165_v36 = vld [vmem:[#allocation56_spill] sm:$0xff]  ;;  %v8169_v2 = vld [vmem:[#allocation59_spill] sm:$0xff] }
 0x1f9   :  { %v6620_v56 = vpop.f32.mrf.mxu2 }
 0x1fa   :  { %8158 = vst [vmem:[#allocation132_spill] sm:$0xff] %v6620_v56  ;;  %v8168_v56 = vld [vmem:[#allocation58_spill] sm:$0xff] }
 0x1fb   :  { %2457 = vmatpush.bf16.msrb.mxu0 %v8162_v40  ;;  %2471 = vmatpush.bf16.msrb.mxu1 %v8163_v21  ;;  %v8173_v21 = vld [vmem:[#allocation40_spill] sm:$0xff] }
 0x1fc   :  { %2433 = vmatpush.bf16.msrb.mxu2 %v6046_v13  ;;  %2447 = vmatpush.bf16.msrb.mxu3 %v6048_v15  ;;  %v8167_v15 = vld [vmem:[#allocation38_spill] sm:$0xff] }
 0x1fe   :  { %v1376_v10 = vpop.f32.mrf.mxu3 }
 0x1ff   :  { %2458 = vmatpush.bf16.msrb.mxu0 %v8166_v3  ;;  %2472 = vmatpush.bf16.msrb.mxu1 %v8167_v15  ;;  %v6634_v37 = vpop.f32.mrf.mxu0  ;;  %v6636_v8 = vpop.f32.mrf.mxu1  ;;  %v8177_v15 = vld [vmem:[#allocation46_spill] sm:$0xff] }
 0x200   :  { %2434 = vmatpush.bf16.msrb.mxu2 %v8164_v0  ;;  %2448 = vmatpush.bf16.msrb.mxu3 %v8165_v36  ;;  %8170 = vst [vmem:[#allocation134_spill] sm:$0xff] %v6634_v37  ;;  %v8175_v36 = vld [vmem:[#allocation62_spill] sm:$0xff] }
 0x201   :  { %v1343_v57 = vpop.f32.mrf.mxu2  ;;  %8171 = vst [vmem:[#allocation135_spill] sm:$0xff] %v6636_v8  ;;  %v8180_v8 = vld [vmem:[#allocation49_spill] sm:$0xff] }
 0x203   :  { %2459 = vmatpush.bf16.msrb.mxu0 %v8172_v9  ;;  %2473 = vmatpush.bf16.msrb.mxu1 %v8173_v21  ;;  %v8182_v21 = vld [vmem:[#allocation57_spill] sm:$0xff] }
 0x204   :  { %2435 = vmatpush.bf16.msrb.mxu2 %v8168_v56  ;;  %2449 = vmatpush.bf16.msrb.mxu3 %v8169_v2  ;;  %v8181_v2 = vld [vmem:[#allocation52_spill] sm:$0xff]  ;;  %v8192_v9 = vld [vmem:[#allocation93_spill] sm:$0xff] }
 0x205   :  { %v1260_v59 = vadd.f32 %v8192_v9, %v960_v29 }
 0x206   :  { %v6646_v57 = vpop.f32.mrf.mxu3 }
 0x207   :  { %2460 = vmatpush.bf16.msrb.mxu0 %v8176_v60  ;;  %2474 = vmatpush.bf16.msrb.mxu1 %v8177_v15  ;;  %8179 = vst [vmem:[#allocation137_spill] sm:$0xff] %v6646_v57  ;;  %v6648_v10 = vpop.f32.mrf.mxu0  ;;  %v6650_v37 = vpop.f32.mrf.mxu1  ;;  %v6663_v57 = vperm.slane %v6400_v53, 4 }
 0x208   :  { %2436 = vmatpush.bf16.msrb.mxu2 %v8174_v27  ;;  %2450 = vmatpush.bf16.msrb.mxu3 %v8175_v36  ;;  %v8183_v27 = vld [vmem:[#allocation60_spill] sm:$0xff] }
 0x209   :  { %v6644_v56 = vpop.f32.mrf.mxu2  ;;  %8185 = vst [vmem:[#allocation138_spill] sm:$0xff] %v6663_v57 }
 0x20a   :  { %8178 = vst [vmem:[#allocation136_spill] sm:$0xff] %v6644_v56  ;;  %v8184_v56 = vld [vmem:[#allocation66_spill] sm:$0xff] }
 0x20b   :  { %2461 = vmatpush.bf16.msrb.mxu0 %v8180_v8  ;;  %2475 = vmatpush.bf16.msrb.mxu1 %v8181_v2  ;;  %v970_v2 = vmul.f32 %v6663_v57, %v6454_v42 }
 0x20e   :  { %v2046_v1 = vpop.f32.mrf.mxu3 }
 0x20f   :  { %2462 = vmatpush.bf16.msrb.mxu0 %v8182_v21  ;;  %2476 = vmatpush.bf16.msrb.mxu1 %v8183_v27  ;;  %v6656_v0 = vpop.f32.mrf.mxu0  ;;  %v6658_v15 = vpop.f32.mrf.mxu1  ;;  %v971_v21 = vmul.f32 %v6666_v11, %v6454_v42 }
 0x211   :  { %v2032_v36 = vpop.f32.mrf.mxu2 }
 0x213   :  { %2463 = vmatpush.bf16.msrb.mxu0 %v6178_v52  ;;  %2477 = vmatpush.bf16.msrb.mxu1 %v8184_v56  ;;  %v954_v56 = vmul.f32 %v6431_v26, %v6510_v4 }
 0x216   :  { %v2048_v52 = vpop.f32.mrf.mxu3 }
 0x217   :  { %2464 = vmatpush.bf16.msrb.mxu0 %v6221_v38  ;;  %2478 = vmatpush.bf16.msrb.mxu1 %v6223_v20  ;;  %v1394_v39 = vpop.f32.mrf.mxu0  ;;  %v1427_v8 = vpop.f32.mrf.mxu1  ;;  %v8189_v38 = vld [vmem:[#allocation81_spill] sm:$0xff] }
 0x218   :  { %v6676_v13 = vadd.f32 %v1394_v39, %v970_v2  ;;  %v6678_v53 = vadd.f32 %v1427_v8, %v971_v21  ;;  %v1258_v50 = vadd.f32 %v8189_v38, %v954_v56  ;;  %v982_v38 = vmul.f32 %v6663_v57, %v6530_v30 }
 0x219   :  { %v2034_v27 = vpop.f32.mrf.mxu2 }
 0x21a   :  { %8187 = vst [vmem:[#allocation140_spill] sm:$0xff] %v6676_v13  ;;  %v2033_v20 = vadd.f32 %v2032_v36, %v1258_v50  ;;  %v2035_v5 = vadd.f32 %v2034_v27, %v1260_v59  ;;  %v983_v50 = vmul.f32 %v6666_v11, %v6530_v30  ;;  %v8195_v27 = vld [vmem:[#allocation82_spill] sm:$0xff] }
 0x21b   :  { %8188 = vst [vmem:[#allocation141_spill] sm:$0xff] %v6678_v53 }
 0x21c   :  { %v2047_v33 = vadd.f32 %v2046_v1, %v2033_v20  ;;  %v2049_v2 = vadd.f32 %v2048_v52, %v2035_v5  ;;  %v955_v20 = vmul.f32 %v6434_v51, %v6510_v4 }
 0x21e   :  { %v2074_v18 = vpop.f32.mrf.mxu3  ;;  %v4440_v39 = vmul.f32 -1.442695, %v2047_v33  ;;  %v1291_v59 = vadd.f32 %v8195_v27, %v955_v20  ;;  %v4444_v5 = vmul.f32 -1.442695, %v2049_v2 }
 0x21f   :  { %v6683_v31 = vpop.f32.mrf.mxu0  ;;  %v6685_v42 = vpop.f32.mrf.mxu1 }
 0x220   :  { %8190 = vst [vmem:[#allocation81_spill] sm:$0xff] %v6683_v31  ;;  %4661 = vpow2.f32 %v4440_v39  ;;  %v961_v39 = vmul.f32 %v6434_v51, %v6500_v12 }
 0x221   :  { %v2060_v60 = vpop.f32.mrf.mxu2  ;;  %8191 = vst [vmem:[#allocation142_spill] sm:$0xff] %v6685_v42  ;;  %4663 = vpow2.f32 %v4444_v5 }
 0x222   :  { %v2061_v33 = vadd.f32 %v2060_v60, %v1291_v59  ;;  %v8199_v60 = vld [vmem:[#allocation91_spill] sm:$0xff] }
 0x226   :  { %v2076_v52 = vpop.f32.mrf.mxu3  ;;  %v4662_v9 = vpop.eup %4661 }
 0x227   :  { %v1399_v36 = vpop.f32.mrf.mxu0  ;;  %v1432_v1 = vpop.f32.mrf.mxu1  ;;  %v6705_v13 = vadd.f32 1.0, %v4662_v9  ;;  %v994_v9 = vmul.f32 %v6663_v57, %v6570_v14 }
 0x228   :  { %v6694_v21 = vadd.f32 %v1399_v36, %v982_v38  ;;  %v6696_v29 = vadd.f32 %v1432_v1, %v983_v50  ;;  %v2075_v38 = vadd.f32 %v2074_v18, %v2061_v33  ;;  %v956_v50 = vmul.f32 %v6493_v45, %v6510_v4  ;;  %v8198_v1 = vld [vmem:[#allocation94_spill] sm:$0xff]  ;;  %v4664_v20 = vpop.eup %4663 }
 0x229   :  { %v2062_v8 = vpop.f32.mrf.mxu2  ;;  %v1293_v2 = vadd.f32 %v8198_v1, %v961_v39  ;;  %4665 = vrcp.f32 %v6705_v13  ;;  %v995_v18 = vmul.f32 %v6666_v11, %v6570_v14  ;;  %v6716_v33 = vadd.f32 1.0, %v4664_v20 }
 0x22a   :  { %8193 = vst [vmem:[#allocation93_spill] sm:$0xff] %v6694_v21  ;;  %v1324_v27 = vadd.f32 %v8199_v60, %v956_v50  ;;  %v4441_v59 = vmul.f32 -1.442695, %v2075_v38  ;;  %vm2228_vm3 = vweird.f32 %v6705_v13 }
 0x22b   :  { %8194 = vst [vmem:[#allocation143_spill] sm:$0xff] %v6696_v29  ;;  %v2063_v5 = vadd.f32 %v2062_v8, %v1293_v2  ;;  %v962_v8 = vmul.f32 %v6493_v45, %v6500_v12  ;;  %vm2288_vm7 = vweird.f32 %v6716_v33 }
 0x22c   :  { %4667 = vpow2.f32 %v4441_v59 }
 0x22d   :  { %v2077_v39 = vadd.f32 %v2076_v52, %v2063_v5  ;;  %v1326_v60 = vadd.f32 %v6458_v23, %v962_v8  ;;  %4669 = vrcp.f32 %v6716_v33 }
 0x22e   :  { %v2102_v29 = vpop.f32.mrf.mxu3 }
 0x22f   :  { %v6699_v56 = vpop.f32.mrf.mxu0  ;;  %v6701_v30 = vpop.f32.mrf.mxu1  ;;  %v4445_v14 = vmul.f32 -1.442695, %v2077_v39 }
 0x230   :  { %8196 = vst [vmem:[#allocation82_spill] sm:$0xff] %v6699_v56  ;;  %v4666_v38 = vpop.eup %4665 }
 0x231   :  { %8197 = vst [vmem:[#allocation144_spill] sm:$0xff] %v6701_v30  ;;  %v2088_v36 = vpop.f32.mrf.mxu2  ;;  %v2224_v20 = vmul.f32 %v4666_v38, %v6705_v13  ;;  %4671 = vpow2.f32 %v4445_v14  ;;  %v958_v14 = vmul.f32 %v6663_v57, %v6510_v4  ;;  %vm2229_vm2 = vweird.f32 %v4666_v38 }
 0x232   :  { %v2089_v30 = vadd.f32 %v2088_v36, %v1324_v27  ;;  %v4668_v27 = vpop.eup %4667  ;;  %vm2230_vm4 = vmor %vm2228_vm3, %vm2229_vm2 }
 0x234   :  { %v2103_v36 = vadd.f32 %v2102_v29, %v2089_v30  ;;  %v6733_v29 = vpop.eup %4669 }
 0x235   :  { %v2284_v30 = vmul.f32 %v6733_v29, %v6716_v33  ;;  %vm2289_vm6 = vweird.f32 %v6733_v29 }
 0x236   :  { %v4442_v59 = vmul.f32 -1.442695, %v2103_v36  ;;  %vm6773_vm8 = vmor %vm2288_vm7, %vm2289_vm6 }
 0x237   :  { %v1404_v21 = vpop.f32.mrf.mxu0  ;;  %v1437_v56 = vpop.f32.mrf.mxu1 }
 0x238   :  { %v6718_v1 = vadd.f32 %v1404_v21, %v994_v9  ;;  %v6720_v50 = vadd.f32 %v1437_v56, %v995_v18  ;;  %v2104_v21 = vpop.f32.mrf.mxu3  ;;  %v2225_v9 = vsub.f32 1.0, %v2224_v20  ;;  %v6731_v18 = vadd.f32 1.0, %v4668_v27  ;;  %v4672_v8 = vpop.eup %4671 }
 0x239   :  { %v2090_v2 = vpop.f32.mrf.mxu2  ;;  %4673 = vpow2.f32 %v4442_v59  ;;  %v2285_v20 = vsub.f32 1.0, %v2284_v30  ;;  %v6740_v27 = vadd.f32 1.0, %v4672_v8  ;;  %v1390_v59 = vadd.f32 %v6648_v10, %v958_v14 }
 0x23a   :  { %8200 = vst [vmem:[#allocation94_spill] sm:$0xff] %v6718_v1  ;;  %v2091_v52 = vadd.f32 %v2090_v2, %v1326_v60  ;;  %4675 = vrcp.f32 %v6731_v18  ;;  %v2226_v39 = vmul.f32 %v4666_v38, %v2225_v9  ;;  %vm2243_vm11 = vweird.f32 %v6731_v18 }
 0x23b   :  { %8201 = vst [vmem:[#allocation91_spill] sm:$0xff] %v6720_v50  ;;  %v2286_v10 = vmul.f32 %v6733_v29, %v2285_v20  ;;  %vm2303_vm15 = vweird.f32 %v6740_v27 }
 0x23c   :  { %v2105_v23 = vadd.f32 %v2104_v21, %v2091_v52  ;;  %v2234_v52 = vand.u32 2147483648, %v6705_v13 }
 0x23e   :  { %v4446_v36 = vmul.f32 -1.442695, %v2105_v23  ;;  %v2235_v14 = vor.u32 1.1754944e-38, %v2234_v52 }
 0x23f   :  { %v6727_v5 = vpop.f32.mrf.mxu0  ;;  %v6729_v56 = vpop.f32.mrf.mxu1 }
 0x240   :  { %8202 = vst [vmem:[#allocation145_spill] sm:$0xff] %v6727_v5  ;;  %v4674_v50 = vpop.eup %4673  ;;  %4677 = vpow2.f32 %v4446_v36 }
 0x241   :  { %8203 = vst [vmem:[#allocation146_spill] sm:$0xff] %v6729_v56  ;;  %v2227_v56 = vadd.f32 %v4666_v38, %v2226_v39  ;;  %v6744_v21 = vpop.eup %4675  ;;  %v6746_v9 = vadd.f32 1.0, %v4674_v50  ;;  %4679 = vrcp.f32 %v6740_v27 }
 0x242   :  { %v2239_v8 = vmul.f32 %v6744_v21, %v6731_v18  ;;  %vm2244_vm10 = vweird.f32 %v6744_v21 }
 0x243   :  { %v2231_v39 = vsel %vm2230_vm4, %v4666_v38, %v2227_v56  ;;  %4681 = vrcp.f32 %v6746_v9  ;;  %v2287_v38 = vadd.f32 %v6733_v29, %v2286_v10  ;;  %v957_v56 = vmul.f32 %v6496_v19, %v6510_v4  ;;  %vm6798_vm12 = vmor %vm2243_vm11, %vm2244_vm10 }
 0x244   :  { %v2240_v52 = vsub.f32 1.0, %v2239_v8  ;;  %v2292_v10 = vand.u32 2147483647, %v6716_v33  ;;  %v8208_v8 = vld [vmem:[#allocation92_spill] sm:$0xff]  ;;  %vm2258_vm2 = vweird.f32 %v6746_v9 }
 0x246   :  { %v2241_v53 = vmul.f32 %v6744_v21, %v2240_v52  ;;  %vm2293_vm9 = vcmp.eq.f32.partialorder %v2292_v10, 8.507059e+37 }
 0x247   :  { %v1409_v2 = vpop.f32.mrf.mxu0  ;;  %v1442_v60 = vpop.f32.mrf.mxu1 }
 0x248   :  { %v2232_v60 = vand.u32 2147483647, %v6705_v13  ;;  %v4678_v13 = vpop.eup %4677  ;;  %v2242_v52 = vadd.f32 %v6744_v21, %v2241_v53  ;;  %v8215_v53 = vld [vmem:[#allocation73_spill] sm:$0xff] }
 0x24a   :  { %vm2233_vm5 = vcmp.eq.f32.partialorder %v2232_v60, 8.507059e+37  ;;  %v6767_v60 = vpop.eup %4679 }
 0x24b   :  { %v2299_v31 = vmul.f32 %v6767_v60, %v6740_v27  ;;  %vm2304_vm14 = vweird.f32 %v6767_v60 }
 0x24c   :  { %vm6819_vm0 = vmor %vm2303_vm15, %vm2304_vm14 }
 0x24e   :  { %v2144_v23 = vpop.f32.mrf.mxu2  ;;  %v2158_v2 = vpop.f32.mrf.mxu3 }
 0x24f   :  { %v2145_v30 = vadd.f32 %v2144_v23, %v1390_v59  ;;  %v6755_v50 = vpop.f32.mrf.mxu0  ;;  %v6757_v1 = vpop.f32.mrf.mxu1  ;;  %v964_v59 = vmul.f32 %v6663_v57, %v6500_v12  ;;  %v2236_v23 = vsel %vm2233_vm5, %v2235_v14, %v2231_v39 }
 0x250   :  { %8204 = vst [vmem:[#allocation147_spill] sm:$0xff] %v6755_v50 }
 0x251   :  { %v2159_v36 = vadd.f32 %v2158_v2, %v2145_v30  ;;  %8205 = vst [vmem:[#allocation148_spill] sm:$0xff] %v6757_v1  ;;  %v1392_v20 = vadd.f32 %v6656_v0, %v964_v59  ;;  %v2294_v2 = vand.u32 2147483648, %v6716_v33  ;;  %v6769_v30 = vadd.f32 1.0, %v4678_v13  ;;  %v6777_v0 = vpop.eup %4681 }
 0x252   :  { %v2347_v1 = vsub.f32 1.0, %v2236_v23  ;;  %v1357_v59 = vadd.f32 %v8208_v8, %v957_v56  ;;  %v2291_v13 = vsel %vm6773_vm8, %v6733_v29, %v2287_v38  ;;  %v2254_v29 = vmul.f32 %v6777_v0, %v6746_v9 }
 0x253   :  { %4683 = vtanh.f32 %v2159_v36  ;;  %vm2259_vm1 = vweird.f32 %v6777_v0  ;;  %vm2318_vm7 = vweird.f32 %v6769_v30 }
 0x254   :  { %4685 = vrcp.f32 %v6769_v30  ;;  %vm2260_vm4 = vmor %vm2258_vm2, %vm2259_vm1 }
 0x256   :  { %v2146_v50 = vpop.f32.mrf.mxu2  ;;  %v2160_v39 = vpop.f32.mrf.mxu3 }
 0x257   :  { %v2147_v36 = vadd.f32 %v2146_v50, %v1392_v20  ;;  %v2295_v50 = vor.u32 1.1754944e-38, %v2294_v2  ;;  %v2349_v20 = vmul.f32 0.0, %v2347_v1  ;;  %v2116_v57 = vpop.f32.mrf.mxu0  ;;  %v2130_v45 = vpop.f32.mrf.mxu1 }
 0x258   :  { %v2117_v8 = vadd.f32 %v2116_v57, %v1357_v59  ;;  %v2247_v57 = vand.u32 2147483647, %v6731_v18  ;;  %v2246_v59 = vsel %vm6798_vm12, %v6744_v21, %v2242_v52 }
 0x259   :  { %v4684_v5 = vpop.eup %4683  ;;  %v2161_v33 = vadd.f32 %v2160_v39, %v2147_v36  ;;  %v2296_v56 = vsel %vm2293_vm9, %v2295_v50, %v2291_v13  ;;  %v2300_v39 = vsub.f32 1.0, %v2299_v31  ;;  %v2249_v36 = vand.u32 2147483648, %v6731_v18 }
 0x25a   :  { %v2351_v42 = vmul.f32 %v4684_v5, %v2236_v23  ;;  %v2131_v2 = vadd.f32 %v2130_v45, %v2117_v8  ;;  %v2348_v1 = vsub.f32 1.0, %v2296_v56  ;;  %v963_v5 = vmul.f32 %v6496_v19, %v6500_v12  ;;  %v6796_v10 = vpop.eup %4685 }
 0x25b   :  { %4687 = vtanh.f32 %v2161_v33  ;;  %v2255_v31 = vsub.f32 1.0, %v2254_v29  ;;  %v2301_v13 = vmul.f32 %v6767_v60, %v2300_v39  ;;  %v2250_v33 = vor.u32 1.1754944e-38, %v2249_v36 }
 0x25c   :  { %v2353_v38 = vadd.f32 %v2351_v42, %v2349_v20  ;;  %v4443_v23 = vmul.f32 -1.442695, %v2131_v2  ;;  %v8211_v42 = vld [vmem:[#allocation102_spill] sm:$0xff]  ;;  %v2350_v18 = vmul.f32 0.0, %v2348_v1  ;;  %vm2248_vm13 = vcmp.eq.f32.partialorder %v2247_v57, 8.507059e+37 }
 0x25d   :  { %v1359_v14 = vadd.f32 %v8211_v42, %v963_v5  ;;  %v2314_v29 = vmul.f32 %v6796_v10, %v6769_v30  ;;  %v2251_v19 = vsel %vm2248_vm13, %v2250_v33, %v2246_v59  ;;  %v2256_v42 = vmul.f32 %v6777_v0, %v2255_v31 }
 0x25e   :  { %4689 = vtanh.f32 %v2353_v38  ;;  %v2302_v21 = vadd.f32 %v6767_v60, %v2301_v13  ;;  %v959_v1 = vmul.f32 %v6666_v11, %v6510_v4  ;;  %v2307_v57 = vand.u32 2147483647, %v6740_v27 }
 0x25f   :  { %4691 = vpow2.f32 %v4443_v23  ;;  %v2118_v20 = vpop.f32.mrf.mxu0  ;;  %v2132_v8 = vpop.f32.mrf.mxu1  ;;  %v2315_v31 = vsub.f32 1.0, %v2314_v29  ;;  %vm2319_vm6 = vweird.f32 %v6796_v10 }
 0x260   :  { %v2119_v38 = vadd.f32 %v2118_v20, %v1359_v14  ;;  %v1423_v14 = vadd.f32 %v6650_v37, %v959_v1  ;;  %v2306_v4 = vsel %vm6819_vm0, %v6767_v60, %v2302_v21  ;;  %vm2308_vm3 = vcmp.eq.f32.partialorder %v2307_v57, 8.507059e+37  ;;  %vm2320_vm8 = vmor %vm2318_vm7, %vm2319_vm6 }
 0x261   :  { %v4688_v45 = vpop.eup %4687  ;;  %v2316_v60 = vmul.f32 %v6796_v10, %v2315_v31 }
 0x262   :  { %v2352_v50 = vmul.f32 %v4688_v45, %v2296_v56  ;;  %v2133_v39 = vadd.f32 %v2132_v8, %v2119_v38  ;;  %v2309_v56 = vand.u32 2147483648, %v6740_v27  ;;  %v2257_v45 = vadd.f32 %v6777_v0, %v2256_v42 }
 0x263   :  { %v2264_v27 = vand.u32 2147483648, %v6746_v9  ;;  %v965_v42 = vmul.f32 %v6666_v11, %v6500_v12  ;;  %v2324_v12 = vand.u32 2147483648, %v6769_v30 }
 0x264   :  { %v4690_v2 = vpop.eup %4689  ;;  %v2354_v5 = vadd.f32 %v2352_v50, %v2350_v18  ;;  %v4447_v23 = vmul.f32 -1.442695, %v2133_v39  ;;  %v2310_v59 = vor.u32 1.1754944e-38, %v2309_v56  ;;  %v2262_v18 = vand.u32 2147483647, %v6746_v9 }
 0x265   :  { %v6812_v52 = vmul.f32 %v4690_v2, %v2251_v19  ;;  %v4692_v36 = vpop.eup %4691  ;;  %v2261_v8 = vsel %vm2260_vm4, %v6777_v0, %v2257_v45  ;;  %v2265_v29 = vor.u32 1.1754944e-38, %v2264_v27  ;;  %v2317_v0 = vadd.f32 %v6796_v10, %v2316_v60 }
 0x266   :  { %4693 = vtanh.f32 %v2354_v5  ;;  %v6823_v19 = vadd.f32 1.0, %v4692_v36  ;;  %v2311_v20 = vsel %vm2308_vm3, %v2310_v59, %v2306_v4  ;;  %vm2263_vm5 = vcmp.eq.f32.partialorder %v2262_v18, 8.507059e+37 }
 0x267   :  { %4695 = vpow2.f32 %v4447_v23  ;;  %v2172_v13 = vpop.f32.mrf.mxu0  ;;  %v2186_v33 = vpop.f32.mrf.mxu1  ;;  %v2266_v21 = vsel %vm2263_vm5, %v2265_v29, %v2261_v8  ;;  %v1425_v36 = vadd.f32 %v6658_v15, %v965_v42  ;;  %v8214_v23 = vld [vmem:[#allocation63_spill] sm:$0xff]  ;;  %v2322_v15 = vand.u32 2147483647, %v6769_v30  ;;  %v8217_v8 = vld [vmem:[#allocation77_spill] sm:$0xff] }
 0x268   :  { %4697 = vrcp.f32 %v6823_v19  ;;  %v2173_v50 = vadd.f32 %v2172_v13, %v1423_v14  ;;  %v2359_v57 = vsub.f32 1.0, %v2266_v21  ;;  %v2321_v27 = vsel %vm2320_vm8, %v6796_v10, %v2317_v0  ;;  %v8218_v0 = vld [vmem:[#allocation71_spill] sm:$0xff] }
 0x269   :  { %v2325_v18 = vor.u32 1.1754944e-38, %v2324_v12  ;;  %vm2323_vm9 = vcmp.eq.f32.partialorder %v2322_v15, 8.507059e+37  ;;  %v2279_v10 = vand.u32 2147483648, %v6823_v19  ;;  %vm2273_vm11 = vweird.f32 %v6823_v19 }
 0x26a   :  { %v2187_v2 = vadd.f32 %v2186_v33, %v2173_v50  ;;  %v2361_v50 = vmul.f32 0.0, %v2359_v57 }
 0x26b   :  { %v2326_v30 = vsel %vm2323_vm9, %v2325_v18, %v2321_v27  ;;  %v2280_v15 = vor.u32 1.1754944e-38, %v2279_v10  ;;  %v8221_v27 = vld [vmem:[#allocation87_spill] sm:$0xff] }
 0x26c   :  { %v4694_v37 = vpop.eup %4693  ;;  %4699 = vtanh.f32 %v2187_v2  ;;  %v2360_v42 = vsub.f32 1.0, %v2326_v30 }
 0x26d   :  { %v6837_v38 = vmul.f32 %v4694_v37, %v2311_v20  ;;  %v4696_v5 = vpop.eup %4695  ;;  %v8216_v20 = vld [vmem:[#allocation67_spill] sm:$0xff] }
 0x26e   :  { %v4698_v39 = vpop.eup %4697  ;;  %v6845_v56 = vadd.f32 1.0, %v4696_v5 }
 0x26f   :  { %v6843_v9 = vpack.c.bf16 %v6837_v38, %v6812_v52  ;;  %v2269_v1 = vmul.f32 %v4698_v39, %v6823_v19  ;;  %v2174_v31 = vpop.f32.mrf.mxu0  ;;  %v2188_v4 = vpop.f32.mrf.mxu1  ;;  %vm2274_vm10 = vweird.f32 %v4698_v39 }
 0x270   :  { %4701 = vrcp.f32 %v6845_v56  ;;  %v2175_v14 = vadd.f32 %v2174_v31, %v1425_v36  ;;  %v2277_v36 = vand.u32 2147483647, %v6823_v19  ;;  %vm2275_vm12 = vmor %vm2273_vm11, %vm2274_vm10  ;;  %v2339_v19 = vand.u32 2147483648, %v6845_v56 }
 0x271   :  { %2381 = vmatmul.bf16.vlgmr.msra.gmra.mxu2 %v6843_v9  ;;  %2409 = vmatmul.bf16.vlgmr.msra.gmra.mxu0 %v6843_v9  ;;  %v2270_v45 = vsub.f32 1.0, %v2269_v1  ;;  %vm2333_vm15 = vweird.f32 %v6845_v56 }
 0x272   :  { %2485 = vmatpush.bf16.msra.mxu2 %v8214_v23  ;;  %2513 = vmatpush.bf16.msra.mxu0 %v8215_v53  ;;  %v4700_v59 = vpop.eup %4699  ;;  %v2189_v33 = vadd.f32 %v2188_v4, %v2175_v14  ;;  %v8220_v4 = vld [vmem:[#allocation75_spill] sm:$0xff]  ;;  %vm2278_vm13 = vcmp.eq.f32.partialorder %v2277_v36, 8.507059e+37 }
 0x273   :  { %v2271_v13 = vmul.f32 %v4698_v39, %v2270_v45  ;;  %v2363_v37 = vmul.f32 %v4700_v59, %v2266_v21  ;;  %v8219_v21 = vld [vmem:[#allocation83_spill] sm:$0xff]  ;;  %v2362_v45 = vmul.f32 0.0, %v2360_v42 }
 0x274   :  { %4703 = vtanh.f32 %v2189_v33 }
 0x275   :  { %v2365_v2 = vadd.f32 %v2363_v37, %v2361_v50  ;;  %v2272_v29 = vadd.f32 %v4698_v39, %v2271_v13  ;;  %v8223_v37 = vld [vmem:[#allocation95_spill] sm:$0xff] }
 0x276   :  { %2486 = vmatpush.bf16.msra.mxu2 %v8216_v20  ;;  %2514 = vmatpush.bf16.msra.mxu0 %v8217_v8  ;;  %v4702_v60 = vpop.eup %4701 }
 0x277   :  { %v2329_v5 = vmul.f32 %v4702_v60, %v6845_v56  ;;  %4705 = vtanh.f32 %v2365_v2  ;;  %v2276_v57 = vsel %vm2275_vm12, %v4698_v39, %v2272_v29  ;;  %vm2334_vm14 = vweird.f32 %v4702_v60  ;;  %v8222_v39 = vld [vmem:[#allocation79_spill] sm:$0xff] }
 0x278   :  { %v2281_v13 = vsel %vm2278_vm13, %v2280_v15, %v2276_v57  ;;  %vm2335_vm0 = vmor %vm2333_vm15, %vm2334_vm14  ;;  %v2340_v29 = vor.u32 1.1754944e-38, %v2339_v19  ;;  %v8230_v15 = vld [vmem:[#allocation3_spill] sm:$0xff]  ;;  %v8238_v19 = vld [vmem:[#allocation96_spill] sm:$0xff] }
 0x279   :  { %v2330_v1 = vsub.f32 1.0, %v2329_v5  ;;  %v8224_v5 = vld [vmem:[#allocation85_spill] sm:$0xff] }
 0x27a   :  { %2487 = vmatpush.bf16.msra.mxu2 %v8218_v0  ;;  %2515 = vmatpush.bf16.msra.mxu0 %v8219_v21  ;;  %v4704_v12 = vpop.eup %4703 }
 0x27b   :  { %v2331_v31 = vmul.f32 %v4702_v60, %v2330_v1  ;;  %v2364_v14 = vmul.f32 %v4704_v12, %v2326_v30  ;;  %v2337_v30 = vand.u32 2147483647, %v6845_v56  ;;  %v8225_v1 = vld [vmem:[#allocation89_spill] sm:$0xff]  ;;  %v8226_v12 = vld [vmem:[#allocation103_spill] sm:$0xff] }
 0x27c   :  { %v8227_v56 = vld [vmem:[#allocation97_spill] sm:$0xff] }
 0x27d   :  { %v4706_v59 = vpop.eup %4705  ;;  %v2366_v33 = vadd.f32 %v2364_v14, %v2362_v45  ;;  %v2332_v18 = vadd.f32 %v4702_v60, %v2331_v31  ;;  %vm2338_vm1 = vcmp.eq.f32.partialorder %v2337_v30, 8.507059e+37  ;;  %v8229_v31 = vld [vmem:[#allocation74_spill] sm:$0xff]  ;;  %v8231_v45 = vld [vmem:[#allocation68_spill] sm:$0xff] }
 0x27e   :  { %2488 = vmatpush.bf16.msra.mxu2 %v8220_v4  ;;  %2516 = vmatpush.bf16.msra.mxu0 %v8221_v27  ;;  %v6872_v50 = vmul.f32 %v4706_v59, %v2281_v13  ;;  %v8232_v14 = vld [vmem:[#allocation78_spill] sm:$0xff]  ;;  %v8233_v59 = vld [vmem:[#allocation72_spill] sm:$0xff] }
 0x27f   :  { %4707 = vtanh.f32 %v2366_v33  ;;  %v2336_v2 = vsel %vm2335_vm0, %v4702_v60, %v2332_v18  ;;  %v8228_v60 = vld [vmem:[#allocation64_spill] sm:$0xff]  ;;  %v8239_v30 = vld [vmem:[#allocation86_spill] sm:$0xff] }
 0x280   :  { %v2341_v42 = vsel %vm2338_vm1, %v2340_v29, %v2336_v2  ;;  %v8234_v13 = vld [vmem:[#allocation84_spill] sm:$0xff]  ;;  %v8240_v2 = vld [vmem:[#allocation101_spill] sm:$0xff]  ;;  %v8241_v29 = vld [vmem:[#allocation90_spill] sm:$0xff] }
 0x281   :  { %2437 = vmatmul.bf16.vlgmr.msrb.gmra.mxu2 %v6843_v9  ;;  %2465 = vmatmul.bf16.vlgmr.msrb.gmra.mxu0 %v6843_v9  ;;  %v8235_v33 = vld [vmem:[#allocation76_spill] sm:$0xff] }
 0x282   :  { %2489 = vmatpush.bf16.msra.mxu2 %v8222_v39  ;;  %2517 = vmatpush.bf16.msra.mxu0 %v8223_v37  ;;  %v8236_v18 = vld [vmem:[#allocation88_spill] sm:$0xff] }
 0x285   :  { %v4708_v10 = vpop.eup %4707 }
 0x286   :  { %2490 = vmatpush.bf16.msra.mxu2 %v8224_v5  ;;  %2518 = vmatpush.bf16.msra.mxu0 %v6438_v61  ;;  %v6883_v36 = vmul.f32 %v4708_v10, %v2341_v42  ;;  %v8242_v10 = vld [vmem:[#allocation98_spill] sm:$0xff]  ;;  %v8243_v42 = vld [vmem:[#allocation4_spill] sm:$0xff] }
 0x288   :  { %v2372_v57 = vpack.c.bf16 %v6872_v50, %v6883_v36 }
 0x28a   :  { %2491 = vmatpush.bf16.msra.mxu2 %v8225_v1  ;;  %2519 = vmatpush.bf16.msra.mxu0 %v8226_v12 }
 0x28b   :  { %2395 = vmatmul.bf16.vlgmr.msra.gmra.mxu3 %v2372_v57  ;;  %2423 = vmatmul.bf16.vlgmr.msra.gmra.mxu1 %v2372_v57 }
 0x28c   :  { %2499 = vmatpush.bf16.msra.mxu3 %v8228_v60  ;;  %2527 = vmatpush.bf16.msra.mxu1 %v8229_v31 }
 0x28e   :  { %2492 = vmatpush.bf16.msra.mxu2 %v8227_v56  ;;  %2520 = vmatpush.bf16.msra.mxu0 %v6504_v32 }
 0x290   :  { %2500 = vmatpush.bf16.msra.mxu3 %v8231_v45  ;;  %2528 = vmatpush.bf16.msra.mxu1 %v8232_v14 }
 0x291   :  { %2493 = vmatmul.bf16.vlgmr.msra.gmra.mxu2 %v6843_v9  ;;  %2521 = vmatmul.bf16.vlgmr.msra.gmra.mxu0 %v6843_v9  ;;  %v8237_v9 = vld [vmem:[#allocation80_spill] sm:$0xff] }
 0x292   :  { %2723 = vmatpush.bf16.msrb.mxu2 %v8230_v15  ;;  %2751 = vmatpush.bf16.msrb.mxu0 %v5681_v22 }
 0x294   :  { %2501 = vmatpush.bf16.msra.mxu3 %v8233_v59  ;;  %2529 = vmatpush.bf16.msra.mxu1 %v8234_v13 }
 0x296   :  { %2724 = vmatpush.bf16.msrb.mxu2 %v5502_v44  ;;  %2752 = vmatpush.bf16.msrb.mxu0 %v5707_v41 }
 0x298   :  { %2502 = vmatpush.bf16.msra.mxu3 %v8235_v33  ;;  %2530 = vmatpush.bf16.msra.mxu1 %v8236_v18 }
 0x29a   :  { %2725 = vmatpush.bf16.msrb.mxu2 %v5522_v55  ;;  %2753 = vmatpush.bf16.msrb.mxu0 %v5730_v62  ;;  %v8286_v55 = vld [vmem:[#allocation119_spill] sm:$0xff] }
 0x29b   :  { %2451 = vmatmul.bf16.vlgmr.msrb.gmra.mxu3 %v2372_v57  ;;  %2479 = vmatmul.bf16.vlgmr.msrb.gmra.mxu1 %v2372_v57 }
 0x29c   :  { %2503 = vmatpush.bf16.msra.mxu3 %v8237_v9  ;;  %2531 = vmatpush.bf16.msra.mxu1 %v8238_v19 }
 0x29e   :  { %2726 = vmatpush.bf16.msrb.mxu2 %v5553_v7  ;;  %2754 = vmatpush.bf16.msrb.mxu0 %v5764_v25  ;;  %v8285_v7 = vld [vmem:[#allocation105_spill] sm:$0xff] }
 0x2a0   :  { %2504 = vmatpush.bf16.msra.mxu3 %v8239_v30  ;;  %2532 = vmatpush.bf16.msra.mxu1 %v8240_v2 }
 0x2a2   :  { %2727 = vmatpush.bf16.msrb.mxu2 %v5580_v24  ;;  %2755 = vmatpush.bf16.msrb.mxu0 %v5794_v47  ;;  %v8255_v47 = vld [vmem:[#allocation49_spill] sm:$0xff]  ;;  %v8256_v24 = vld [vmem:[#allocation14_spill] sm:$0xff] }
 0x2a4   :  { %2505 = vmatpush.bf16.msra.mxu3 %v8241_v29  ;;  %2533 = vmatpush.bf16.msra.mxu1 %v6472_v46 }
 0x2a6   :  { %2728 = vmatpush.bf16.msrb.mxu2 %v5597_v63  ;;  %2756 = vmatpush.bf16.msrb.mxu0 %v5812_v6  ;;  %v8251_v6 = vld [vmem:[#allocation43_spill] sm:$0xff]  ;;  %v8252_v63 = vld [vmem:[#allocation12_spill] sm:$0xff] }
 0x2a8   :  { %2506 = vmatpush.bf16.msra.mxu3 %v8242_v10  ;;  %2534 = vmatpush.bf16.msra.mxu1 %v6506_v48 }
 0x2aa   :  { %2729 = vmatpush.bf16.msrb.mxu2 %v5632_v54  ;;  %2757 = vmatpush.bf16.msrb.mxu0 %v5833_v28  ;;  %v8244_v28 = vld [vmem:[#allocation8_spill] sm:$0xff] }
 0x2ab   :  { %2507 = vmatmul.bf16.vlgmr.msra.gmra.mxu3 %v2372_v57  ;;  %2535 = vmatmul.bf16.vlgmr.msra.gmra.mxu1 %v2372_v57  ;;  %v8245_v54 = vld [vmem:[#allocation24_spill] sm:$0xff]  ;;  %v8248_v57 = vld [vmem:[#allocation10_spill] sm:$0xff] }
 0x2ac   :  { %2737 = vmatpush.bf16.msrb.mxu3 %v8243_v42  ;;  %2765 = vmatpush.bf16.msrb.mxu1 %v5697_v34  ;;  %v973_v34 = vmul.f32 %v6434_v51, %v8286_v55  ;;  %v8287_v42 = vld [vmem:[#allocation113_spill] sm:$0xff] }
 0x2ae   :  { %2730 = vmatpush.bf16.msrb.mxu2 %v5667_v17  ;;  %2758 = vmatpush.bf16.msrb.mxu0 %v8160_v35  ;;  %v8246_v17 = vld [vmem:[#allocation47_spill] sm:$0xff] }
 0x2af   :  { %v8247_v35 = vld [vmem:[#allocation39_spill] sm:$0xff] }
 0x2b0   :  { %2738 = vmatpush.bf16.msrb.mxu3 %v5512_v49  ;;  %2766 = vmatpush.bf16.msrb.mxu1 %v5711_v43 }
 0x2b2   :  { %2779 = vmatpush.bf16.msra.mxu2 %v5935_v16  ;;  %2807 = vmatpush.bf16.msra.mxu0 %v8162_v40  ;;  %v8249_v16 = vld [vmem:[#allocation26_spill] sm:$0xff] }
 0x2b3   :  { %v8250_v40 = vld [vmem:[#allocation50_spill] sm:$0xff] }
 0x2b4   :  { %2739 = vmatpush.bf16.msrb.mxu3 %v8244_v28  ;;  %2767 = vmatpush.bf16.msrb.mxu1 %v8245_v54 }
 0x2b6   :  { %2780 = vmatpush.bf16.msra.mxu2 %v5971_v58  ;;  %2808 = vmatpush.bf16.msra.mxu0 %v8166_v3  ;;  %v8253_v58 = vld [vmem:[#allocation28_spill] sm:$0xff]  ;;  %v8254_v3 = vld [vmem:[#allocation53_spill] sm:$0xff] }
 0x2b8   :  { %2740 = vmatpush.bf16.msrb.mxu3 %v8248_v57  ;;  %2768 = vmatpush.bf16.msrb.mxu1 %v8249_v16  ;;  %v8259_v57 = vld [vmem:[#allocation57_spill] sm:$0xff]  ;;  %v8260_v16 = vld [vmem:[#allocation16_spill] sm:$0xff] }
 0x2ba   :  { %2781 = vmatpush.bf16.msra.mxu2 %v8246_v17  ;;  %2809 = vmatpush.bf16.msra.mxu0 %v8247_v35  ;;  %v8257_v17 = vld [vmem:[#allocation30_spill] sm:$0xff]  ;;  %v8258_v35 = vld [vmem:[#allocation55_spill] sm:$0xff] }
 0x2bc   :  { %2741 = vmatpush.bf16.msrb.mxu3 %v8252_v63  ;;  %2769 = vmatpush.bf16.msrb.mxu1 %v8253_v58  ;;  %v8263_v63 = vld [vmem:[#allocation65_spill] sm:$0xff]  ;;  %v8264_v58 = vld [vmem:[#allocation19_spill] sm:$0xff] }
 0x2be   :  { %2782 = vmatpush.bf16.msra.mxu2 %v8250_v40  ;;  %2810 = vmatpush.bf16.msra.mxu0 %v8251_v6  ;;  %v8261_v40 = vld [vmem:[#allocation32_spill] sm:$0xff]  ;;  %v8262_v6 = vld [vmem:[#allocation58_spill] sm:$0xff] }
 0x2c0   :  { %2742 = vmatpush.bf16.msrb.mxu3 %v8256_v24  ;;  %2770 = vmatpush.bf16.msrb.mxu1 %v8257_v17  ;;  %v8267_v24 = vld [vmem:[#allocation36_spill] sm:$0xff]  ;;  %v8268_v17 = vld [vmem:[#allocation61_spill] sm:$0xff] }
 0x2c2   :  { %2783 = vmatpush.bf16.msra.mxu2 %v8254_v3  ;;  %2811 = vmatpush.bf16.msra.mxu0 %v8255_v47  ;;  %v8265_v3 = vld [vmem:[#allocation35_spill] sm:$0xff]  ;;  %v8266_v47 = vld [vmem:[#allocation42_spill] sm:$0xff] }
 0x2c4   :  { %2743 = vmatpush.bf16.msrb.mxu3 %v8260_v16  ;;  %2771 = vmatpush.bf16.msrb.mxu1 %v8261_v40  ;;  %v8271_v16 = vld [vmem:[#allocation38_spill] sm:$0xff]  ;;  %v8272_v40 = vld [vmem:[#allocation48_spill] sm:$0xff] }
 0x2c6   :  { %2784 = vmatpush.bf16.msra.mxu2 %v8258_v35  ;;  %2812 = vmatpush.bf16.msra.mxu0 %v8259_v57  ;;  %v8269_v35 = vld [vmem:[#allocation69_spill] sm:$0xff] }
 0x2c7   :  { %v8270_v57 = vld [vmem:[#allocation45_spill] sm:$0xff] }
 0x2c8   :  { %2744 = vmatpush.bf16.msrb.mxu3 %v8264_v58  ;;  %2772 = vmatpush.bf16.msrb.mxu1 %v8265_v3  ;;  %v8275_v58 = vld [vmem:[#allocation46_spill] sm:$0xff] }
 0x2c9   :  { %v8276_v3 = vld [vmem:[#allocation54_spill] sm:$0xff] }
 0x2ca   :  { %2785 = vmatpush.bf16.msra.mxu2 %v8262_v6  ;;  %2813 = vmatpush.bf16.msra.mxu0 %v8263_v63  ;;  %v8273_v6 = vld [vmem:[#allocation40_spill] sm:$0xff]  ;;  %v8274_v63 = vld [vmem:[#allocation51_spill] sm:$0xff] }
 0x2cc   :  { %2793 = vmatpush.bf16.msra.mxu3 %v8266_v47  ;;  %2821 = vmatpush.bf16.msra.mxu1 %v8267_v24  ;;  %v8277_v47 = vld [vmem:[#allocation52_spill] sm:$0xff] }
 0x2cd   :  { %v8278_v24 = vld [vmem:[#allocation56_spill] sm:$0xff] }
 0x2ce   :  { %2786 = vmatpush.bf16.msra.mxu2 %v8268_v17  ;;  %2814 = vmatpush.bf16.msra.mxu0 %v8269_v35  ;;  %v8279_v17 = vld [vmem:[#allocation60_spill] sm:$0xff]  ;;  %v8280_v35 = vld [vmem:[#allocation59_spill] sm:$0xff] }
 0x2d0   :  { %2794 = vmatpush.bf16.msra.mxu3 %v8270_v57  ;;  %2822 = vmatpush.bf16.msra.mxu1 %v8271_v16  ;;  %v8281_v57 = vld [vmem:[#allocation66_spill] sm:$0xff] }
 0x2d1   :  { %v8282_v16 = vld [vmem:[#allocation62_spill] sm:$0xff] }
 0x2d4   :  { %2795 = vmatpush.bf16.msra.mxu3 %v8272_v40  ;;  %2823 = vmatpush.bf16.msra.mxu1 %v8273_v6  ;;  %v8283_v40 = vld [vmem:[#allocation70_spill] sm:$0xff] }
 0x2d8   :  { %2796 = vmatpush.bf16.msra.mxu3 %v8274_v63  ;;  %2824 = vmatpush.bf16.msra.mxu1 %v8275_v58 }
 0x2dc   :  { %2797 = vmatpush.bf16.msra.mxu3 %v8276_v3  ;;  %2825 = vmatpush.bf16.msra.mxu1 %v8277_v47  ;;  %v8284_v3 = vld [vmem:[#allocation106_spill] sm:$0xff] }
 0x2e0   :  { %2798 = vmatpush.bf16.msra.mxu3 %v8278_v24  ;;  %2826 = vmatpush.bf16.msra.mxu1 %v8279_v17 }
 0x2e4   :  { %2799 = vmatpush.bf16.msra.mxu3 %v8280_v35  ;;  %2827 = vmatpush.bf16.msra.mxu1 %v8281_v57 }
 0x2e8   :  { %2800 = vmatpush.bf16.msra.mxu3 %v8282_v16  ;;  %2828 = vmatpush.bf16.msra.mxu1 %v8283_v40  ;;  %v972_v16 = vmul.f32 %v6431_v26, %v8286_v55 }
 0x2ea   :  { %v1265_v48 = vadd.f32 %v8287_v42, %v972_v16  ;;  %v8290_v16 = vld [vmem:[#allocation108_spill] sm:$0xff] }
 0x2ee   :  { %v2410_v6 = vpop.f32.mrf.mxu0 }
 0x2ef   :  { %v2411_v25 = vadd.f32 %v2410_v6, %v8284_v3  ;;  %v8288_v6 = vld [vmem:[#allocation114_spill] sm:$0xff]  ;;  %v8289_v3 = vld [vmem:[#allocation112_spill] sm:$0xff] }
 0x2f4   :  { %v2382_v63 = vpop.f32.mrf.mxu2 }
 0x2f5   :  { %v2383_v24 = vadd.f32 %v2382_v63, %v8285_v7 }
 0x2f6   :  { %v2412_v54 = vpop.f32.mrf.mxu0 }
 0x2fc   :  { %v2384_v58 = vpop.f32.mrf.mxu2 }
 0x2fd   :  { %v2385_v7 = vadd.f32 %v2384_v58, %v1265_v48  ;;  %v8292_v48 = vld [vmem:[#allocation111_spill] sm:$0xff] }
 0x2fe   :  { %v2466_v43 = vpop.f32.mrf.mxu0 }
 0x304   :  { %v2438_v49 = vpop.f32.mrf.mxu2 }
 0x308   :  { %v2424_v28 = vpop.f32.mrf.mxu1 }
 0x309   :  { %v2425_v47 = vadd.f32 %v2424_v28, %v2411_v25  ;;  %v1298_v25 = vadd.f32 %v8288_v6, %v973_v34  ;;  %v975_v34 = vmul.f32 %v8290_v16, %v8286_v55  ;;  %v8299_v16 = vld [vmem:[#allocation140_spill] sm:$0xff] }
 0x30b   :  { %v4449_v62 = vmul.f32 -1.442695, %v2425_v47  ;;  %v2413_v63 = vadd.f32 %v2412_v54, %v1298_v25  ;;  %v2468_v47 = vpop.f32.mrf.mxu0 }
 0x30e   :  { %v2396_v17 = vpop.f32.mrf.mxu3 }
 0x30f   :  { %v2397_v35 = vadd.f32 %v2396_v17, %v2383_v24  ;;  %v2467_v24 = vadd.f32 %v2466_v43, %v8289_v3  ;;  %v8291_v43 = vld [vmem:[#allocation116_spill] sm:$0xff]  ;;  %v8294_v3 = vld [vmem:[#allocation115_spill] sm:$0xff] }
 0x310   :  { %v2426_v57 = vpop.f32.mrf.mxu1  ;;  %v1364_v58 = vadd.f32 %v8291_v43, %v975_v34 }
 0x311   :  { %v4448_v40 = vmul.f32 -1.442695, %v2397_v35  ;;  %v2427_v10 = vadd.f32 %v2426_v57, %v2413_v63  ;;  %v2440_v35 = vpop.f32.mrf.mxu2 }
 0x313   :  { %4709 = vpow2.f32 %v4448_v40  ;;  %v4453_v54 = vmul.f32 -1.442695, %v2427_v10  ;;  %v2439_v40 = vadd.f32 %v2438_v49, %v8292_v48 }
 0x314   :  { %4711 = vpow2.f32 %v4449_v62 }
 0x316   :  { %v2398_v28 = vpop.f32.mrf.mxu3 }
 0x317   :  { %v2399_v17 = vadd.f32 %v2398_v28, %v2385_v7  ;;  %v8293_v7 = vld [vmem:[#allocation107_spill] sm:$0xff]  ;;  %v2522_v28 = vpop.f32.mrf.mxu0 }
 0x318   :  { %v2480_v41 = vpop.f32.mrf.mxu1 }
 0x319   :  { %v4710_v26 = vpop.eup %4709  ;;  %v4452_v44 = vmul.f32 -1.442695, %v2399_v17  ;;  %v2481_v46 = vadd.f32 %v2480_v41, %v2467_v24  ;;  %v2469_v41 = vadd.f32 %v2468_v47, %v1364_v58  ;;  %v2494_v47 = vpop.f32.mrf.mxu2 }
 0x31a   :  { %v4712_v51 = vpop.eup %4711  ;;  %v6982_v29 = vadd.f32 1.0, %v4710_v26  ;;  %v2495_v22 = vadd.f32 %v2494_v47, %v8299_v16 }
 0x31b   :  { %4713 = vpow2.f32 %v4452_v44  ;;  %v4451_v62 = vmul.f32 -1.442695, %v2481_v46  ;;  %v6989_v42 = vadd.f32 1.0, %v4712_v51  ;;  %v974_v44 = vmul.f32 %v8293_v7, %v8286_v55 }
 0x31c   :  { %4715 = vrcp.f32 %v6982_v29  ;;  %vm2578_vm3 = vweird.f32 %v6982_v29 }
 0x31d   :  { %4717 = vpow2.f32 %v4451_v62  ;;  %v1331_v24 = vadd.f32 %v8294_v3, %v974_v44  ;;  %vm2593_vm5 = vweird.f32 %v6989_v42 }
 0x31e   :  { %v2452_v57 = vpop.f32.mrf.mxu3  ;;  %4719 = vpow2.f32 %v4453_v54 }
 0x31f   :  { %v2453_v6 = vadd.f32 %v2452_v57, %v2439_v40  ;;  %4721 = vrcp.f32 %v6989_v42  ;;  %v2441_v62 = vadd.f32 %v2440_v35, %v1331_v24  ;;  %v977_v35 = vmul.f32 %v6666_v11, %v8286_v55  ;;  %v8297_v11 = vld [vmem:[#allocation81_spill] sm:$0xff] }
 0x320   :  { %v2482_v26 = vpop.f32.mrf.mxu1 }
 0x321   :  { %v4714_v25 = vpop.eup %4713  ;;  %v4450_v46 = vmul.f32 -1.442695, %v2453_v6  ;;  %v2483_v10 = vadd.f32 %v2482_v26, %v2469_v41  ;;  %v8295_v26 = vld [vmem:[#allocation138_spill] sm:$0xff] }
 0x322   :  { %v6994_v63 = vpop.eup %4715  ;;  %v6996_v49 = vadd.f32 1.0, %v4714_v25  ;;  %v976_v25 = vmul.f32 %v8295_v26, %v8286_v55  ;;  %v2599_v55 = vand.u32 2147483648, %v6989_v42 }
 0x323   :  { %v4718_v51 = vpop.eup %4717  ;;  %v2574_v17 = vmul.f32 %v6994_v63, %v6982_v29  ;;  %4723 = vpow2.f32 %v4450_v46  ;;  %v4455_v34 = vmul.f32 -1.442695, %v2483_v10  ;;  %vm2579_vm2 = vweird.f32 %v6994_v63 }
 0x324   :  { %4725 = vrcp.f32 %v6996_v49  ;;  %v4720_v43 = vpop.eup %4719  ;;  %v7002_v58 = vadd.f32 1.0, %v4718_v51  ;;  %v1397_v26 = vadd.f32 %v8297_v11, %v976_v25  ;;  %vm7036_vm4 = vmor %vm2578_vm3, %vm2579_vm2  ;;  %v7049_v16 = vor.u32 1.1754944e-38, %v2599_v55 }
 0x325   :  { %v2575_v54 = vsub.f32 1.0, %v2574_v17  ;;  %v7004_v40 = vpop.eup %4721  ;;  %4727 = vpow2.f32 %v4455_v34  ;;  %v7009_v44 = vadd.f32 1.0, %v4720_v43  ;;  %v2524_v43 = vpop.f32.mrf.mxu0  ;;  %vm2638_vm9 = vweird.f32 %v6996_v49 }
 0x326   :  { %v2454_v48 = vpop.f32.mrf.mxu3  ;;  %v2589_v51 = vmul.f32 %v7004_v40, %v6989_v42  ;;  %4729 = vrcp.f32 %v7002_v58  ;;  %vm2594_vm6 = vweird.f32 %v7004_v40 }
 0x327   :  { %v2455_v57 = vadd.f32 %v2454_v48, %v2441_v62  ;;  %v2576_v41 = vmul.f32 %v6994_v63, %v2575_v54  ;;  %v8296_v62 = vld [vmem:[#allocation142_spill] sm:$0xff]  ;;  %v2584_v48 = vand.u32 2147483648, %v6982_v29  ;;  %vm7087_vm13 = vmor %vm2593_vm5, %vm2594_vm6 }
 0x328   :  { %v2536_v17 = vpop.f32.mrf.mxu1  ;;  %v1430_v54 = vadd.f32 %v8296_v62, %v977_v35  ;;  %v2590_v7 = vsub.f32 1.0, %v2589_v51  ;;  %v8298_v35 = vld [vmem:[#allocation141_spill] sm:$0xff] }
 0x329   :  { %v4724_v6 = vpop.eup %4723  ;;  %v4454_v46 = vmul.f32 -1.442695, %v2455_v57  ;;  %v2577_v34 = vadd.f32 %v6994_v63, %v2576_v41  ;;  %v2523_v62 = vadd.f32 %v2522_v28, %v8298_v35  ;;  %v2585_v47 = vor.u32 1.1754944e-38, %v2584_v48 }
 0x32a   :  { %v7011_v10 = vpop.eup %4725  ;;  %v7018_v3 = vadd.f32 1.0, %v4724_v6  ;;  %v2496_v6 = vpop.f32.mrf.mxu2  ;;  %v2525_v32 = vadd.f32 %v2524_v43, %v1430_v54 }
 0x32b   :  { %v2634_v24 = vmul.f32 %v7011_v10, %v6996_v49  ;;  %4731 = vpow2.f32 %v4454_v46  ;;  %v2582_v46 = vand.u32 2147483647, %v6982_v29  ;;  %v4728_v41 = vpop.eup %4727  ;;  %v2581_v29 = vsel %vm7036_vm4, %v6994_v63, %v2577_v34 }
 0x32c   :  { %4733 = vrcp.f32 %v7018_v3  ;;  %v7045_v25 = vpop.eup %4729  ;;  %v2497_v28 = vadd.f32 %v2496_v6, %v1397_v26  ;;  %v7052_v43 = vadd.f32 1.0, %v4728_v41  ;;  %v2591_v63 = vmul.f32 %v7004_v40, %v2590_v7 }
 0x32d   :  { %4735 = vrcp.f32 %v7009_v44  ;;  %v2635_v57 = vsub.f32 1.0, %v2634_v24  ;;  %vm2583_vm7 = vcmp.eq.f32.partialorder %v2582_v46, 8.507059e+37  ;;  %vm2639_vm8 = vweird.f32 %v7011_v10 }
 0x32e   :  { %v2508_v56 = vpop.f32.mrf.mxu3  ;;  %v2586_v24 = vsel %vm2583_vm7, %v2585_v47, %v2581_v29  ;;  %v2619_v7 = vmul.f32 %v7045_v25, %v7002_v58  ;;  %v2614_v48 = vand.u32 2147483648, %v7018_v3  ;;  %v7071_v46 = vadd.f32 %v7004_v40, %v2591_v63  ;;  %vm7075_vm10 = vmor %vm2638_vm9, %vm2639_vm8 }
 0x32f   :  { %v2636_v11 = vmul.f32 %v7011_v10, %v2635_v57  ;;  %v2509_v35 = vadd.f32 %v2508_v56, %v2495_v22  ;;  %v2537_v57 = vadd.f32 %v2536_v17, %v2523_v62  ;;  %v2642_v22 = vand.u32 2147483647, %v6996_v49 }
 0x330   :  { %v2644_v56 = vand.u32 2147483648, %v6996_v49  ;;  %v2538_v6 = vpop.f32.mrf.mxu1  ;;  %v2697_v62 = vsub.f32 1.0, %v2586_v24  ;;  %vm2608_vm14 = vweird.f32 %v7018_v3  ;;  %v2615_v12 = vor.u32 1.1754944e-38, %v2614_v48 }
 0x331   :  { %v4732_v51 = vpop.eup %4731  ;;  %4737 = vtanh.f32 %v2509_v35  ;;  %v2637_v26 = vadd.f32 %v7011_v10, %v2636_v11  ;;  %v2612_v11 = vand.u32 2147483647, %v7018_v3  ;;  %v2539_v35 = vadd.f32 %v2538_v6, %v2525_v32 }
 0x332   :  { %v4734_v15 = vpop.eup %4733  ;;  %v7055_v34 = vadd.f32 1.0, %v4732_v51  ;;  %vm2643_vm12 = vcmp.eq.f32.partialorder %v2642_v22, 8.507059e+37  ;;  %v2699_v32 = vmul.f32 %v2697_v62, %v6812_v52  ;;  %v2596_v22 = vsel %vm7087_vm13, %v7004_v40, %v7071_v46 }
 0x333   :  { %v7057_v2 = vpop.eup %4735  ;;  %v2604_v55 = vmul.f32 %v4734_v15, %v7018_v3  ;;  %vm2609_vm11 = vweird.f32 %v4734_v15  ;;  %v2641_v51 = vsel %vm7075_vm10, %v7011_v10, %v2637_v26  ;;  %vm2613_vm1 = vcmp.eq.f32.partialorder %v2612_v11, 8.507059e+37 }
 0x334   :  { %4739 = vrcp.f32 %v7055_v34  ;;  %v2649_v41 = vmul.f32 %v7057_v2, %v7009_v44  ;;  %vm2610_vm15 = vmor %vm2608_vm14, %vm2609_vm11  ;;  %vm2654_vm2 = vweird.f32 %v7057_v2  ;;  %vm2623_vm4 = vweird.f32 %v7002_v58 }
 0x335   :  { %v2605_v17 = vsub.f32 1.0, %v2604_v55  ;;  %4741 = vrcp.f32 %v7052_v43  ;;  %v2645_v55 = vor.u32 1.1754944e-38, %v2644_v56  ;;  %v8306_v56 = vand.u32 2147483647, %v6989_v42 }
 0x336   :  { %4743 = vtanh.f32 %v2537_v57  ;;  %v2510_v47 = vpop.f32.mrf.mxu3  ;;  %vm2668_vm5 = vweird.f32 %v7055_v34  ;;  %vm2624_vm6 = vweird.f32 %v7045_v25  ;;  %vm2653_vm10 = vweird.f32 %v7009_v44 }
 0x337   :  { %v2606_v49 = vmul.f32 %v4734_v15, %v2605_v17  ;;  %v2511_v63 = vadd.f32 %v2510_v47, %v2497_v28  ;;  %v4738_v54 = vpop.eup %4737  ;;  %v2620_v17 = vsub.f32 1.0, %v2619_v7  ;;  %v2646_v28 = vsel %vm2643_vm12, %v2645_v55, %v2641_v51  ;;  %vm7129_vm9 = vmor %vm2623_vm4, %vm2624_vm6 }
 0x338   :  { %v2701_v10 = vmul.f32 %v4738_v54, %v2586_v24  ;;  %vm7102_vm0 = vcmp.eq.f32.partialorder %v8306_v56, 8.507059e+37  ;;  %v2650_v24 = vsub.f32 1.0, %v2649_v41  ;;  %v2698_v46 = vsub.f32 1.0, %v2646_v28  ;;  %vm7143_vm11 = vmor %vm2653_vm10, %vm2654_vm2 }
 0x339   :  { %v2607_v30 = vadd.f32 %v4734_v15, %v2606_v49  ;;  %4745 = vtanh.f32 %v2511_v63  ;;  %v2621_v42 = vmul.f32 %v7045_v25, %v2620_v17 }
 0x33a   :  { %v4740_v29 = vpop.eup %4739  ;;  %v2703_v6 = vadd.f32 %v2701_v10, %v2699_v32  ;;  %4747 = vtanh.f32 %v2539_v35  ;;  %v2651_v51 = vmul.f32 %v7057_v2, %v2650_v24  ;;  %v2629_v35 = vand.u32 2147483648, %v7002_v58 }
 0x33b   :  { %v7094_v26 = vpop.eup %4741  ;;  %v2664_v7 = vmul.f32 %v4740_v29, %v7055_v34  ;;  %v2611_v48 = vsel %vm2610_vm15, %v4734_v15, %v2607_v30  ;;  %v2674_v30 = vand.u32 2147483648, %v7055_v34  ;;  %vm2669_vm3 = vweird.f32 %v4740_v29 }
 0x33c   :  { %v4744_v52 = vpop.eup %4743  ;;  %v2616_v54 = vsel %vm2613_vm1, %v2615_v12, %v2611_v48  ;;  %v2679_v47 = vmul.f32 %v7094_v26, %v7052_v43  ;;  %4749 = vtanh.f32 %v2703_v6  ;;  %v2672_v12 = vand.u32 2147483647, %v7055_v34  ;;  %vm2670_vm7 = vmor %vm2668_vm5, %vm2669_vm3 }
 0x33d   :  { %v2665_v62 = vsub.f32 1.0, %v2664_v7  ;;  %v2709_v49 = vsub.f32 1.0, %v2616_v54  ;;  %v2713_v40 = vmul.f32 %v4744_v52, %v2616_v54  ;;  %v2700_v57 = vmul.f32 %v2698_v46, %v6837_v38  ;;  %v8325_v54 = vld [vmem:[#allocation98_spill] sm:$0xff] }
 0x33e   :  { %v2680_v10 = vsub.f32 1.0, %v2679_v47  ;;  %v2675_v56 = vor.u32 1.1754944e-38, %v2674_v30  ;;  %vm2673_vm8 = vcmp.eq.f32.partialorder %v2672_v12, 8.507059e+37  ;;  %v2652_v34 = vadd.f32 %v7057_v2, %v2651_v51 }
 0x33f   :  { %v2711_v15 = vmul.f32 %v2709_v49, %v6883_v36  ;;  %v2666_v41 = vmul.f32 %v4740_v29, %v2665_v62  ;;  %v4746_v11 = vpop.eup %4745  ;;  %v2622_v36 = vadd.f32 %v7045_v25, %v2621_v42  ;;  %v2627_v24 = vand.u32 2147483647, %v7002_v58  ;;  %v8331_v58 = vld [vmem:[#allocation6_spill] sm:$0xff] }
 0x340   :  { %v2702_v17 = vmul.f32 %v4746_v11, %v2646_v28  ;;  %v4748_v32 = vpop.eup %4747  ;;  %v2601_v38 = vsel %vm7102_vm0, %v7049_v16, %v2596_v22  ;;  %v2657_v49 = vand.u32 2147483647, %v7009_v44  ;;  %v2681_v22 = vmul.f32 %v7094_v26, %v2680_v10  ;;  %v8316_v10 = vld [vmem:[#allocation101_spill] sm:$0xff] }
 0x341   :  { %v2715_v63 = vadd.f32 %v2713_v40, %v2711_v15  ;;  %v2667_v55 = vadd.f32 %v4740_v29, %v2666_v41  ;;  %v2626_v16 = vsel %vm7129_vm9, %v7045_v25, %v2622_v36  ;;  %v2630_v3 = vor.u32 1.1754944e-38, %v2629_v35  ;;  %v8315_v36 = vld [vmem:[#allocation86_spill] sm:$0xff] }
 0x342   :  { %v2704_v48 = vadd.f32 %v2702_v17, %v2700_v57  ;;  %v4750_v52 = vpop.eup %4749  ;;  %v2656_v46 = vsel %vm7143_vm11, %v7057_v2, %v2652_v34  ;;  %vm2628_vm12 = vcmp.eq.f32.partialorder %v2627_v24, 8.507059e+37  ;;  %v8313_v47 = vand.u32 2147483648, %v7009_v44  ;;  %v8321_v34 = vld [vmem:[#allocation90_spill] sm:$0xff]  ;;  %v8322_v24 = vld [vmem:[#allocation104_spill] sm:$0xff] }
 0x343   :  { %4751 = vtanh.f32 %v2715_v63  ;;  %v2671_v7 = vsel %vm2670_vm7, %v4740_v29, %v2667_v55  ;;  %v7133_v6 = vmul.f32 %v4750_v52, %v2601_v38  ;;  %v2631_v30 = vsel %vm2628_vm12, %v2630_v3, %v2626_v16  ;;  %v8320_v52 = vld [vmem:[#allocation18_spill] sm:$0xff]  ;;  %v8323_v38 = vld [vmem:[#allocation5_spill] sm:$0xff]  ;;  %v8329_v16 = vld [vmem:[#allocation7_spill] sm:$0xff] }
 0x344   :  { %v2676_v28 = vsel %vm2673_vm8, %v2675_v56, %v2671_v7  ;;  %4753 = vtanh.f32 %v2704_v48  ;;  %v2660_v25 = vor.u32 1.1754944e-38, %v8313_v47  ;;  %vm2658_vm13 = vcmp.eq.f32.partialorder %v2657_v49, 8.507059e+37  ;;  %v8317_v56 = vld [vmem:[#allocation97_spill] sm:$0xff]  ;;  %v8319_v48 = vld [vmem:[#allocation3_spill] sm:$0xff]  ;;  %v8328_v49 = vld [vmem:[#allocation20_spill] sm:$0xff] }
 0x345   :  { %v2710_v29 = vsub.f32 1.0, %v2676_v28  ;;  %v2714_v62 = vmul.f32 %v4748_v32, %v2676_v28  ;;  %v2682_v41 = vadd.f32 %v7094_v26, %v2681_v22  ;;  %vm2684_vm14 = vweird.f32 %v7094_v26  ;;  %v8318_v7 = vld [vmem:[#allocation109_spill] sm:$0xff]  ;;  %v8330_v22 = vld [vmem:[#allocation23_spill] sm:$0xff]  ;;  %v8332_v3 = vld [vmem:[#allocation22_spill] sm:$0xff] }
 0x346   :  { %v2661_v51 = vsel %vm2658_vm13, %v2660_v25, %v2656_v46  ;;  %vm2683_vm15 = vweird.f32 %v7052_v43  ;;  %v2687_v2 = vand.u32 2147483647, %v7052_v43  ;;  %v8324_v28 = vld [vmem:[#allocation21_spill] sm:$0xff]  ;;  %v8336_v47 = vld [vmem:[#allocation24_spill] sm:$0xff]  ;;  %v8337_v25 = vld [vmem:[#allocation11_spill] sm:$0xff] }
 0x347   :  { %v2712_v40 = vmul.f32 %v2710_v29, %v6872_v50  ;;  %v2689_v50 = vand.u32 2147483648, %v7052_v43  ;;  %vm2685_vm0 = vmor %vm2683_vm15, %vm2684_vm14  ;;  %v8326_v29 = vld [vmem:[#allocation110_spill] sm:$0xff]  ;;  %v8334_v46 = vld [vmem:[#allocation25_spill] sm:$0xff] }
 0x348   :  { %v2686_v35 = vsel %vm2685_vm0, %v7094_v26, %v2682_v41  ;;  %vm2688_vm1 = vcmp.eq.f32.partialorder %v2687_v2, 8.507059e+37  ;;  %v8314_v26 = vld [vmem:[#allocation103_spill] sm:$0xff]  ;;  %v8340_v41 = vld [vmem:[#allocation26_spill] sm:$0xff]  ;;  %v8344_v2 = vld [vmem:[#allocation28_spill] sm:$0xff] }
 0x349   :  { %v4752_v42 = vpop.eup %4751  ;;  %v2716_v15 = vadd.f32 %v2714_v62, %v2712_v40  ;;  %v2690_v55 = vor.u32 1.1754944e-38, %v2689_v50  ;;  %v8327_v62 = vld [vmem:[#allocation4_spill] sm:$0xff]  ;;  %v8333_v40 = vld [vmem:[#allocation9_spill] sm:$0xff] }
 0x34a   :  { %v7155_v12 = vmul.f32 %v4752_v42, %v2631_v30  ;;  %v4754_v11 = vpop.eup %4753  ;;  %v8335_v42 = vld [vmem:[#allocation8_spill] sm:$0xff]  ;;  %v8338_v30 = vld [vmem:[#allocation27_spill] sm:$0xff]  ;;  %v8342_v50 = vld [vmem:[#allocation29_spill] sm:$0xff] }
 0x34b   :  { %4755 = vtanh.f32 %v2716_v15  ;;  %v7160_v44 = vmul.f32 %v4754_v11, %v2661_v51  ;;  %v2691_v17 = vsel %vm2688_vm1, %v2690_v55, %v2686_v35  ;;  %v8339_v15 = vld [vmem:[#allocation10_spill] sm:$0xff]  ;;  %v8341_v11 = vld [vmem:[#allocation13_spill] sm:$0xff]  ;;  %v8343_v51 = vld [vmem:[#allocation12_spill] sm:$0xff] }
 0x34c   :  { %v8345_v35 = vld [vmem:[#allocation15_spill] sm:$0xff]  ;;  %v8347_v55 = vld [vmem:[#allocation14_spill] sm:$0xff] }
 0x34d   :  { %v2721_v63 = vpack.c.bf16 %v7160_v44, %v7133_v6 }
 0x34f   :  { %2731 = vmatmul.bf16.vlgmr.msrb.gmra.mxu2 %v2721_v63  ;;  %2759 = vmatmul.bf16.vlgmr.msrb.gmra.mxu0 %v2721_v63 }
 0x350   :  { %2835 = vmatpush.bf16.msrb.mxu2 %v8214_v23  ;;  %2863 = vmatpush.bf16.msrb.mxu0 %v8215_v53 }
 0x351   :  { %v4756_v57 = vpop.eup %4755 }
 0x352   :  { %v7167_v32 = vmul.f32 %v4756_v57, %v2691_v17  ;;  %v8348_v57 = vld [vmem:[#allocation30_spill] sm:$0xff]  ;;  %v8349_v17 = vld [vmem:[#allocation17_spill] sm:$0xff] }
 0x354   :  { %v2722_v43 = vpack.c.bf16 %v7155_v12, %v7167_v32  ;;  %2836 = vmatpush.bf16.msrb.mxu2 %v8216_v20  ;;  %2864 = vmatpush.bf16.msrb.mxu0 %v8217_v8 }
 0x356   :  { %2745 = vmatmul.bf16.vlgmr.msrb.gmra.mxu3 %v2722_v43  ;;  %2773 = vmatmul.bf16.vlgmr.msrb.gmra.mxu1 %v2722_v43 }
 0x357   :  { %2849 = vmatpush.bf16.msrb.mxu3 %v8228_v60  ;;  %2877 = vmatpush.bf16.msrb.mxu1 %v8229_v31 }
 0x358   :  { %2837 = vmatpush.bf16.msrb.mxu2 %v8218_v0  ;;  %2865 = vmatpush.bf16.msrb.mxu0 %v8219_v21 }
 0x35b   :  { %2850 = vmatpush.bf16.msrb.mxu3 %v8231_v45  ;;  %2878 = vmatpush.bf16.msrb.mxu1 %v8232_v14 }
 0x35c   :  { %2838 = vmatpush.bf16.msrb.mxu2 %v8220_v4  ;;  %2866 = vmatpush.bf16.msrb.mxu0 %v8221_v27 }
 0x35f   :  { %2851 = vmatpush.bf16.msrb.mxu3 %v8233_v59  ;;  %2879 = vmatpush.bf16.msrb.mxu1 %v8234_v13 }
 0x360   :  { %2787 = vmatmul.bf16.vlgmr.msra.gmra.mxu2 %v2721_v63  ;;  %2815 = vmatmul.bf16.vlgmr.msra.gmra.mxu0 %v2721_v63 }
 0x361   :  { %2839 = vmatpush.bf16.msrb.mxu2 %v8222_v39  ;;  %2867 = vmatpush.bf16.msrb.mxu0 %v8223_v37 }
 0x363   :  { %2852 = vmatpush.bf16.msrb.mxu3 %v8235_v33  ;;  %2880 = vmatpush.bf16.msrb.mxu1 %v8236_v18 }
 0x365   :  { %2840 = vmatpush.bf16.msrb.mxu2 %v8224_v5  ;;  %2868 = vmatpush.bf16.msrb.mxu0 %v6438_v61 }
 0x366   :  { %2801 = vmatmul.bf16.vlgmr.msra.gmra.mxu3 %v2722_v43  ;;  %2829 = vmatmul.bf16.vlgmr.msra.gmra.mxu1 %v2722_v43 }
 0x367   :  { %2853 = vmatpush.bf16.msrb.mxu3 %v8237_v9  ;;  %2881 = vmatpush.bf16.msrb.mxu1 %v8238_v19 }
 0x369   :  { %2841 = vmatpush.bf16.msrb.mxu2 %v8225_v1  ;;  %2869 = vmatpush.bf16.msrb.mxu0 %v8314_v26 }
 0x36b   :  { %2854 = vmatpush.bf16.msrb.mxu3 %v8315_v36  ;;  %2882 = vmatpush.bf16.msrb.mxu1 %v8316_v10 }
 0x36d   :  { %2842 = vmatpush.bf16.msrb.mxu2 %v8317_v56  ;;  %2870 = vmatpush.bf16.msrb.mxu0 %v8318_v7 }
 0x36f   :  { %2855 = vmatpush.bf16.msrb.mxu3 %v8321_v34  ;;  %2883 = vmatpush.bf16.msrb.mxu1 %v8322_v24 }
 0x370   :  { %2843 = vmatmul.bf16.vlgmr.msrb.gmra.mxu2 %v2721_v63  ;;  %2871 = vmatmul.bf16.vlgmr.msrb.gmra.mxu0 %v2721_v63  ;;  %v8346_v63 = vld [vmem:[#allocation31_spill] sm:$0xff] }
 0x371   :  { %3073 = vmatpush.bf16.msra.mxu2 %v8319_v48  ;;  %3101 = vmatpush.bf16.msra.mxu0 %v8320_v52 }
 0x373   :  { %2856 = vmatpush.bf16.msrb.mxu3 %v8325_v54  ;;  %2884 = vmatpush.bf16.msrb.mxu1 %v8326_v29 }
 0x375   :  { %3074 = vmatpush.bf16.msra.mxu2 %v8323_v38  ;;  %3102 = vmatpush.bf16.msra.mxu0 %v8324_v28 }
 0x376   :  { %2857 = vmatmul.bf16.vlgmr.msrb.gmra.mxu3 %v2722_v43  ;;  %2885 = vmatmul.bf16.vlgmr.msrb.gmra.mxu1 %v2722_v43  ;;  %v8350_v43 = vld [vmem:[#allocation33_spill] sm:$0xff] }
 0x377   :  { %3087 = vmatpush.bf16.msra.mxu3 %v8327_v62  ;;  %3115 = vmatpush.bf16.msra.mxu1 %v8328_v49  ;;  %v8392_v49 = vld [vmem:[#allocation122_spill] sm:$0xff] }
 0x379   :  { %3075 = vmatpush.bf16.msra.mxu2 %v8329_v16  ;;  %3103 = vmatpush.bf16.msra.mxu0 %v8330_v22 }
 0x37b   :  { %3088 = vmatpush.bf16.msra.mxu3 %v8331_v58  ;;  %3116 = vmatpush.bf16.msra.mxu1 %v8332_v3 }
 0x37d   :  { %3076 = vmatpush.bf16.msra.mxu2 %v8333_v40  ;;  %3104 = vmatpush.bf16.msra.mxu0 %v8334_v46 }
 0x37f   :  { %3089 = vmatpush.bf16.msra.mxu3 %v8335_v42  ;;  %3117 = vmatpush.bf16.msra.mxu1 %v8336_v47 }
 0x381   :  { %3077 = vmatpush.bf16.msra.mxu2 %v8337_v25  ;;  %3105 = vmatpush.bf16.msra.mxu0 %v8338_v30  ;;  %v7266_v25 = vpop.permute.xlu0 %919 }
 0x383   :  { %3090 = vmatpush.bf16.msra.mxu3 %v8339_v15  ;;  %3118 = vmatpush.bf16.msra.mxu1 %v8340_v41  ;;  %v8351_v41 = vld [vmem:[#allocation41_spill] sm:$0xff] }
 0x385   :  { %3078 = vmatpush.bf16.msra.mxu2 %v8341_v11  ;;  %3106 = vmatpush.bf16.msra.mxu0 %v8342_v50  ;;  %v8352_v11 = vld [vmem:[#allocation34_spill] sm:$0xff]  ;;  %v8353_v50 = vld [vmem:[#allocation16_spill] sm:$0xff] }
 0x387   :  { %3091 = vmatpush.bf16.msra.mxu3 %v8343_v51  ;;  %3119 = vmatpush.bf16.msra.mxu1 %v8344_v2  ;;  %v8354_v51 = vld [vmem:[#allocation32_spill] sm:$0xff] }
 0x388   :  { %v8355_v2 = vld [vmem:[#allocation44_spill] sm:$0xff] }
 0x389   :  { %3079 = vmatpush.bf16.msra.mxu2 %v8345_v35  ;;  %3107 = vmatpush.bf16.msra.mxu0 %v8346_v63  ;;  %v8356_v35 = vld [vmem:[#allocation37_spill] sm:$0xff]  ;;  %v8357_v63 = vld [vmem:[#allocation19_spill] sm:$0xff] }
 0x38b   :  { %3092 = vmatpush.bf16.msra.mxu3 %v8347_v55  ;;  %3120 = vmatpush.bf16.msra.mxu1 %v8348_v57  ;;  %v8358_v55 = vld [vmem:[#allocation35_spill] sm:$0xff]  ;;  %v8359_v57 = vld [vmem:[#allocation42_spill] sm:$0xff] }
 0x38d   :  { %3080 = vmatpush.bf16.msra.mxu2 %v8349_v17  ;;  %3108 = vmatpush.bf16.msra.mxu0 %v8350_v43  ;;  %v8360_v17 = vld [vmem:[#allocation36_spill] sm:$0xff]  ;;  %v8361_v43 = vld [vmem:[#allocation47_spill] sm:$0xff] }
 0x38f   :  { %3093 = vmatpush.bf16.msra.mxu3 %v8353_v50  ;;  %3121 = vmatpush.bf16.msra.mxu1 %v8354_v51  ;;  %v8364_v50 = vld [vmem:[#allocation38_spill] sm:$0xff] }
 0x390   :  { %v8365_v51 = vld [vmem:[#allocation50_spill] sm:$0xff] }
 0x391   :  { %3129 = vmatpush.bf16.msrb.mxu2 %v8351_v41  ;;  %3157 = vmatpush.bf16.msrb.mxu0 %v8352_v11  ;;  %v8362_v41 = vld [vmem:[#allocation39_spill] sm:$0xff]  ;;  %v8363_v11 = vld [vmem:[#allocation45_spill] sm:$0xff] }
 0x393   :  { %3094 = vmatpush.bf16.msra.mxu3 %v8357_v63  ;;  %3122 = vmatpush.bf16.msra.mxu1 %v8358_v55  ;;  %v8368_v63 = vld [vmem:[#allocation40_spill] sm:$0xff]  ;;  %v8369_v55 = vld [vmem:[#allocation53_spill] sm:$0xff] }
 0x395   :  { %3130 = vmatpush.bf16.msrb.mxu2 %v8355_v2  ;;  %3158 = vmatpush.bf16.msrb.mxu0 %v8356_v35  ;;  %v8366_v2 = vld [vmem:[#allocation43_spill] sm:$0xff]  ;;  %v8367_v35 = vld [vmem:[#allocation48_spill] sm:$0xff] }
 0x397   :  { %3143 = vmatpush.bf16.msrb.mxu3 %v8359_v57  ;;  %3171 = vmatpush.bf16.msrb.mxu1 %v8360_v17  ;;  %v8370_v57 = vld [vmem:[#allocation49_spill] sm:$0xff]  ;;  %v8371_v17 = vld [vmem:[#allocation51_spill] sm:$0xff] }
 0x399   :  { %3131 = vmatpush.bf16.msrb.mxu2 %v8361_v43  ;;  %3159 = vmatpush.bf16.msrb.mxu0 %v8362_v41  ;;  %v8372_v43 = vld [vmem:[#allocation46_spill] sm:$0xff]  ;;  %v8373_v41 = vld [vmem:[#allocation55_spill] sm:$0xff] }
 0x39b   :  { %3144 = vmatpush.bf16.msrb.mxu3 %v8363_v11  ;;  %3172 = vmatpush.bf16.msrb.mxu1 %v8364_v50  ;;  %v8374_v11 = vld [vmem:[#allocation57_spill] sm:$0xff]  ;;  %v8375_v50 = vld [vmem:[#allocation54_spill] sm:$0xff] }
 0x39d   :  { %3132 = vmatpush.bf16.msrb.mxu2 %v8365_v51  ;;  %3160 = vmatpush.bf16.msrb.mxu0 %v8366_v2  ;;  %v8376_v51 = vld [vmem:[#allocation52_spill] sm:$0xff]  ;;  %v8377_v2 = vld [vmem:[#allocation58_spill] sm:$0xff] }
 0x39f   :  { %3145 = vmatpush.bf16.msrb.mxu3 %v8367_v35  ;;  %3173 = vmatpush.bf16.msrb.mxu1 %v8368_v63  ;;  %v8378_v35 = vld [vmem:[#allocation65_spill] sm:$0xff]  ;;  %v8379_v63 = vld [vmem:[#allocation56_spill] sm:$0xff] }
 0x3a1   :  { %3133 = vmatpush.bf16.msrb.mxu2 %v8369_v55  ;;  %3161 = vmatpush.bf16.msrb.mxu0 %v8370_v57  ;;  %v8380_v55 = vld [vmem:[#allocation60_spill] sm:$0xff]  ;;  %v8381_v57 = vld [vmem:[#allocation61_spill] sm:$0xff] }
 0x3a3   :  { %3146 = vmatpush.bf16.msrb.mxu3 %v8371_v17  ;;  %3174 = vmatpush.bf16.msrb.mxu1 %v8372_v43  ;;  %v8382_v17 = vld [vmem:[#allocation69_spill] sm:$0xff]  ;;  %v8383_v43 = vld [vmem:[#allocation59_spill] sm:$0xff] }
 0x3a5   :  { %3134 = vmatpush.bf16.msrb.mxu2 %v8373_v41  ;;  %3162 = vmatpush.bf16.msrb.mxu0 %v8374_v11  ;;  %v8384_v41 = vld [vmem:[#allocation66_spill] sm:$0xff] }
 0x3a6   :  { %v8385_v11 = vld [vmem:[#allocation62_spill] sm:$0xff] }
 0x3a7   :  { %3147 = vmatpush.bf16.msrb.mxu3 %v8375_v50  ;;  %3175 = vmatpush.bf16.msrb.mxu1 %v8376_v51  ;;  %v8386_v50 = vld [vmem:[#allocation70_spill] sm:$0xff] }
 0x3a9   :  { %3135 = vmatpush.bf16.msrb.mxu2 %v8377_v2  ;;  %3163 = vmatpush.bf16.msrb.mxu0 %v8378_v35  ;;  %v8387_v2 = vld [vmem:[#allocation118_spill] sm:$0xff] }
 0x3ab   :  { %3148 = vmatpush.bf16.msrb.mxu3 %v8379_v63  ;;  %3176 = vmatpush.bf16.msrb.mxu1 %v8380_v55 }
 0x3ad   :  { %3136 = vmatpush.bf16.msrb.mxu2 %v8381_v57  ;;  %3164 = vmatpush.bf16.msrb.mxu0 %v8382_v17  ;;  %v8388_v57 = vld [vmem:[#allocation100_spill] sm:$0xff] }
 0x3ae   :  { %v985_v17 = vmul.f32 %v8388_v57, %v7266_v25 }
 0x3af   :  { %3149 = vmatpush.bf16.msrb.mxu3 %v8383_v43  ;;  %3177 = vmatpush.bf16.msrb.mxu1 %v8384_v41  ;;  %v8389_v43 = vld [vmem:[#allocation123_spill] sm:$0xff]  ;;  %v8390_v41 = vld [vmem:[#allocation117_spill] sm:$0xff] }
 0x3b0   :  { %v1303_v42 = vadd.f32 %v8389_v43, %v985_v17 }
 0x3b3   :  { %3150 = vmatpush.bf16.msrb.mxu3 %v8385_v11  ;;  %3178 = vmatpush.bf16.msrb.mxu1 %v8386_v50 }
 0x3cc   :  { %v2760_v51 = vpop.f32.mrf.mxu0 }
 0x3cd   :  { %v2761_v15 = vadd.f32 %v2760_v51, %v8387_v2  ;;  %v8391_v2 = vld [vmem:[#allocation99_spill] sm:$0xff] }
 0x3d2   :  { %v2732_v35 = vpop.f32.mrf.mxu2 }
 0x3d3   :  { %v2774_v30 = vpop.f32.mrf.mxu1  ;;  %v2733_v46 = vadd.f32 %v2732_v35, %v8390_v41  ;;  %v8393_v35 = vld [vmem:[#allocation121_spill] sm:$0xff] }
 0x3d4   :  { %v2775_v63 = vadd.f32 %v2774_v30, %v2761_v15  ;;  %v2762_v55 = vpop.f32.mrf.mxu0  ;;  %v984_v30 = vmul.f32 %v8391_v2, %v7266_v25 }
 0x3d5   :  { %v2763_v50 = vadd.f32 %v2762_v55, %v1303_v42 }
 0x3d6   :  { %v4457_v47 = vmul.f32 -1.442695, %v2775_v63  ;;  %v1270_v57 = vadd.f32 %v8392_v49, %v984_v30  ;;  %v8394_v49 = vld [vmem:[#allocation108_spill] sm:$0xff] }
 0x3d7   :  { %v8396_v30 = vld [vmem:[#allocation120_spill] sm:$0xff] }
 0x3d8   :  { %4757 = vpow2.f32 %v4457_v47 }
 0x3d9   :  { %v2746_v11 = vpop.f32.mrf.mxu3 }
 0x3da   :  { %v2747_v40 = vadd.f32 %v2746_v11, %v2733_v46  ;;  %v2734_v3 = vpop.f32.mrf.mxu2 }
 0x3db   :  { %v2776_v51 = vpop.f32.mrf.mxu1  ;;  %v2735_v41 = vadd.f32 %v2734_v3, %v1270_v57 }
 0x3dc   :  { %v4456_v15 = vmul.f32 -1.442695, %v2747_v40  ;;  %v2777_v58 = vadd.f32 %v2776_v51, %v2763_v50 }
 0x3dd   :  { %v2816_v22 = vpop.f32.mrf.mxu0 }
 0x3de   :  { %v4758_v16 = vpop.eup %4757  ;;  %4759 = vpow2.f32 %v4456_v15  ;;  %v4461_v63 = vmul.f32 -1.442695, %v2777_v58  ;;  %v2817_v42 = vadd.f32 %v2816_v22, %v8393_v35  ;;  %v987_v58 = vmul.f32 %v8394_v49, %v7266_v25  ;;  %v8395_v22 = vld [vmem:[#allocation125_spill] sm:$0xff] }
 0x3df   :  { %v7275_v17 = vadd.f32 1.0, %v4758_v16 }
 0x3e0   :  { %4761 = vpow2.f32 %v4461_v63  ;;  %v1369_v57 = vadd.f32 %v8395_v22, %v987_v58 }
 0x3e1   :  { %v2748_v47 = vpop.f32.mrf.mxu3  ;;  %4763 = vrcp.f32 %v7275_v17  ;;  %vm2943_vm6 = vweird.f32 %v7275_v17 }
 0x3e2   :  { %v2749_v46 = vadd.f32 %v2748_v47, %v2735_v41 }
 0x3e3   :  { %v2788_v11 = vpop.f32.mrf.mxu2  ;;  %v2830_v55 = vpop.f32.mrf.mxu1 }
 0x3e4   :  { %v4760_v43 = vpop.eup %4759  ;;  %v4460_v40 = vmul.f32 -1.442695, %v2749_v46  ;;  %v2831_v50 = vadd.f32 %v2830_v55, %v2817_v42  ;;  %v2789_v15 = vadd.f32 %v2788_v11, %v8396_v30  ;;  %v8398_v30 = vld [vmem:[#allocation124_spill] sm:$0xff] }
 0x3e5   :  { %v7279_v51 = vadd.f32 1.0, %v4760_v43  ;;  %v2818_v3 = vpop.f32.mrf.mxu0 }
 0x3e6   :  { %4765 = vpow2.f32 %v4460_v40  ;;  %v4459_v16 = vmul.f32 -1.442695, %v2831_v50  ;;  %v4762_v63 = vpop.eup %4761  ;;  %v2819_v35 = vadd.f32 %v2818_v3, %v1369_v57  ;;  %v8397_v40 = vld [vmem:[#allocation107_spill] sm:$0xff] }
 0x3e7   :  { %4767 = vrcp.f32 %v7279_v51  ;;  %v7286_v47 = vpop.eup %4763  ;;  %v986_v50 = vmul.f32 %v8397_v40, %v7266_v25  ;;  %v7292_v11 = vadd.f32 1.0, %v4762_v63  ;;  %vm2928_vm3 = vweird.f32 %v7279_v51 }
 0x3e8   :  { %4769 = vpow2.f32 %v4459_v16  ;;  %v2939_v58 = vmul.f32 %v7286_v47, %v7275_v17  ;;  %vm2944_vm4 = vweird.f32 %v7286_v47 }
 0x3e9   :  { %v2802_v41 = vpop.f32.mrf.mxu3  ;;  %v1336_v3 = vadd.f32 %v8398_v30, %v986_v50  ;;  %v8399_v50 = vld [vmem:[#allocation138_spill] sm:$0xff]  ;;  %vm7341_vm8 = vmor %vm2943_vm6, %vm2944_vm4 }
 0x3ea   :  { %v2803_v42 = vadd.f32 %v2802_v41, %v2789_v15  ;;  %v988_v30 = vmul.f32 %v8399_v50, %v7266_v25 }
 0x3eb   :  { %v2790_v46 = vpop.f32.mrf.mxu2  ;;  %v2832_v55 = vpop.f32.mrf.mxu1 }
 0x3ec   :  { %v4766_v43 = vpop.eup %4765  ;;  %v4458_v49 = vmul.f32 -1.442695, %v2803_v42  ;;  %v2833_v2 = vadd.f32 %v2832_v55, %v2819_v35  ;;  %v2791_v42 = vadd.f32 %v2790_v46, %v1336_v3  ;;  %v2940_v35 = vsub.f32 1.0, %v2939_v58 }
 0x3ed   :  { %v4768_v62 = vpop.eup %4767  ;;  %v7294_v16 = vadd.f32 1.0, %v4766_v43  ;;  %v2872_v58 = vpop.f32.mrf.mxu0 }
 0x3ee   :  { %v4770_v22 = vpop.eup %4769  ;;  %v2924_v57 = vmul.f32 %v4768_v62, %v7279_v51  ;;  %4771 = vpow2.f32 %v4458_v49  ;;  %v4463_v15 = vmul.f32 -1.442695, %v2833_v2  ;;  %v2941_v2 = vmul.f32 %v7286_v47, %v2940_v35 }
 0x3ef   :  { %4773 = vrcp.f32 %v7294_v16  ;;  %v7300_v55 = vadd.f32 1.0, %v4770_v22  ;;  %v2934_v22 = vand.u32 2147483648, %v7279_v51  ;;  %vm2929_vm2 = vweird.f32 %v4768_v62 }
 0x3f0   :  { %v2925_v41 = vsub.f32 1.0, %v2924_v57  ;;  %4775 = vrcp.f32 %v7292_v11  ;;  %vm2930_vm5 = vmor %vm2928_vm3, %vm2929_vm2  ;;  %v7325_v48 = vadd.f32 %v7286_v47, %v2941_v2  ;;  %vm2988_vm9 = vweird.f32 %v7294_v16 }
 0x3f1   :  { %v2804_v63 = vpop.f32.mrf.mxu3  ;;  %4777 = vpow2.f32 %v4463_v15  ;;  %v2935_v52 = vor.u32 1.1754944e-38, %v2934_v22  ;;  %v2947_v22 = vand.u32 2147483647, %v7275_v17 }
 0x3f2   :  { %v2805_v40 = vadd.f32 %v2804_v63, %v2791_v42  ;;  %v2926_v43 = vmul.f32 %v4768_v62, %v2925_v41  ;;  %4779 = vrcp.f32 %v7300_v55  ;;  %v8400_v41 = vld [vmem:[#allocation82_spill] sm:$0xff]  ;;  %v8402_v63 = vld [vmem:[#allocation93_spill] sm:$0xff] }
 0x3f3   :  { %v2844_v49 = vpop.f32.mrf.mxu2  ;;  %v1402_v42 = vadd.f32 %v8400_v41, %v988_v30  ;;  %v2886_v38 = vpop.f32.mrf.mxu1  ;;  %vm7366_vm11 = vcmp.eq.f32.partialorder %v2947_v22, 8.507059e+37 }
 0x3f4   :  { %v4772_v29 = vpop.eup %4771  ;;  %v4462_v54 = vmul.f32 -1.442695, %v2805_v40  ;;  %v2927_v57 = vadd.f32 %v4768_v62, %v2926_v43  ;;  %v2932_v40 = vand.u32 2147483647, %v7279_v51  ;;  %v2845_v50 = vadd.f32 %v2844_v49, %v8402_v63  ;;  %v8403_v51 = vld [vmem:[#allocation144_spill] sm:$0xff] }
 0x3f5   :  { %v7304_v28 = vpop.eup %4773  ;;  %v7308_v46 = vadd.f32 1.0, %v4772_v29  ;;  %v8401_v29 = vld [vmem:[#allocation139_spill] sm:$0xff] }
 0x3f6   :  { %v2984_v3 = vmul.f32 %v7304_v28, %v7294_v16  ;;  %4781 = vpow2.f32 %v4462_v54  ;;  %v7313_v15 = vpop.eup %4775  ;;  %v989_v35 = vmul.f32 %v8401_v29, %v7266_v25  ;;  %v2949_v54 = vand.u32 2147483648, %v7275_v17  ;;  %v8404_v29 = vld [vmem:[#allocation143_spill] sm:$0xff] }
 0x3f7   :  { %4783 = vrcp.f32 %v7308_v46  ;;  %v4778_v24 = vpop.eup %4777  ;;  %v7329_v25 = vmul.f32 %v7313_v15, %v7292_v11  ;;  %v2931_v49 = vsel %vm2930_vm5, %v4768_v62, %v2927_v57  ;;  %vm2933_vm7 = vcmp.eq.f32.partialorder %v2932_v40, 8.507059e+37 }
 0x3f8   :  { %v2985_v43 = vsub.f32 1.0, %v2984_v3  ;;  %v7331_v41 = vpop.eup %4779  ;;  %v1435_v63 = vadd.f32 %v8403_v51, %v989_v35  ;;  %v2873_v3 = vadd.f32 %v2872_v58, %v8404_v29  ;;  %v7337_v2 = vadd.f32 1.0, %v4778_v24 }
 0x3f9   :  { %v2858_v34 = vpop.f32.mrf.mxu3  ;;  %v2936_v56 = vsel %vm2933_vm7, %v2935_v52, %v2931_v49  ;;  %v7345_v62 = vor.u32 1.1754944e-38, %v2949_v54  ;;  %v2969_v29 = vmul.f32 %v7331_v41, %v7300_v55  ;;  %v2992_v35 = vand.u32 2147483647, %v7294_v16 }
 0x3fa   :  { %v2859_v30 = vadd.f32 %v2858_v34, %v2845_v50  ;;  %v2887_v58 = vadd.f32 %v2886_v38, %v2873_v3  ;;  %v2986_v57 = vmul.f32 %v7304_v28, %v2985_v43  ;;  %v3047_v38 = vsub.f32 1.0, %v2936_v56 }
 0x3fb   :  { %v2846_v40 = vpop.f32.mrf.mxu2  ;;  %v2964_v43 = vand.u32 2147483648, %v7308_v46  ;;  %vm2989_vm10 = vweird.f32 %v7304_v28  ;;  %v2888_v1 = vpop.f32.mrf.mxu1  ;;  %v2970_v19 = vsub.f32 1.0, %v2969_v29  ;;  %vm2958_vm14 = vweird.f32 %v7308_v46 }
 0x3fc   :  { %v4782_v7 = vpop.eup %4781  ;;  %4785 = vtanh.f32 %v2859_v30  ;;  %v2994_v30 = vand.u32 2147483648, %v7294_v16  ;;  %v2847_v49 = vadd.f32 %v2846_v40, %v1402_v42  ;;  %v2987_v3 = vadd.f32 %v7304_v28, %v2986_v57  ;;  %vm7374_vm13 = vmor %vm2988_vm9, %vm2989_vm10 }
 0x3fd   :  { %v4784_v10 = vpop.eup %4783  ;;  %v7347_v50 = vadd.f32 1.0, %v4782_v7  ;;  %v2874_v7 = vpop.f32.mrf.mxu0  ;;  %vm2993_vm1 = vcmp.eq.f32.partialorder %v2992_v35, 8.507059e+37  ;;  %vm3004_vm2 = vweird.f32 %v7313_v15  ;;  %vm2974_vm4 = vweird.f32 %v7331_v41 }
 0x3fe   :  { %v2954_v17 = vmul.f32 %v4784_v10, %v7308_v46  ;;  %vm2959_vm12 = vweird.f32 %v4784_v10  ;;  %v2875_v26 = vadd.f32 %v2874_v7, %v1435_v63  ;;  %v2991_v63 = vsel %vm7374_vm13, %v7304_v28, %v2987_v3 }
 0x3ff   :  { %4787 = vrcp.f32 %v7347_v50  ;;  %vm2960_vm15 = vmor %vm2958_vm14, %vm2959_vm12  ;;  %v2979_v3 = vand.u32 2147483648, %v7300_v55  ;;  %v8412_v57 = vsel %vm7341_vm8, %v7286_v47, %v7325_v48  ;;  %vm3018_vm5 = vweird.f32 %v7347_v50 }
 0x400   :  { %v2955_v54 = vsub.f32 1.0, %v2954_v17  ;;  %4789 = vrcp.f32 %v7337_v2  ;;  %v2962_v17 = vand.u32 2147483647, %v7308_v46  ;;  %v2971_v46 = vmul.f32 %v7331_v41, %v2970_v19 }
 0x401   :  { %4791 = vtanh.f32 %v2887_v58  ;;  %v2860_v51 = vpop.f32.mrf.mxu3  ;;  %v3049_v58 = vmul.f32 %v3047_v38, %v7133_v6  ;;  %v2889_v6 = vadd.f32 %v2888_v1, %v2875_v26  ;;  %v3022_v26 = vand.u32 2147483647, %v7347_v50 }
 0x402   :  { %v4786_v52 = vpop.eup %4785  ;;  %v2956_v36 = vmul.f32 %v4784_v10, %v2955_v54  ;;  %v2861_v40 = vadd.f32 %v2860_v51, %v2847_v49  ;;  %v2965_v54 = vor.u32 1.1754944e-38, %v2964_v43  ;;  %vm2963_vm0 = vcmp.eq.f32.partialorder %v2962_v17, 8.507059e+37 }
 0x403   :  { %v3051_v42 = vmul.f32 %v4786_v52, %v2936_v56  ;;  %v2995_v56 = vor.u32 1.1754944e-38, %v2994_v30  ;;  %vm3023_vm7 = vcmp.eq.f32.partialorder %v3022_v26, 8.507059e+37  ;;  %vm2973_vm8 = vweird.f32 %v7300_v55 }
 0x404   :  { %v2957_v22 = vadd.f32 %v4784_v10, %v2956_v36  ;;  %4793 = vtanh.f32 %v2861_v40  ;;  %vm7416_vm9 = vmor %vm2973_vm8, %vm2974_vm4  ;;  %vm3003_vm10 = vweird.f32 %v7292_v11 }
 0x405   :  { %v4788_v7 = vpop.eup %4787  ;;  %v3053_v29 = vadd.f32 %v3051_v42, %v3049_v58  ;;  %v2996_v28 = vsel %vm2993_vm1, %v2995_v56, %v2991_v63  ;;  %v8411_v42 = vsub.f32 1.0, %v7329_v25 }
 0x406   :  { %v7382_v52 = vpop.eup %4789  ;;  %v3014_v16 = vmul.f32 %v4788_v7, %v7347_v50  ;;  %v2961_v38 = vsel %vm2960_vm15, %v4784_v10, %v2957_v22  ;;  %v3024_v10 = vand.u32 2147483648, %v7347_v50  ;;  %v3048_v35 = vsub.f32 1.0, %v2996_v28 }
 0x407   :  { %v4792_v36 = vpop.eup %4791  ;;  %v2966_v43 = vsel %vm2963_vm0, %v2965_v54, %v2961_v38  ;;  %4795 = vtanh.f32 %v3053_v29  ;;  %v3029_v30 = vmul.f32 %v7382_v52, %v7337_v2  ;;  %vm3019_vm3 = vweird.f32 %v4788_v7 }
 0x408   :  { %v3015_v49 = vsub.f32 1.0, %v3014_v16  ;;  %v3059_v51 = vsub.f32 1.0, %v2966_v43  ;;  %v3063_v1 = vmul.f32 %v4792_v36, %v2966_v43  ;;  %4797 = vtanh.f32 %v2889_v6  ;;  %vm3020_vm6 = vmor %vm3018_vm5, %vm3019_vm3  ;;  %v8431_v36 = vld [vmem:[#allocation110_spill] sm:$0xff] }
 0x409   :  { %v3001_v40 = vmul.f32 %v7313_v15, %v8411_v42  ;;  %v2951_v22 = vsel %vm7366_vm11, %v7345_v62, %v8412_v57  ;;  %v3050_v63 = vmul.f32 %v3048_v35, %v7160_v44  ;;  %v2972_v6 = vadd.f32 %v7331_v41, %v2971_v46  ;;  %vm7428_vm11 = vmor %vm3003_vm10, %vm3004_vm2 }
 0x40a   :  { %v3061_v17 = vmul.f32 %v3059_v51, %v7167_v32  ;;  %v3016_v19 = vmul.f32 %v4788_v7, %v3015_v49  ;;  %v4794_v58 = vpop.eup %4793  ;;  %v3030_v56 = vsub.f32 1.0, %v3029_v30  ;;  %v3025_v34 = vor.u32 1.1754944e-38, %v3024_v10  ;;  %v8437_v49 = vld [vmem:[#allocation22_spill] sm:$0xff] }
 0x40b   :  { %v3052_v25 = vmul.f32 %v4794_v58, %v2996_v28  ;;  %v3002_v50 = vadd.f32 %v7313_v15, %v3001_v40  ;;  %v2977_v44 = vand.u32 2147483647, %v7300_v55  ;;  %v3009_v38 = vand.u32 2147483648, %v7292_v11 }
 0x40c   :  { %v3065_v32 = vadd.f32 %v3063_v1, %v3061_v17  ;;  %v3017_v54 = vadd.f32 %v4788_v7, %v3016_v19  ;;  %v2976_v55 = vsel %vm7416_vm9, %v7331_v41, %v2972_v6  ;;  %v3031_v28 = vmul.f32 %v7382_v52, %v3030_v56  ;;  %v8421_v6 = vld [vmem:[#allocation101_spill] sm:$0xff] }
 0x40d   :  { %v4796_v29 = vpop.eup %4795  ;;  %v3054_v24 = vadd.f32 %v3052_v25, %v3050_v63  ;;  %v2980_v51 = vor.u32 1.1754944e-38, %v2979_v3  ;;  %v3006_v26 = vsel %vm7428_vm11, %v7313_v15, %v3002_v50  ;;  %vm2978_vm12 = vcmp.eq.f32.partialorder %v2977_v44, 8.507059e+37  ;;  %v8418_v63 = vld [vmem:[#allocation89_spill] sm:$0xff]  ;;  %v8419_v25 = vld [vmem:[#allocation103_spill] sm:$0xff]  ;;  %v8427_v50 = vld [vmem:[#allocation104_spill] sm:$0xff] }
 0x40e   :  { %4799 = vtanh.f32 %v3065_v32  ;;  %v7408_v48 = vmul.f32 %v4796_v29, %v2951_v22  ;;  %v3021_v47 = vsel %vm3020_vm6, %v4788_v7, %v3017_v54  ;;  %v4798_v62 = vpop.eup %4797  ;;  %v3007_v7 = vand.u32 2147483647, %v7292_v11  ;;  %v8420_v29 = vld [vmem:[#allocation86_spill] sm:$0xff]  ;;  %v8422_v56 = vld [vmem:[#allocation97_spill] sm:$0xff] }
 0x40f   :  { %v3026_v16 = vsel %vm3023_vm7, %v3025_v34, %v3021_v47  ;;  %4801 = vtanh.f32 %v3054_v24  ;;  %v3010_v30 = vor.u32 1.1754944e-38, %v3009_v38  ;;  %v2981_v10 = vsel %vm2978_vm12, %v2980_v51, %v2976_v55  ;;  %v8423_v34 = vld [vmem:[#allocation109_spill] sm:$0xff]  ;;  %v8424_v47 = vld [vmem:[#allocation3_spill] sm:$0xff]  ;;  %v8425_v24 = vld [vmem:[#allocation18_spill] sm:$0xff] }
 0x410   :  { %v3060_v46 = vsub.f32 1.0, %v3026_v16  ;;  %v3064_v43 = vmul.f32 %v4798_v62, %v3026_v16  ;;  %vm3008_vm13 = vcmp.eq.f32.partialorder %v3007_v7, 8.507059e+37  ;;  %v3032_v35 = vadd.f32 %v7382_v52, %v3031_v28  ;;  %v8426_v62 = vld [vmem:[#allocation90_spill] sm:$0xff]  ;;  %v8428_v44 = vld [vmem:[#allocation5_spill] sm:$0xff]  ;;  %v8434_v7 = vld [vmem:[#allocation7_spill] sm:$0xff] }
 0x411   :  { %vm3034_vm14 = vweird.f32 %v7382_v52  ;;  %v3039_v3 = vand.u32 2147483648, %v7337_v2  ;;  %vm3033_vm15 = vweird.f32 %v7337_v2  ;;  %v3037_v15 = vand.u32 2147483647, %v7337_v2  ;;  %v8429_v16 = vld [vmem:[#allocation21_spill] sm:$0xff]  ;;  %v8430_v38 = vld [vmem:[#allocation98_spill] sm:$0xff]  ;;  %v8435_v55 = vld [vmem:[#allocation23_spill] sm:$0xff] }
 0x412   :  { %v3062_v1 = vmul.f32 %v3060_v46, %v7155_v12  ;;  %v3011_v12 = vsel %vm3008_vm13, %v3010_v30, %v3006_v26  ;;  %vm3035_vm0 = vmor %vm3033_vm15, %vm3034_vm14  ;;  %v8432_v46 = vld [vmem:[#allocation4_spill] sm:$0xff]  ;;  %v8436_v28 = vld [vmem:[#allocation6_spill] sm:$0xff] }
 0x413   :  { %v3036_v42 = vsel %vm3035_vm0, %v7382_v52, %v3032_v35  ;;  %v3040_v57 = vor.u32 1.1754944e-38, %v3039_v3  ;;  %vm3038_vm1 = vcmp.eq.f32.partialorder %v3037_v15, 8.507059e+37  ;;  %v8417_v52 = vld [vmem:[#allocation96_spill] sm:$0xff]  ;;  %v8438_v51 = vld [vmem:[#allocation9_spill] sm:$0xff]  ;;  %v8442_v30 = vld [vmem:[#allocation11_spill] sm:$0xff] }
 0x414   :  { %v4800_v11 = vpop.eup %4799  ;;  %v3066_v41 = vadd.f32 %v3064_v43, %v3062_v1  ;;  %v8433_v43 = vld [vmem:[#allocation20_spill] sm:$0xff]  ;;  %v8439_v1 = vld [vmem:[#allocation25_spill] sm:$0xff]  ;;  %v8445_v35 = vld [vmem:[#allocation26_spill] sm:$0xff] }
 0x415   :  { %v7438_v17 = vmul.f32 %v4800_v11, %v2981_v10  ;;  %v4802_v19 = vpop.eup %4801  ;;  %v3041_v32 = vsel %vm3038_vm1, %v3040_v57, %v3036_v42  ;;  %v8440_v26 = vld [vmem:[#allocation8_spill] sm:$0xff]  ;;  %v8443_v10 = vld [vmem:[#allocation27_spill] sm:$0xff]  ;;  %v8447_v3 = vld [vmem:[#allocation29_spill] sm:$0xff] }
 0x416   :  { %4803 = vtanh.f32 %v3066_v41  ;;  %v7443_v58 = vmul.f32 %v4802_v19, %v3011_v12  ;;  %v8441_v11 = vld [vmem:[#allocation24_spill] sm:$0xff]  ;;  %v8444_v41 = vld [vmem:[#allocation10_spill] sm:$0xff]  ;;  %v8446_v19 = vld [vmem:[#allocation13_spill] sm:$0xff] }
 0x417   :  { %v8448_v12 = vld [vmem:[#allocation12_spill] sm:$0xff]  ;;  %v8450_v42 = vld [vmem:[#allocation15_spill] sm:$0xff]  ;;  %v8452_v57 = vld [vmem:[#allocation14_spill] sm:$0xff] }
 0x418   :  { %v3071_v40 = vpack.c.bf16 %v7443_v58, %v7408_v48  ;;  %v8449_v15 = vld [vmem:[#allocation28_spill] sm:$0xff] }
 0x41a   :  { %3081 = vmatmul.bf16.vlgmr.msra.gmra.mxu2 %v3071_v40  ;;  %3109 = vmatmul.bf16.vlgmr.msra.gmra.mxu0 %v3071_v40 }
 0x41b   :  { %3185 = vmatpush.bf16.msra.mxu2 %v8214_v23  ;;  %3213 = vmatpush.bf16.msra.mxu0 %v8215_v53 }
 0x41c   :  { %v4804_v22 = vpop.eup %4803 }
 0x41d   :  { %v7450_v54 = vmul.f32 %v4804_v22, %v3041_v32  ;;  %v8453_v22 = vld [vmem:[#allocation30_spill] sm:$0xff]  ;;  %v8454_v32 = vld [vmem:[#allocation17_spill] sm:$0xff] }
 0x41f   :  { %v3072_v2 = vpack.c.bf16 %v7438_v17, %v7450_v54  ;;  %3186 = vmatpush.bf16.msra.mxu2 %v8216_v20  ;;  %3214 = vmatpush.bf16.msra.mxu0 %v8217_v8 }
 0x421   :  { %3095 = vmatmul.bf16.vlgmr.msra.gmra.mxu3 %v3072_v2  ;;  %3123 = vmatmul.bf16.vlgmr.msra.gmra.mxu1 %v3072_v2 }
 0x422   :  { %3199 = vmatpush.bf16.msra.mxu3 %v8228_v60  ;;  %3227 = vmatpush.bf16.msra.mxu1 %v8229_v31 }
 0x423   :  { %3187 = vmatpush.bf16.msra.mxu2 %v8218_v0  ;;  %3215 = vmatpush.bf16.msra.mxu0 %v8219_v21 }
 0x426   :  { %3200 = vmatpush.bf16.msra.mxu3 %v8231_v45  ;;  %3228 = vmatpush.bf16.msra.mxu1 %v8232_v14 }
 0x427   :  { %3188 = vmatpush.bf16.msra.mxu2 %v8220_v4  ;;  %3216 = vmatpush.bf16.msra.mxu0 %v8221_v27 }
 0x42a   :  { %3201 = vmatpush.bf16.msra.mxu3 %v8233_v59  ;;  %3229 = vmatpush.bf16.msra.mxu1 %v8234_v13 }
 0x42b   :  { %3137 = vmatmul.bf16.vlgmr.msrb.gmra.mxu2 %v3071_v40  ;;  %3165 = vmatmul.bf16.vlgmr.msrb.gmra.mxu0 %v3071_v40 }
 0x42c   :  { %3189 = vmatpush.bf16.msra.mxu2 %v8222_v39  ;;  %3217 = vmatpush.bf16.msra.mxu0 %v8223_v37 }
 0x42e   :  { %3202 = vmatpush.bf16.msra.mxu3 %v8235_v33  ;;  %3230 = vmatpush.bf16.msra.mxu1 %v8236_v18 }
 0x430   :  { %3190 = vmatpush.bf16.msra.mxu2 %v8224_v5  ;;  %3218 = vmatpush.bf16.msra.mxu0 %v6438_v61 }
 0x431   :  { %3151 = vmatmul.bf16.vlgmr.msrb.gmra.mxu3 %v3072_v2  ;;  %3179 = vmatmul.bf16.vlgmr.msrb.gmra.mxu1 %v3072_v2 }
 0x432   :  { %3203 = vmatpush.bf16.msra.mxu3 %v8237_v9  ;;  %3231 = vmatpush.bf16.msra.mxu1 %v8417_v52 }
 0x434   :  { %3191 = vmatpush.bf16.msra.mxu2 %v8418_v63  ;;  %3219 = vmatpush.bf16.msra.mxu0 %v8419_v25 }
 0x436   :  { %3204 = vmatpush.bf16.msra.mxu3 %v8420_v29  ;;  %3232 = vmatpush.bf16.msra.mxu1 %v8421_v6 }
 0x438   :  { %3192 = vmatpush.bf16.msra.mxu2 %v8422_v56  ;;  %3220 = vmatpush.bf16.msra.mxu0 %v8423_v34 }
 0x43a   :  { %3205 = vmatpush.bf16.msra.mxu3 %v8426_v62  ;;  %3233 = vmatpush.bf16.msra.mxu1 %v8427_v50 }
 0x43b   :  { %3193 = vmatmul.bf16.vlgmr.msra.gmra.mxu2 %v3071_v40  ;;  %3221 = vmatmul.bf16.vlgmr.msra.gmra.mxu0 %v3071_v40  ;;  %v8451_v40 = vld [vmem:[#allocation31_spill] sm:$0xff] }
 0x43c   :  { %3423 = vmatpush.bf16.msrb.mxu2 %v8424_v47  ;;  %3449 = vmatpush.bf16.msrb.mxu0 %v8425_v24  ;;  %v8456_v47 = vld [vmem:[#allocation41_spill] sm:$0xff]  ;;  %v8457_v24 = vld [vmem:[#allocation34_spill] sm:$0xff] }
 0x43e   :  { %3206 = vmatpush.bf16.msra.mxu3 %v8430_v38  ;;  %3234 = vmatpush.bf16.msra.mxu1 %v8431_v36 }
 0x440   :  { %3424 = vmatpush.bf16.msrb.mxu2 %v8428_v44  ;;  %3450 = vmatpush.bf16.msrb.mxu0 %v8429_v16  ;;  %v8458_v44 = vld [vmem:[#allocation16_spill] sm:$0xff] }
 0x441   :  { %3207 = vmatmul.bf16.vlgmr.msra.gmra.mxu3 %v3072_v2  ;;  %3235 = vmatmul.bf16.vlgmr.msra.gmra.mxu1 %v3072_v2  ;;  %v8455_v2 = vld [vmem:[#allocation33_spill] sm:$0xff]  ;;  %v8459_v16 = vld [vmem:[#allocation32_spill] sm:$0xff] }
 0x442   :  { %3436 = vmatpush.bf16.msrb.mxu3 %v8432_v46  ;;  %3462 = vmatpush.bf16.msrb.mxu1 %v8433_v43  ;;  %v8460_v46 = vld [vmem:[#allocation44_spill] sm:$0xff]  ;;  %v8461_v43 = vld [vmem:[#allocation37_spill] sm:$0xff] }
 0x444   :  { %3425 = vmatpush.bf16.msrb.mxu2 %v8434_v7  ;;  %3451 = vmatpush.bf16.msrb.mxu0 %v8435_v55  ;;  %v8462_v7 = vld [vmem:[#allocation19_spill] sm:$0xff] }
 0x445   :  { %v8463_v55 = vld [vmem:[#allocation35_spill] sm:$0xff] }
 0x446   :  { %3437 = vmatpush.bf16.msrb.mxu3 %v8436_v28  ;;  %3463 = vmatpush.bf16.msrb.mxu1 %v8437_v49  ;;  %v8464_v28 = vld [vmem:[#allocation42_spill] sm:$0xff]  ;;  %v8465_v49 = vld [vmem:[#allocation36_spill] sm:$0xff] }
 0x448   :  { %3426 = vmatpush.bf16.msrb.mxu2 %v8438_v51  ;;  %3452 = vmatpush.bf16.msrb.mxu0 %v8439_v1  ;;  %v8466_v51 = vld [vmem:[#allocation47_spill] sm:$0xff] }
 0x449   :  { %v8467_v1 = vld [vmem:[#allocation39_spill] sm:$0xff] }
 0x44a   :  { %3438 = vmatpush.bf16.msrb.mxu3 %v8440_v26  ;;  %3464 = vmatpush.bf16.msrb.mxu1 %v8441_v11  ;;  %v8468_v26 = vld [vmem:[#allocation45_spill] sm:$0xff]  ;;  %v8469_v11 = vld [vmem:[#allocation38_spill] sm:$0xff] }
 0x44c   :  { %3427 = vmatpush.bf16.msrb.mxu2 %v8442_v30  ;;  %3453 = vmatpush.bf16.msrb.mxu0 %v8443_v10  ;;  %v8470_v30 = vld [vmem:[#allocation50_spill] sm:$0xff]  ;;  %v8471_v10 = vld [vmem:[#allocation43_spill] sm:$0xff] }
 0x44e   :  { %3439 = vmatpush.bf16.msrb.mxu3 %v8444_v41  ;;  %3465 = vmatpush.bf16.msrb.mxu1 %v8445_v35  ;;  %v8472_v41 = vld [vmem:[#allocation48_spill] sm:$0xff] }
 0x44f   :  { %v8473_v35 = vld [vmem:[#allocation40_spill] sm:$0xff] }
 0x450   :  { %3428 = vmatpush.bf16.msrb.mxu2 %v8446_v19  ;;  %3454 = vmatpush.bf16.msrb.mxu0 %v8447_v3  ;;  %v8474_v19 = vld [vmem:[#allocation53_spill] sm:$0xff] }
 0x451   :  { %v8475_v3 = vld [vmem:[#allocation49_spill] sm:$0xff] }
 0x452   :  { %3440 = vmatpush.bf16.msrb.mxu3 %v8448_v12  ;;  %3466 = vmatpush.bf16.msrb.mxu1 %v8449_v15  ;;  %v8476_v12 = vld [vmem:[#allocation51_spill] sm:$0xff]  ;;  %v8477_v15 = vld [vmem:[#allocation46_spill] sm:$0xff] }
 0x454   :  { %3429 = vmatpush.bf16.msrb.mxu2 %v8450_v42  ;;  %3455 = vmatpush.bf16.msrb.mxu0 %v8451_v40  ;;  %v8478_v42 = vld [vmem:[#allocation55_spill] sm:$0xff]  ;;  %v8479_v40 = vld [vmem:[#allocation57_spill] sm:$0xff] }
 0x456   :  { %3441 = vmatpush.bf16.msrb.mxu3 %v8452_v57  ;;  %3467 = vmatpush.bf16.msrb.mxu1 %v8453_v22  ;;  %v8480_v57 = vld [vmem:[#allocation54_spill] sm:$0xff]  ;;  %v8481_v22 = vld [vmem:[#allocation52_spill] sm:$0xff] }
 0x458   :  { %3430 = vmatpush.bf16.msrb.mxu2 %v8454_v32  ;;  %3456 = vmatpush.bf16.msrb.mxu0 %v8455_v2  ;;  %v8482_v32 = vld [vmem:[#allocation58_spill] sm:$0xff]  ;;  %v8483_v2 = vld [vmem:[#allocation65_spill] sm:$0xff] }
 0x45a   :  { %3442 = vmatpush.bf16.msrb.mxu3 %v8458_v44  ;;  %3468 = vmatpush.bf16.msrb.mxu1 %v8459_v16  ;;  %v8486_v44 = vld [vmem:[#allocation61_spill] sm:$0xff] }
 0x45b   :  { %v8487_v16 = vld [vmem:[#allocation69_spill] sm:$0xff] }
 0x45c   :  { %3475 = vmatpush.bf16.msra.mxu2 %v8456_v47  ;;  %3501 = vmatpush.bf16.msra.mxu0 %v8457_v24  ;;  %v8484_v47 = vld [vmem:[#allocation56_spill] sm:$0xff] }
 0x45d   :  { %v8485_v24 = vld [vmem:[#allocation60_spill] sm:$0xff] }
 0x45e   :  { %3443 = vmatpush.bf16.msrb.mxu3 %v8462_v7  ;;  %3469 = vmatpush.bf16.msrb.mxu1 %v8463_v55  ;;  %v8490_v7 = vld [vmem:[#allocation62_spill] sm:$0xff] }
 0x45f   :  { %v8491_v55 = vld [vmem:[#allocation70_spill] sm:$0xff] }
 0x460   :  { %3476 = vmatpush.bf16.msra.mxu2 %v8460_v46  ;;  %3502 = vmatpush.bf16.msra.mxu0 %v8461_v43  ;;  %v8488_v46 = vld [vmem:[#allocation59_spill] sm:$0xff]  ;;  %v8489_v43 = vld [vmem:[#allocation66_spill] sm:$0xff] }
 0x462   :  { %3488 = vmatpush.bf16.msra.mxu3 %v8464_v28  ;;  %3514 = vmatpush.bf16.msra.mxu1 %v8465_v49  ;;  %v7548_v49 = vpop.permute.xlu2 %929 }
 0x464   :  { %3477 = vmatpush.bf16.msra.mxu2 %v8466_v51  ;;  %3503 = vmatpush.bf16.msra.mxu0 %v8467_v1  ;;  %v8492_v51 = vld [vmem:[#allocation127_spill] sm:$0xff] }
 0x466   :  { %3489 = vmatpush.bf16.msra.mxu3 %v8468_v26  ;;  %3515 = vmatpush.bf16.msra.mxu1 %v8469_v11 }
 0x468   :  { %3478 = vmatpush.bf16.msra.mxu2 %v8470_v30  ;;  %3504 = vmatpush.bf16.msra.mxu0 %v8471_v10 }
 0x46a   :  { %3490 = vmatpush.bf16.msra.mxu3 %v8472_v41  ;;  %3516 = vmatpush.bf16.msra.mxu1 %v8473_v35  ;;  %v8493_v41 = vld [vmem:[#allocation100_spill] sm:$0xff] }
 0x46b   :  { %v997_v35 = vmul.f32 %v8493_v41, %v7548_v49 }
 0x46c   :  { %3479 = vmatpush.bf16.msra.mxu2 %v8474_v19  ;;  %3505 = vmatpush.bf16.msra.mxu0 %v8475_v3  ;;  %v8494_v3 = vld [vmem:[#allocation131_spill] sm:$0xff] }
 0x46e   :  { %3491 = vmatpush.bf16.msra.mxu3 %v8476_v12  ;;  %3517 = vmatpush.bf16.msra.mxu1 %v8477_v15  ;;  %v1308_v12 = vadd.f32 %v8494_v3, %v997_v35  ;;  %v8495_v15 = vld [vmem:[#allocation126_spill] sm:$0xff] }
 0x470   :  { %3480 = vmatpush.bf16.msra.mxu2 %v8478_v42  ;;  %3506 = vmatpush.bf16.msra.mxu0 %v8479_v40 }
 0x472   :  { %3492 = vmatpush.bf16.msra.mxu3 %v8480_v57  ;;  %3518 = vmatpush.bf16.msra.mxu1 %v8481_v22 }
 0x474   :  { %3481 = vmatpush.bf16.msra.mxu2 %v8482_v32  ;;  %3507 = vmatpush.bf16.msra.mxu0 %v8483_v2 }
 0x476   :  { %3493 = vmatpush.bf16.msra.mxu3 %v8484_v47  ;;  %3519 = vmatpush.bf16.msra.mxu1 %v8485_v24  ;;  %v8496_v47 = vld [vmem:[#allocation99_spill] sm:$0xff] }
 0x477   :  { %v996_v24 = vmul.f32 %v8496_v47, %v7548_v49 }
 0x478   :  { %3482 = vmatpush.bf16.msra.mxu2 %v8486_v44  ;;  %3508 = vmatpush.bf16.msra.mxu0 %v8487_v16 }
 0x47a   :  { %3494 = vmatpush.bf16.msra.mxu3 %v8488_v46  ;;  %3520 = vmatpush.bf16.msra.mxu1 %v8489_v43 }
 0x47e   :  { %3495 = vmatpush.bf16.msra.mxu3 %v8490_v7  ;;  %3521 = vmatpush.bf16.msra.mxu1 %v8491_v55  ;;  %v8497_v7 = vld [vmem:[#allocation130_spill] sm:$0xff] }
 0x47f   :  { %v1275_v55 = vadd.f32 %v8497_v7, %v996_v24 }
 0x497   :  { %v3110_v28 = vpop.f32.mrf.mxu0 }
 0x498   :  { %v3111_v1 = vadd.f32 %v3110_v28, %v8492_v51 }
 0x49d   :  { %v3082_v26 = vpop.f32.mrf.mxu2 }
 0x49e   :  { %v3124_v11 = vpop.f32.mrf.mxu1  ;;  %v3083_v42 = vadd.f32 %v3082_v26, %v8495_v15 }
 0x49f   :  { %v3125_v30 = vadd.f32 %v3124_v11, %v3111_v1  ;;  %v3112_v10 = vpop.f32.mrf.mxu0  ;;  %v8498_v11 = vld [vmem:[#allocation129_spill] sm:$0xff] }
 0x4a0   :  { %v3113_v57 = vadd.f32 %v3112_v10, %v1308_v12 }
 0x4a1   :  { %v4465_v19 = vmul.f32 -1.442695, %v3125_v30 }
 0x4a3   :  { %4805 = vpow2.f32 %v4465_v19 }
 0x4a4   :  { %v3096_v40 = vpop.f32.mrf.mxu3 }
 0x4a5   :  { %v3097_v22 = vadd.f32 %v3096_v40, %v3083_v42  ;;  %v3084_v32 = vpop.f32.mrf.mxu2  ;;  %v8499_v40 = vld [vmem:[#allocation108_spill] sm:$0xff] }
 0x4a6   :  { %v3126_v2 = vpop.f32.mrf.mxu1  ;;  %v3085_v1 = vadd.f32 %v3084_v32, %v1275_v55 }
 0x4a7   :  { %v4464_v44 = vmul.f32 -1.442695, %v3097_v22  ;;  %v3127_v16 = vadd.f32 %v3126_v2, %v3113_v57  ;;  %v999_v57 = vmul.f32 %v8499_v40, %v7548_v49  ;;  %v8500_v2 = vld [vmem:[#allocation133_spill] sm:$0xff] }
 0x4a8   :  { %v3166_v46 = vpop.f32.mrf.mxu0 }
 0x4a9   :  { %v4806_v43 = vpop.eup %4805  ;;  %4807 = vpow2.f32 %v4464_v44  ;;  %v4469_v28 = vmul.f32 -1.442695, %v3127_v16  ;;  %v3167_v30 = vadd.f32 %v3166_v46, %v8498_v11  ;;  %v1374_v24 = vadd.f32 %v8500_v2, %v999_v57  ;;  %v8501_v44 = vld [vmem:[#allocation128_spill] sm:$0xff] }
 0x4aa   :  { %v7558_v51 = vadd.f32 1.0, %v4806_v43  ;;  %v8503_v2 = vld [vmem:[#allocation132_spill] sm:$0xff] }
 0x4ab   :  { %4809 = vpow2.f32 %v4469_v28 }
 0x4ac   :  { %v3098_v26 = vpop.f32.mrf.mxu3  ;;  %4811 = vrcp.f32 %v7558_v51  ;;  %vm3293_vm6 = vweird.f32 %v7558_v51 }
 0x4ad   :  { %v3099_v10 = vadd.f32 %v3098_v26, %v3085_v1 }
 0x4ae   :  { %v3138_v35 = vpop.f32.mrf.mxu2  ;;  %v3180_v19 = vpop.f32.mrf.mxu1 }
 0x4af   :  { %v4808_v3 = vpop.eup %4807  ;;  %v4468_v12 = vmul.f32 -1.442695, %v3099_v10  ;;  %v3181_v15 = vadd.f32 %v3180_v19, %v3167_v30  ;;  %v3139_v16 = vadd.f32 %v3138_v35, %v8501_v44  ;;  %v8502_v30 = vld [vmem:[#allocation107_spill] sm:$0xff] }
 0x4b0   :  { %v7562_v42 = vadd.f32 1.0, %v4808_v3  ;;  %v3168_v32 = vpop.f32.mrf.mxu0  ;;  %v998_v10 = vmul.f32 %v8502_v30, %v7548_v49 }
 0x4b1   :  { %4813 = vpow2.f32 %v4468_v12  ;;  %v4467_v22 = vmul.f32 -1.442695, %v3181_v15  ;;  %v4810_v46 = vpop.eup %4809  ;;  %v3169_v55 = vadd.f32 %v3168_v32, %v1374_v24 }
 0x4b2   :  { %4815 = vrcp.f32 %v7562_v42  ;;  %v7569_v7 = vpop.eup %4811  ;;  %v7575_v35 = vadd.f32 1.0, %v4810_v46  ;;  %v1341_v32 = vadd.f32 %v8503_v2, %v998_v10  ;;  %v8504_v10 = vld [vmem:[#allocation138_spill] sm:$0xff]  ;;  %vm3278_vm3 = vweird.f32 %v7562_v42 }
 0x4b3   :  { %4817 = vpow2.f32 %v4467_v22  ;;  %v3289_v15 = vmul.f32 %v7569_v7, %v7558_v51  ;;  %v1000_v2 = vmul.f32 %v8504_v10, %v7548_v49  ;;  %vm3294_vm4 = vweird.f32 %v7569_v7 }
 0x4b4   :  { %v3152_v43 = vpop.f32.mrf.mxu3  ;;  %vm7624_vm8 = vmor %vm3293_vm6, %vm3294_vm4 }
 0x4b5   :  { %v3153_v28 = vadd.f32 %v3152_v43, %v3139_v16 }
 0x4b6   :  { %v3140_v1 = vpop.f32.mrf.mxu2  ;;  %v3182_v26 = vpop.f32.mrf.mxu1 }
 0x4b7   :  { %v4814_v11 = vpop.eup %4813  ;;  %v4466_v19 = vmul.f32 -1.442695, %v3153_v28  ;;  %v3183_v3 = vadd.f32 %v3182_v26, %v3169_v55  ;;  %v3141_v43 = vadd.f32 %v3140_v1, %v1341_v32  ;;  %v3290_v55 = vsub.f32 1.0, %v3289_v15 }
 0x4b8   :  { %v4816_v12 = vpop.eup %4815  ;;  %v7577_v57 = vadd.f32 1.0, %v4814_v11  ;;  %v3222_v15 = vpop.f32.mrf.mxu0 }
 0x4b9   :  { %v4818_v22 = vpop.eup %4817  ;;  %v3274_v24 = vmul.f32 %v4816_v12, %v7562_v42  ;;  %4819 = vpow2.f32 %v4466_v19  ;;  %v4471_v44 = vmul.f32 -1.442695, %v3183_v3  ;;  %v3291_v3 = vmul.f32 %v7569_v7, %v3290_v55 }
 0x4ba   :  { %4821 = vrcp.f32 %v7577_v57  ;;  %v7583_v28 = vadd.f32 1.0, %v4818_v22  ;;  %v3284_v22 = vand.u32 2147483648, %v7562_v42  ;;  %vm3279_vm2 = vweird.f32 %v4816_v12 }
 0x4bb   :  { %v3275_v16 = vsub.f32 1.0, %v3274_v24  ;;  %4823 = vrcp.f32 %v7575_v35  ;;  %vm3280_vm5 = vmor %vm3278_vm3, %vm3279_vm2  ;;  %v7608_v62 = vadd.f32 %v7569_v7, %v3291_v3  ;;  %vm3338_vm9 = vweird.f32 %v7577_v57 }
 0x4bc   :  { %v3154_v46 = vpop.f32.mrf.mxu3  ;;  %4825 = vpow2.f32 %v4471_v44  ;;  %v3285_v50 = vor.u32 1.1754944e-38, %v3284_v22  ;;  %v3297_v22 = vand.u32 2147483647, %v7558_v51 }
 0x4bd   :  { %v3155_v26 = vadd.f32 %v3154_v46, %v3141_v43  ;;  %v3276_v11 = vmul.f32 %v4816_v12, %v3275_v16  ;;  %4827 = vrcp.f32 %v7583_v28  ;;  %v3282_v16 = vand.u32 2147483647, %v7562_v42  ;;  %v8505_v43 = vld [vmem:[#allocation145_spill] sm:$0xff]  ;;  %v8508_v42 = vld [vmem:[#allocation146_spill] sm:$0xff] }
 0x4be   :  { %v3194_v19 = vpop.f32.mrf.mxu2  ;;  %v1407_v55 = vadd.f32 %v8505_v43, %v1000_v2  ;;  %v3236_v47 = vpop.f32.mrf.mxu1  ;;  %vm7649_vm11 = vcmp.eq.f32.partialorder %v3297_v22, 8.507059e+37 }
 0x4bf   :  { %v4820_v30 = vpop.eup %4819  ;;  %v4470_v40 = vmul.f32 -1.442695, %v3155_v26  ;;  %v3277_v24 = vadd.f32 %v4816_v12, %v3276_v11  ;;  %v8507_v26 = vld [vmem:[#allocation94_spill] sm:$0xff]  ;;  %vm3283_vm7 = vcmp.eq.f32.partialorder %v3282_v16, 8.507059e+37 }
 0x4c0   :  { %v7587_v41 = vpop.eup %4821  ;;  %v7591_v1 = vadd.f32 1.0, %v4820_v30  ;;  %v8506_v30 = vld [vmem:[#allocation139_spill] sm:$0xff]  ;;  %v3195_v10 = vadd.f32 %v3194_v19, %v8507_v26 }
 0x4c1   :  { %v3334_v32 = vmul.f32 %v7587_v41, %v7577_v57  ;;  %4829 = vpow2.f32 %v4470_v40  ;;  %v7596_v44 = vpop.eup %4823  ;;  %v1001_v46 = vmul.f32 %v8506_v30, %v7548_v49  ;;  %v3299_v40 = vand.u32 2147483648, %v7558_v51  ;;  %v8509_v30 = vld [vmem:[#allocation91_spill] sm:$0xff] }
 0x4c2   :  { %4831 = vrcp.f32 %v7591_v1  ;;  %v4826_v36 = vpop.eup %4825  ;;  %v7612_v49 = vmul.f32 %v7596_v44, %v7575_v35  ;;  %v3281_v19 = vsel %vm3280_vm5, %v4816_v12, %v3277_v24  ;;  %vm3339_vm10 = vweird.f32 %v7587_v41 }
 0x4c3   :  { %v3335_v11 = vsub.f32 1.0, %v3334_v32  ;;  %v7614_v43 = vpop.eup %4827  ;;  %v1440_v26 = vadd.f32 %v8508_v42, %v1001_v46  ;;  %v3223_v32 = vadd.f32 %v3222_v15, %v8509_v30  ;;  %v7620_v3 = vadd.f32 1.0, %v4826_v36  ;;  %vm7657_vm13 = vmor %vm3338_vm9, %vm3339_vm10 }
 0x4c4   :  { %v3208_v38 = vpop.f32.mrf.mxu3  ;;  %v3286_v56 = vsel %vm3283_vm7, %v3285_v50, %v3281_v19  ;;  %v7628_v12 = vor.u32 1.1754944e-38, %v3299_v40  ;;  %v3319_v30 = vmul.f32 %v7614_v43, %v7583_v28  ;;  %v3342_v46 = vand.u32 2147483647, %v7577_v57 }
 0x4c5   :  { %v3209_v2 = vadd.f32 %v3208_v38, %v3195_v10  ;;  %v3237_v15 = vadd.f32 %v3236_v47, %v3223_v32  ;;  %v3336_v24 = vmul.f32 %v7587_v41, %v3335_v11  ;;  %v3397_v47 = vsub.f32 1.0, %v3286_v56 }
 0x4c6   :  { %v3196_v16 = vpop.f32.mrf.mxu2  ;;  %v3314_v11 = vand.u32 2147483648, %v7591_v1  ;;  %v3238_v63 = vpop.f32.mrf.mxu1  ;;  %v3320_v52 = vsub.f32 1.0, %v3319_v30  ;;  %vm3308_vm14 = vweird.f32 %v7591_v1  ;;  %vm3343_vm1 = vcmp.eq.f32.partialorder %v3342_v46, 8.507059e+37 }
 0x4c7   :  { %v4830_v34 = vpop.eup %4829  ;;  %4833 = vtanh.f32 %v3209_v2  ;;  %v3344_v2 = vand.u32 2147483648, %v7577_v57  ;;  %v3197_v19 = vadd.f32 %v3196_v16, %v1407_v55  ;;  %v3337_v32 = vadd.f32 %v7587_v41, %v3336_v24 }
 0x4c8   :  { %v4832_v6 = vpop.eup %4831  ;;  %v7630_v10 = vadd.f32 1.0, %v4830_v34  ;;  %v3224_v34 = vpop.f32.mrf.mxu0  ;;  %vm3354_vm2 = vweird.f32 %v7596_v44  ;;  %vm3324_vm4 = vweird.f32 %v7614_v43  ;;  %v8517_v24 = vsel %vm7624_vm8, %v7569_v7, %v7608_v62 }
 0x4c9   :  { %v3304_v51 = vmul.f32 %v4832_v6, %v7591_v1  ;;  %vm3309_vm12 = vweird.f32 %v4832_v6  ;;  %v3225_v25 = vadd.f32 %v3224_v34, %v1440_v26  ;;  %v3341_v26 = vsel %vm7657_vm13, %v7587_v41, %v3337_v32 }
 0x4ca   :  { %4835 = vrcp.f32 %v7630_v10  ;;  %vm3310_vm15 = vmor %vm3308_vm14, %vm3309_vm12  ;;  %v3329_v32 = vand.u32 2147483648, %v7583_v28  ;;  %vm3368_vm5 = vweird.f32 %v7630_v10  ;;  %vm3323_vm8 = vweird.f32 %v7583_v28 }
 0x4cb   :  { %v3305_v40 = vsub.f32 1.0, %v3304_v51  ;;  %4837 = vrcp.f32 %v7620_v3  ;;  %v3312_v51 = vand.u32 2147483647, %v7591_v1  ;;  %v3321_v1 = vmul.f32 %v7614_v43, %v3320_v52  ;;  %vm7697_vm9 = vmor %vm3323_vm8, %vm3324_vm4 }
 0x4cc   :  { %4839 = vtanh.f32 %v3237_v15  ;;  %v3210_v42 = vpop.f32.mrf.mxu3  ;;  %v3399_v15 = vmul.f32 %v3397_v47, %v7408_v48  ;;  %v3239_v48 = vadd.f32 %v3238_v63, %v3225_v25  ;;  %v3372_v25 = vand.u32 2147483647, %v7630_v10 }
 0x4cd   :  { %v4834_v50 = vpop.eup %4833  ;;  %v3306_v29 = vmul.f32 %v4832_v6, %v3305_v40  ;;  %v3211_v16 = vadd.f32 %v3210_v42, %v3197_v19  ;;  %v3315_v40 = vor.u32 1.1754944e-38, %v3314_v11  ;;  %vm3313_vm0 = vcmp.eq.f32.partialorder %v3312_v51, 8.507059e+37 }
 0x4ce   :  { %v3401_v55 = vmul.f32 %v4834_v50, %v3286_v56  ;;  %v3345_v56 = vor.u32 1.1754944e-38, %v3344_v2  ;;  %vm3373_vm7 = vcmp.eq.f32.partialorder %v3372_v25, 8.507059e+37  ;;  %vm3353_vm10 = vweird.f32 %v7575_v35 }
 0x4cf   :  { %v3307_v22 = vadd.f32 %v4832_v6, %v3306_v29  ;;  %4841 = vtanh.f32 %v3211_v16 }
 0x4d0   :  { %v4836_v34 = vpop.eup %4835  ;;  %v3403_v30 = vadd.f32 %v3401_v55, %v3399_v15  ;;  %v3346_v41 = vsel %vm3343_vm1, %v3345_v56, %v3341_v26  ;;  %v8516_v55 = vsub.f32 1.0, %v7612_v49 }
 0x4d1   :  { %v7665_v50 = vpop.eup %4837  ;;  %v3364_v57 = vmul.f32 %v4836_v34, %v7630_v10  ;;  %v3311_v47 = vsel %vm3310_vm15, %v4832_v6, %v3307_v22  ;;  %v3374_v6 = vand.u32 2147483648, %v7630_v10  ;;  %v3398_v46 = vsub.f32 1.0, %v3346_v41 }
 0x4d2   :  { %v4840_v29 = vpop.eup %4839  ;;  %v3316_v11 = vsel %vm3313_vm0, %v3315_v40, %v3311_v47  ;;  %4843 = vtanh.f32 %v3403_v30  ;;  %v3379_v2 = vmul.f32 %v7665_v50, %v7620_v3  ;;  %vm3369_vm3 = vweird.f32 %v4836_v34 }
 0x4d3   :  { %v3365_v19 = vsub.f32 1.0, %v3364_v57  ;;  %v3409_v42 = vsub.f32 1.0, %v3316_v11  ;;  %v3413_v63 = vmul.f32 %v4840_v29, %v3316_v11  ;;  %4845 = vtanh.f32 %v3239_v48  ;;  %vm3370_vm6 = vmor %vm3368_vm5, %vm3369_vm3 }
 0x4d4   :  { %v3351_v16 = vmul.f32 %v7596_v44, %v8516_v55  ;;  %v3301_v22 = vsel %vm7649_vm11, %v7628_v12, %v8517_v24  ;;  %v3400_v26 = vmul.f32 %v3398_v46, %v7443_v58  ;;  %v3322_v48 = vadd.f32 %v7614_v43, %v3321_v1  ;;  %vm7709_vm11 = vmor %vm3353_vm10, %vm3354_vm2 }
 0x4d5   :  { %v3411_v51 = vmul.f32 %v3409_v42, %v7450_v54  ;;  %v3366_v52 = vmul.f32 %v4836_v34, %v3365_v19  ;;  %v4842_v15 = vpop.eup %4841  ;;  %v3380_v56 = vsub.f32 1.0, %v3379_v2  ;;  %v3375_v38 = vor.u32 1.1754944e-38, %v3374_v6 }
 0x4d6   :  { %v3402_v49 = vmul.f32 %v4842_v15, %v3346_v41  ;;  %v3352_v12 = vadd.f32 %v7596_v44, %v3351_v16  ;;  %v3327_v10 = vand.u32 2147483647, %v7583_v28  ;;  %v3359_v47 = vand.u32 2147483648, %v7575_v35 }
 0x4d7   :  { %v3415_v54 = vadd.f32 %v3413_v63, %v3411_v51  ;;  %v3367_v40 = vadd.f32 %v4836_v34, %v3366_v52  ;;  %v3326_v28 = vsel %vm7697_vm9, %v7614_v43, %v3322_v48  ;;  %v3381_v41 = vmul.f32 %v7665_v50, %v3380_v56  ;;  %v8536_v56 = vld [vmem:[#allocation135_spill] sm:$0xff] }
 0x4d8   :  { %v4844_v30 = vpop.eup %4843  ;;  %v3404_v57 = vadd.f32 %v3402_v49, %v3400_v26  ;;  %v3330_v42 = vor.u32 1.1754944e-38, %v3329_v32  ;;  %v3356_v25 = vsel %vm7709_vm11, %v7596_v44, %v3352_v12  ;;  %vm3328_vm12 = vcmp.eq.f32.partialorder %v3327_v10, 8.507059e+37  ;;  %v8534_v26 = vld [vmem:[#allocation134_spill] sm:$0xff] }
 0x4d9   :  { %4847 = vtanh.f32 %v3415_v54  ;;  %v3407_v62 = vmul.f32 %v4844_v30, %v3301_v22  ;;  %v3371_v7 = vsel %vm3370_vm6, %v4836_v34, %v3367_v40  ;;  %v4846_v36 = vpop.eup %4845  ;;  %v3357_v34 = vand.u32 2147483647, %v7575_v35  ;;  %v8535_v30 = vld [vmem:[#allocation100_spill] sm:$0xff] }
 0x4da   :  { %v3376_v58 = vsel %vm3373_vm7, %v3375_v38, %v3371_v7  ;;  %4849 = vtanh.f32 %v3404_v57  ;;  %v3360_v2 = vor.u32 1.1754944e-38, %v3359_v47  ;;  %v3331_v6 = vsel %vm3328_vm12, %v3330_v42, %v3326_v28 }
 0x4db   :  { %v3410_v1 = vsub.f32 1.0, %v3376_v58  ;;  %v3414_v11 = vmul.f32 %v4846_v36, %v3376_v58  ;;  %vm3358_vm13 = vcmp.eq.f32.partialorder %v3357_v34, 8.507059e+37  ;;  %v3382_v46 = vadd.f32 %v7665_v50, %v3381_v41  ;;  %v8538_v34 = vld [vmem:[#allocation137_spill] sm:$0xff] }
 0x4dc   :  { %vm3384_vm14 = vweird.f32 %v7665_v50  ;;  %v3389_v32 = vand.u32 2147483648, %v7620_v3  ;;  %vm3383_vm15 = vweird.f32 %v7620_v3  ;;  %v3387_v44 = vand.u32 2147483647, %v7620_v3 }
 0x4dd   :  { %v3412_v63 = vmul.f32 %v3410_v1, %v7438_v17  ;;  %v3361_v17 = vsel %vm3358_vm13, %v3360_v2, %v3356_v25  ;;  %vm3385_vm0 = vmor %vm3383_vm15, %vm3384_vm14  ;;  %v8537_v1 = vld [vmem:[#allocation108_spill] sm:$0xff]  ;;  %v8539_v2 = vld [vmem:[#allocation107_spill] sm:$0xff] }
 0x4de   :  { %v3386_v55 = vsel %vm3385_vm0, %v7665_v50, %v3382_v46  ;;  %v3390_v24 = vor.u32 1.1754944e-38, %v3389_v32  ;;  %vm3388_vm1 = vcmp.eq.f32.partialorder %v3387_v44, 8.507059e+37  ;;  %v8540_v32 = vld [vmem:[#allocation136_spill] sm:$0xff] }
 0x4df   :  { %v4848_v35 = vpop.eup %4847  ;;  %v3416_v43 = vadd.f32 %v3414_v11, %v3412_v63 }
 0x4e0   :  { %v7719_v51 = vmul.f32 %v4848_v35, %v3331_v6  ;;  %v4850_v52 = vpop.eup %4849  ;;  %v3391_v54 = vsel %vm3388_vm1, %v3390_v24, %v3386_v55 }
 0x4e1   :  { %4851 = vtanh.f32 %v3416_v43  ;;  %v7724_v15 = vmul.f32 %v4850_v52, %v3361_v17 }
 0x4e3   :  { %v3421_v16 = vpack.c.bf16 %v7724_v15, %v3407_v62 }
 0x4e5   :  { %3431 = vmatmul.bf16.vlgmr.msrb.gmra.mxu2 %v3421_v16  ;;  %3457 = vmatmul.bf16.vlgmr.msrb.gmra.mxu0 %v3421_v16 }
 0x4e6   :  { %3527 = vmatpush.bf16.msrb.mxu2 %v8214_v23  ;;  %3553 = vmatpush.bf16.msrb.mxu0 %v8215_v53  ;;  %v8522_v23 = vld [vmem:[#allocation96_spill] sm:$0xff]  ;;  %v8523_v53 = vld [vmem:[#allocation89_spill] sm:$0xff] }
 0x4e7   :  { %v4852_v22 = vpop.eup %4851 }
 0x4e8   :  { %v3420_v40 = vmul.f32 %v4852_v22, %v3391_v54 }
 0x4ea   :  { %v3422_v3 = vpack.c.bf16 %v7719_v51, %v3420_v40  ;;  %3528 = vmatpush.bf16.msrb.mxu2 %v8216_v20  ;;  %3554 = vmatpush.bf16.msrb.mxu0 %v8217_v8  ;;  %v8524_v20 = vld [vmem:[#allocation103_spill] sm:$0xff]  ;;  %v8525_v8 = vld [vmem:[#allocation86_spill] sm:$0xff] }
 0x4ec   :  { %3444 = vmatmul.bf16.vlgmr.msrb.gmra.mxu3 %v3422_v3  ;;  %3470 = vmatmul.bf16.vlgmr.msrb.gmra.mxu1 %v3422_v3 }
 0x4ed   :  { %3540 = vmatpush.bf16.msrb.mxu3 %v8228_v60  ;;  %3566 = vmatpush.bf16.msrb.mxu1 %v8229_v31 }
 0x4ee   :  { %3529 = vmatpush.bf16.msrb.mxu2 %v8218_v0  ;;  %3555 = vmatpush.bf16.msrb.mxu0 %v8219_v21  ;;  %v8526_v0 = vld [vmem:[#allocation101_spill] sm:$0xff] }
 0x4ef   :  { %v8527_v21 = vld [vmem:[#allocation97_spill] sm:$0xff] }
 0x4f1   :  { %3541 = vmatpush.bf16.msrb.mxu3 %v8231_v45  ;;  %3567 = vmatpush.bf16.msrb.mxu1 %v8232_v14  ;;  %v939_v14 = vpop.permute.xlu0 %938 }
 0x4f2   :  { %3530 = vmatpush.bf16.msrb.mxu2 %v8220_v4  ;;  %3556 = vmatpush.bf16.msrb.mxu0 %v8221_v27  ;;  %v8528_v4 = vld [vmem:[#allocation109_spill] sm:$0xff]  ;;  %v8529_v27 = vld [vmem:[#allocation90_spill] sm:$0xff]  ;;  %v1003_v48 = vmul.f32 %v8535_v30, %v939_v14  ;;  %v1005_v11 = vmul.f32 %v8537_v1, %v939_v14  ;;  %v1004_v6 = vmul.f32 %v8539_v2, %v939_v14  ;;  %v8544_v30 = vld [vmem:[#allocation148_spill] sm:$0xff] }
 0x4f4   :  { %v1312_v38 = vadd.f32 %v8536_v56, %v1003_v48  ;;  %v1378_v28 = vadd.f32 %v8538_v34, %v1005_v11  ;;  %v1345_v17 = vadd.f32 %v8540_v32, %v1004_v6 }
 0x4f5   :  { %3542 = vmatpush.bf16.msrb.mxu3 %v8233_v59  ;;  %3568 = vmatpush.bf16.msrb.mxu1 %v8234_v13 }
 0x4f6   :  { %3483 = vmatmul.bf16.vlgmr.msra.gmra.mxu2 %v3421_v16  ;;  %3509 = vmatmul.bf16.vlgmr.msra.gmra.mxu0 %v3421_v16 }
 0x4f7   :  { %3531 = vmatpush.bf16.msrb.mxu2 %v8222_v39  ;;  %3557 = vmatpush.bf16.msrb.mxu0 %v8223_v37  ;;  %v8531_v39 = vld [vmem:[#allocation98_spill] sm:$0xff] }
 0x4f8   :  { %v8532_v37 = vld [vmem:[#allocation110_spill] sm:$0xff] }
 0x4f9   :  { %3543 = vmatpush.bf16.msrb.mxu3 %v8235_v33  ;;  %3569 = vmatpush.bf16.msrb.mxu1 %v8236_v18  ;;  %v8533_v18 = vld [vmem:[#allocation99_spill] sm:$0xff] }
 0x4fb   :  { %3532 = vmatpush.bf16.msrb.mxu2 %v8224_v5  ;;  %3558 = vmatpush.bf16.msrb.mxu0 %v6438_v61  ;;  %v8530_v61 = vld [vmem:[#allocation104_spill] sm:$0xff] }
 0x4fc   :  { %3496 = vmatmul.bf16.vlgmr.msra.gmra.mxu3 %v3422_v3  ;;  %3522 = vmatmul.bf16.vlgmr.msra.gmra.mxu1 %v3422_v3 }
 0x4fd   :  { %3544 = vmatpush.bf16.msrb.mxu3 %v8237_v9  ;;  %3570 = vmatpush.bf16.msrb.mxu1 %v8522_v23  ;;  %v1002_v9 = vmul.f32 %v8533_v18, %v939_v14  ;;  %v8543_v18 = vld [vmem:[#allocation139_spill] sm:$0xff] }
 0x4ff   :  { %3533 = vmatpush.bf16.msrb.mxu2 %v8523_v53  ;;  %3559 = vmatpush.bf16.msrb.mxu0 %v8524_v20  ;;  %v1279_v49 = vadd.f32 %v8534_v26, %v1002_v9  ;;  %v1007_v9 = vmul.f32 %v8543_v18, %v939_v14 }
 0x501   :  { %3545 = vmatpush.bf16.msrb.mxu3 %v8525_v8  ;;  %3571 = vmatpush.bf16.msrb.mxu1 %v8526_v0  ;;  %v1444_v48 = vadd.f32 %v8544_v30, %v1007_v9 }
 0x503   :  { %3534 = vmatpush.bf16.msrb.mxu2 %v8527_v21  ;;  %3560 = vmatpush.bf16.msrb.mxu0 %v8528_v4 }
 0x505   :  { %3546 = vmatpush.bf16.msrb.mxu3 %v8529_v27  ;;  %3572 = vmatpush.bf16.msrb.mxu1 %v8530_v61  ;;  %v8541_v61 = vld [vmem:[#allocation138_spill] sm:$0xff] }
 0x506   :  { %3535 = vmatmul.bf16.vlgmr.msrb.gmra.mxu2 %v3421_v16  ;;  %3561 = vmatmul.bf16.vlgmr.msrb.gmra.mxu0 %v3421_v16 }
 0x509   :  { %3547 = vmatpush.bf16.msrb.mxu3 %v8531_v39  ;;  %3573 = vmatpush.bf16.msrb.mxu1 %v8532_v37  ;;  %v1006_v39 = vmul.f32 %v8541_v61, %v939_v14  ;;  %v17_v14 = vstv %s7815_s11 }
 0x50a   :  { %18 = vst [vmem:[#allocation2] sm:$0x1] %v17_v14 }
 0x50c   :  { %3548 = vmatmul.bf16.vlgmr.msrb.gmra.mxu3 %v3422_v3  ;;  %3574 = vmatmul.bf16.vlgmr.msrb.gmra.mxu1 %v3422_v3 }
 0x562   :  { %v3458_v5 = vpop.f32.mrf.mxu0 }
 0x568   :  { %v3432_v60 = vpop.f32.mrf.mxu2 }
 0x569   :  { %v3471_v31 = vpop.f32.mrf.mxu1 }
 0x56a   :  { %v3459_v45 = vpop.f32.mrf.mxu0 }
 0x56b   :  { %v3460_v57 = vadd.f32 %v3459_v45, %v1312_v38  ;;  %v8542_v45 = vld [vmem:[#allocation147_spill] sm:$0xff] }
 0x56f   :  { %v3445_v59 = vpop.f32.mrf.mxu3 }
 0x570   :  { %v3433_v13 = vpop.f32.mrf.mxu2  ;;  %v1411_v59 = vadd.f32 %v8542_v45, %v1006_v39 }
 0x571   :  { %v3472_v33 = vpop.f32.mrf.mxu1  ;;  %v3434_v62 = vadd.f32 %v3433_v13, %v1279_v49 }
 0x572   :  { %v3473_v58 = vadd.f32 %v3472_v33, %v3460_v57 }
 0x573   :  { %v3510_v50 = vpop.f32.mrf.mxu0 }
 0x574   :  { %v4473_v41 = vmul.f32 -1.442695, %v3473_v58 }
 0x577   :  { %v3446_v7 = vpop.f32.mrf.mxu3 }
 0x578   :  { %v3447_v36 = vadd.f32 %v3446_v7, %v3434_v62 }
 0x579   :  { %v3484_v12 = vpop.f32.mrf.mxu2  ;;  %v3523_v10 = vpop.f32.mrf.mxu1 }
 0x57a   :  { %v4472_v47 = vmul.f32 -1.442695, %v3447_v36 }
 0x57b   :  { %v3511_v29 = vpop.f32.mrf.mxu0 }
 0x57c   :  { %4853 = vpow2.f32 %v4472_v47  ;;  %v3512_v42 = vadd.f32 %v3511_v29, %v1378_v28 }
 0x57d   :  { %4855 = vpow2.f32 %v4473_v41 }
 0x57f   :  { %v3497_v19 = vpop.f32.mrf.mxu3 }
 0x581   :  { %v3485_v63 = vpop.f32.mrf.mxu2  ;;  %v3524_v25 = vpop.f32.mrf.mxu1 }
 0x582   :  { %v4854_v35 = vpop.eup %4853  ;;  %v3525_v43 = vadd.f32 %v3524_v25, %v3512_v42  ;;  %v3486_v55 = vadd.f32 %v3485_v63, %v1345_v17 }
 0x583   :  { %v3591_v46 = vadd.f32 1.0, %v4854_v35  ;;  %v3562_v52 = vpop.f32.mrf.mxu0  ;;  %v4856_v24 = vpop.eup %4855 }
 0x584   :  { %v4475_v44 = vmul.f32 -1.442695, %v3525_v43  ;;  %v7769_v53 = vadd.f32 1.0, %v4856_v24 }
 0x585   :  { %4857 = vrcp.f32 %v3591_v46  ;;  %v3606_v13 = vand.u32 2147483648, %v3591_v46  ;;  %vm3600_vm3 = vweird.f32 %v3591_v46  ;;  %v3604_v50 = vand.u32 2147483647, %v3591_v46 }
 0x586   :  { %4859 = vpow2.f32 %v4475_v44  ;;  %v3621_v24 = vand.u32 2147483648, %v7769_v53  ;;  %vm3615_vm11 = vweird.f32 %v7769_v53 }
 0x587   :  { %v3498_v16 = vpop.f32.mrf.mxu3  ;;  %v3607_v36 = vor.u32 1.1754944e-38, %v3606_v13  ;;  %vm3605_vm5 = vcmp.eq.f32.partialorder %v3604_v50, 8.507059e+37  ;;  %v4660_v50 = vld [vmem:[#allocation2] ss:$0 sm:$0xff] }
 0x588   :  { %v3499_v22 = vadd.f32 %v3498_v16, %v3486_v55 }
 0x589   :  { %v3536_v54 = vpop.f32.mrf.mxu2  ;;  %v3575_v40 = vpop.f32.mrf.mxu1 }
 0x58a   :  { %v4474_v3 = vmul.f32 -1.442695, %v3499_v22  ;;  %v3619_v54 = vand.u32 2147483647, %v7769_v53 }
 0x58b   :  { %v4858_v23 = vpop.eup %4857  ;;  %v3563_v26 = vpop.f32.mrf.mxu0 }
 0x58c   :  { %v3596_v20 = vmul.f32 %v4858_v23, %v3591_v46  ;;  %4861 = vpow2.f32 %v4474_v3  ;;  %v4860_v0 = vpop.eup %4859  ;;  %vm3601_vm2 = vweird.f32 %v4858_v23  ;;  %v3564_v12 = vadd.f32 %v3563_v26, %v1444_v48 }
 0x58d   :  { %4863 = vrcp.f32 %v7769_v53  ;;  %v7773_v37 = vadd.f32 1.0, %v4860_v0  ;;  %vm3602_vm4 = vmor %vm3600_vm3, %vm3601_vm2  ;;  %vm3620_vm13 = vcmp.eq.f32.partialorder %v3619_v54, 8.507059e+37  ;;  %vm3686_vm2 = vcmask 7168  }
 0x58e   :  { %v3597_v8 = vsub.f32 1.0, %v3596_v20  ;;  %v3622_v20 = vor.u32 1.1754944e-38, %v3621_v24 }
 0x58f   :  { %v3549_v21 = vpop.f32.mrf.mxu3  ;;  %vm3645_vm15 = vweird.f32 %v7773_v37 }
 0x590   :  { %v3598_v4 = vmul.f32 %v4858_v23, %v3597_v8 }
 0x591   :  { %v3537_v60 = vpop.f32.mrf.mxu2  ;;  %v3576_v7 = vpop.f32.mrf.mxu1 }
 0x592   :  { %v4862_v27 = vpop.eup %4861  ;;  %v3599_v31 = vadd.f32 %v4858_v23, %v3598_v4  ;;  %v3538_v49 = vadd.f32 %v3537_v60, %v1411_v59  ;;  %v3577_v47 = vadd.f32 %v3576_v7, %v3564_v12 }
 0x593   :  { %v3593_v5 = vadd.f32 1.0, %v4862_v27  ;;  %v7776_v33 = vpop.eup %4863  ;;  %v3651_v27 = vand.u32 2147483648, %v7773_v37 }
 0x594   :  { %v3603_v38 = vsel %vm3602_vm4, %v4858_v23, %v3599_v31  ;;  %v3611_v62 = vmul.f32 %v7776_v33, %v7769_v53  ;;  %vm3616_vm10 = vweird.f32 %v7776_v33  ;;  %v3649_v53 = vand.u32 2147483647, %v7773_v37 }
 0x595   :  { %4865 = vrcp.f32 %v3593_v5  ;;  %v3608_v10 = vsel %vm3605_vm5, %v3607_v36, %v3603_v38  ;;  %v3636_v19 = vand.u32 2147483648, %v3593_v5  ;;  %v3634_v25 = vand.u32 2147483647, %v3593_v5  ;;  %vm3617_vm12 = vmor %vm3615_vm11, %vm3616_vm10 }
 0x596   :  { %4867 = vrcp.f32 %v7773_v37  ;;  %v3612_v1 = vsub.f32 1.0, %v3611_v62  ;;  %v3657_v34 = vsub.f32 1.0, %v3608_v10  ;;  %vm3630_vm7 = vweird.f32 %v3593_v5 }
 0x597   :  { %v3550_v56 = vpop.f32.mrf.mxu3  ;;  %v3637_v52 = vor.u32 1.1754944e-38, %v3636_v19  ;;  %vm3635_vm9 = vcmp.eq.f32.partialorder %v3634_v25, 8.507059e+37  ;;  %vm3650_vm1 = vcmp.eq.f32.partialorder %v3649_v53, 8.507059e+37 }
 0x598   :  { %v3551_v57 = vadd.f32 %v3550_v56, %v3538_v49  ;;  %v3613_v35 = vmul.f32 %v7776_v33, %v3612_v1  ;;  %v3658_v2 = vmul.f32 %v3657_v34, %v7724_v15 }
 0x59a   :  { %4869 = vtanh.f32 %v3551_v57  ;;  %v3614_v44 = vadd.f32 %v7776_v33, %v3613_v35 }
 0x59b   :  { %v4866_v58 = vpop.eup %4865  ;;  %4871 = vtanh.f32 %v3577_v47 }
 0x59c   :  { %v4868_v29 = vpop.eup %4867  ;;  %v3626_v11 = vmul.f32 %v4866_v58, %v3593_v5  ;;  %vm3631_vm6 = vweird.f32 %v4866_v58  ;;  %v3618_v23 = vsel %vm3617_vm12, %v7776_v33, %v3614_v44  ;;  %v3652_v5 = vor.u32 1.1754944e-38, %v3651_v27 }
 0x59d   :  { %v3641_v41 = vmul.f32 %v4868_v29, %v7773_v37  ;;  %vm3632_vm8 = vmor %vm3630_vm7, %vm3631_vm6  ;;  %v3623_v21 = vsel %vm3620_vm13, %v3622_v20, %v3618_v23  ;;  %vm3646_vm14 = vweird.f32 %v4868_v29 }
 0x59e   :  { %v3627_v28 = vsub.f32 1.0, %v3626_v11  ;;  %vm3647_vm0 = vmor %vm3645_vm15, %vm3646_vm14 }
 0x59f   :  { %v3642_v46 = vsub.f32 1.0, %v3641_v41 }
 0x5a0   :  { %v4870_v42 = vpop.eup %4869  ;;  %v3628_v63 = vmul.f32 %v4866_v58, %v3627_v28 }
 0x5a1   :  { %v3659_v6 = vmul.f32 %v4870_v42, %v3608_v10  ;;  %v4872_v55 = vpop.eup %4871  ;;  %v3643_v40 = vmul.f32 %v4868_v29, %v3642_v46 }
 0x5a2   :  { %v3629_v43 = vadd.f32 %v4866_v58, %v3628_v63 }
 0x5a3   :  { %v3660_v32 = vadd.f32 %v3659_v6, %v3658_v2  ;;  %v3644_v4 = vadd.f32 %v4868_v29, %v3643_v40 }
 0x5a4   :  { %v3633_v17 = vsel %vm3632_vm8, %v4866_v58, %v3629_v43 }
 0x5a5   :  { %v3638_v16 = vsel %vm3635_vm9, %v3637_v52, %v3633_v17  ;;  %4873 = vtanh.f32 %v3660_v32  ;;  %v3648_v39 = vsel %vm3647_vm0, %v4868_v29, %v3644_v4 }
 0x5a6   :  { %v3663_v22 = vsub.f32 1.0, %v3638_v16  ;;  %v3665_v15 = vmul.f32 %v4872_v55, %v3638_v16  ;;  %v3653_v59 = vsel %vm3650_vm1, %v3652_v5, %v3648_v39 }
 0x5a8   :  { %v3664_v3 = vmul.f32 %v3663_v22, %v7719_v51  ;;  %v3669_v51 = vld [vmem:[%s7816_s10] sm:$0x3] }
 0x5a9   :  { %v3671_v60 = vperm.slane %v3669_v51, 0  ;;  %v3672_v31 = vperm.slane %v3669_v51, 1 }
 0x5aa   :  { %v3666_v8 = vadd.f32 %v3665_v15, %v3664_v3 }
 0x5ab   :  { %v4874_v0 = vpop.eup %4873 }
 0x5ac   :  { %4875 = vtanh.f32 %v3666_v8  ;;  %v3662_v61 = vmul.f32 %v4874_v0, %v3623_v21 }
 0x5ae   :  { %v3676_v18 = vmul.f32 %v3672_v31, %v3662_v61 }
 0x5b2   :  { %v4876_v45 = vpop.eup %4875 }
 0x5b3   :  { %v3668_v13 = vmul.f32 %v4876_v45, %v3653_v59 }
 0x5b5   :  { %v3675_v33 = vmul.f32 %v3671_v60, %v3668_v13 }
 0x5b7   :  { %v3677_v9 = vadd.f32 %v3676_v18, %v3675_v33 }
 0x5b9   :  { %3678 = vadd.xlane.f32.xlu1 %v3677_v9 }
 0x62c   :  { %v3679_v26 = vpop.xlane.xlu1 %3678 }
 0x62d   :  { %v3680_v37 = vmul.f32 0.5, %v3679_v26 }
 0x62f   :  { %v3685_v49 = vadd.f32 %v4660_v50, %v3680_v37 }
 0x631   :  { %3687 = vst.msk [vmem:[%s7817_s12] sm:$0xff] %vm3686_vm2, %v3685_v49 }

</bundles_post_ra>
